<compile_context>
chip_gen: v7x
topology: tpu7x:2x2x1
jax: 0.10.0
libtpu: 0.0.40
codegen_flags: <defaults>
</compile_context>

<pallas_src>
import functools

import jax
import jax.numpy as jnp
from jax.experimental import pallas as pl
from jax.experimental.pallas import tpu as pltpu


# --------------------------------------------------------------------------
# Fused kernel: conv3x3 (+folded BN) + ReLU + conv1x1, one batch element/step
# --------------------------------------------------------------------------

def _adapter_kernel(x_ref, w1_ref, b1_ref, w2_ref, b2_ref, o_ref, col_ref,
                    *, H, W, Cin, Cmid, Cout):
    # x_ref:   (1, H*W, Cin)       bf16 input rows (NHWC, one batch element)
    # w1_ref:  (3, 3*Cin, Cmid)    bf16 3x3 weight, one (kw,ci)-major slab per
    #                              kh; BN scale folded; Cmid zero-padded to 256
    # b1_ref:  (1, Cmid)           f32 folded BN bias (conv1 bias folded in)
    # w2_ref:  (Cmid, Cout)        bf16 1x1 weight (padded rows are zero)
    # b2_ref:  (1, Cout)           f32 1x1 bias
    # o_ref:   (1, H*W, Cout)      f32 output rows
    # col_ref: (H*W + 2*W, 3*Cin)  bf16 horizontal im2col with W zero rows of
    #                              vertical padding at top and bottom
    HW = H * W
    x_bf = x_ref[0]                            # (HW, Cin) bf16
    x32 = x_bf.astype(jnp.float32)             # 32-bit path for sublane roll

    # Horizontal (kw) neighbours: roll the flattened rows by +/-1 and zero the
    # positions that fall outside the image row (w == 0 / w == W-1).
    w_idx = jax.lax.broadcasted_iota(jnp.int32, (HW, 1), 0) % W
    left = jnp.where(w_idx == 0, 0.0, jnp.roll(x32, 1, axis=0))
    right = jnp.where(w_idx == W - 1, 0.0, jnp.roll(x32, -1, axis=0))

    # Vertical (kh) zero padding: only 2*W rows.  Written every step since the
    # scratch is per-core (no program_id==0 guard -- v7x core-parallel safe).
    zero_rows = jnp.zeros((W, 3 * Cin), col_ref.dtype)
    col_ref[0:W, :] = zero_rows
    col_ref[W + HW:, :] = zero_rows
    # Lane/sublane-aligned stores of the three kw taps (offsets 0/Cin/2*Cin).
    col_ref[W:W + HW, 0:Cin] = left.astype(col_ref.dtype)
    col_ref[W:W + HW, Cin:2 * Cin] = x_bf
    col_ref[W:W + HW, 2 * Cin:] = right.astype(col_ref.dtype)

    # conv3x3 == three K=3*Cin bf16 MXU matmuls; the vertical taps are plain
    # row offsets (0, W, 2W) into col_ref.  f32 accumulation.
    h = (jnp.dot(col_ref[0:HW, :], w1_ref[0],
                 preferred_element_type=jnp.float32)
         + jnp.dot(col_ref[W:W + HW, :], w1_ref[1],
                   preferred_element_type=jnp.float32)
         + jnp.dot(col_ref[2 * W:2 * W + HW, :], w1_ref[2],
                   preferred_element_type=jnp.float32))

    # Folded-BN bias + ReLU epilogue (scale already folded into w1).
    h = jnp.maximum(h + b1_ref[...], 0.0)

    # conv1x1 + bias.
    y = jnp.dot(h.astype(w2_ref.dtype), w2_ref[...],
                preferred_element_type=jnp.float32)
    o_ref[0] = y + b2_ref[...]


# --------------------------------------------------------------------------
# Wrapper (NCHW in / NCHW out, like the PyTorch module)
# --------------------------------------------------------------------------

def dimension_adapter(x_nchw, params):
    w1, b1 = params["conv1"]              # (3, 3*Cin, Cmid) bf16, (Cmid,) f32
    w2, b2 = params["conv2"]              # (Cmid, Cout) bf16, (Cout,) f32
    N, Cin, H, W = x_nchw.shape
    Cmid, Cout = w2.shape
    HW = H * W

    # One fused relayout+cast pass: NCHW f32 -> (N, H*W, Cin) bf16.
    x = jnp.transpose(x_nchw, (0, 2, 3, 1)).astype(jnp.bfloat16).reshape(N, HW, Cin)

    kernel = functools.partial(_adapter_kernel, H=H, W=W, Cin=Cin,
                               Cmid=Cmid, Cout=Cout)

    out = pl.pallas_call(
        kernel,
        out_shape=jax.ShapeDtypeStruct((N, HW, Cout), jnp.float32),
        grid=(N,),
        in_specs=[
            pl.BlockSpec((1, HW, Cin), lambda n: (n, 0, 0)),
            pl.BlockSpec((3, 3 * Cin, Cmid), lambda n: (0, 0, 0)),
            pl.BlockSpec((1, Cmid), lambda n: (0, 0)),
            pl.BlockSpec((Cmid, Cout), lambda n: (0, 0)),
            pl.BlockSpec((1, Cout), lambda n: (0, 0)),
        ],
        out_specs=pl.BlockSpec((1, HW, Cout), lambda n: (n, 0, 0)),
        scratch_shapes=[pltpu.VMEM((HW + 2 * W, 3 * Cin), jnp.bfloat16)],
        compiler_params=pltpu.CompilerParams(
            # batch elements are independent -> both v7x TensorCores used
            dimension_semantics=("parallel",)),
    )(x, w1, b1.reshape(1, Cmid), w2, b2.reshape(1, Cout))

    return jnp.transpose(out.reshape(N, H, W, Cout), (0, 3, 1, 2))


# --------------------------------------------------------------------------
# Deterministic synthetic parameters (BN folded into conv1, inference mode)
# --------------------------------------------------------------------------

def init_params(key, input_dim=256, output_dim=128, hidden=192):
    k = jax.random.split(key, 8)
    # conv1 (3x3) + BatchNorm (inference mode)
    w1 = jax.random.normal(k[0], (3, 3, input_dim, hidden), jnp.float32) * 0.05
    b1 = jax.random.normal(k[1], (hidden,), jnp.float32) * 0.05
    gamma = jax.random.uniform(k[2], (hidden,), jnp.float32, 0.5, 1.5)
    beta = jax.random.normal(k[3], (hidden,), jnp.float32) * 0.1
    rmean = jax.random.normal(k[4], (hidden,), jnp.float32) * 0.1
    rvar = jax.random.uniform(k[5], (hidden,), jnp.float32, 0.5, 1.5)
    scale = gamma / jnp.sqrt(rvar + 1e-5)
    bias1 = beta + (b1 - rmean) * scale
    # fold BN scale into conv1 weights (exact for inference), in f32
    w1 = w1 * scale[None, None, None, :]
    # conv2 (1x1)
    w2 = jax.random.normal(k[6], (hidden, output_dim), jnp.float32) * 0.05
    b2 = jax.random.normal(k[7], (output_dim,), jnp.float32) * 0.05

    # pad hidden 192 -> 256 so the hidden activation uses full (8,128) tiles
    hidden_pad = ((hidden + 127) // 128) * 128
    pad = hidden_pad - hidden
    w1 = jnp.pad(w1, ((0, 0), (0, 0), (0, 0), (0, pad)))
    bias1 = jnp.pad(bias1, (0, pad))
    w2 = jnp.pad(w2, ((0, pad), (0, 0)))

    # (kh, kw, cin, cout) -> (kh, kw*cin, cout): row order matches the
    # [left | centre | right] (kw-major, channel-minor) col layout.
    w1 = w1.reshape(3, 3 * input_dim, hidden_pad).astype(jnp.bfloat16)
    w2 = w2.astype(jnp.bfloat16)
    return {"conv1": (w1, bias1), "conv2": (w2, b2)}


# --------------------------------------------------------------------------
# Pure-JAX f32 reference (independent of the kernel's indexing tricks)
# --------------------------------------------------------------------------

def _reference(x_nchw, params):
    w1, b1 = params["conv1"]
    w2, b2 = params["conv2"]
    Cin = x_nchw.shape[1]
    Cmid = w1.shape[-1]
    x = jnp.transpose(x_nchw, (0, 2, 3, 1)).astype(jnp.float32)      # NHWC
    w1_hwio = w1.astype(jnp.float32).reshape(3, 3, Cin, Cmid)
    h = jax.lax.conv_general_dilated(
        x, w1_hwio, window_strides=(1, 1), padding="SAME",
        dimension_numbers=("NHWC", "HWIO", "NHWC"),
        precision=jax.lax.Precision.HIGHEST) + b1
    h = jnp.maximum(h, 0.0)
    y = jnp.einsum("nhwc,cd->nhwd", h, w2.astype(jnp.float32),
                   precision=jax.lax.Precision.HIGHEST) + b2
    return jnp.transpose(y, (0, 3, 1, 2))


# --------------------------------------------------------------------------

if __name__ == "__main__":
    input_dim, output_dim = 256, 128
    N, H, W = 2, 16, 16

    key = jax.random.PRNGKey(0)
    kx, kp = jax.random.split(key)
    features = jax.random.normal(kx, (N, input_dim, H, W), jnp.float32)
    params = init_params(kp, input_dim, output_dim)

    fwd = jax.jit(dimension_adapter)
    out = jax.block_until_ready(fwd(features, params))

    assert out.shape == (N, output_dim, H, W), out.shape
    assert bool(jnp.all(jnp.isfinite(out)))

    ref = _reference(features, params)
    max_err = float(jnp.max(jnp.abs(out - ref)))
    # bf16 activations/weights vs f32 reference -> loose tolerance
    assert max_err < 0.25, f"max abs err vs reference: {max_err}"

    print("KERNEL_OK")
</pallas_src>

<mosaic_0001>
module attributes {stable_mosaic.version = 11 : i64} {
  func.func @_adapter_kernel(%arg0: i32, %arg1: memref<1x256x256xbf16, #tpu.memory_space<vmem>>, %arg2: memref<3x768x256xbf16, #tpu.memory_space<vmem>>, %arg3: memref<1x256xf32, #tpu.memory_space<vmem>>, %arg4: memref<256x128xbf16, #tpu.memory_space<vmem>>, %arg5: memref<1x128xf32, #tpu.memory_space<vmem>>, %arg6: memref<1x256x128xf32, #tpu.memory_space<vmem>>, %arg7: memref<288x768xbf16, #tpu.memory_space<vmem>>) attributes {dimension_semantics = [#tpu.dimension_semantics<parallel>], iteration_bounds = array<i64: 2>, scalar_prefetch = 0 : i64, scratch_operands = 1 : i64, tpu.core_type = #tpu.core_type<tc>, window_params = [{transform_indices = @transform_0, window_bounds = array<i64: 1, 256, 256>}, {pipeline_mode = #tpu.pipeline_mode<synchronous>, transform_indices = @transform_1, window_bounds = array<i64: 3, 768, 256>}, {pipeline_mode = #tpu.pipeline_mode<synchronous>, transform_indices = @transform_2, window_bounds = array<i64: 1, 256>}, {pipeline_mode = #tpu.pipeline_mode<synchronous>, transform_indices = @transform_3, window_bounds = array<i64: 256, 128>}, {pipeline_mode = #tpu.pipeline_mode<synchronous>, transform_indices = @transform_4, window_bounds = array<i64: 1, 128>}, {transform_indices = @transform_5, window_bounds = array<i64: 1, 256, 128>}]} {
    %c0 = arith.constant 0 : index
    %c0_0 = arith.constant 0 : index
    %c0_1 = arith.constant 0 : index
    %0 = vector.load %arg1[%c0, %c0_0, %c0_1] : memref<1x256x256xbf16, #tpu.memory_space<vmem>>, vector<1x256x256xbf16>
    %1 = vector.shape_cast %0 : vector<1x256x256xbf16> to vector<256x256xbf16>
    %2 = arith.extf %1 : vector<256x256xbf16> to vector<256x256xf32>
    %3 = tpu.iota {dimensions = array<i32: 0>} : vector<256x1xi32>
    %c16_i32 = arith.constant 16 : i32
    %c0_i32 = arith.constant 0 : i32
    %4 = arith.cmpi eq, %c16_i32, %c0_i32 : i32
    %c1_i32 = arith.constant 1 : i32
    %5 = arith.select %4, %c1_i32, %c16_i32 : i32
    %6 = vector.broadcast %5 : i32 to vector<256x1xi32>
    %7 = arith.remsi %3, %6 : vector<256x1xi32>
    %c0_i32_2 = arith.constant 0 : i32
    %8 = vector.broadcast %c0_i32_2 : i32 to vector<256x1xi32>
    %9 = arith.cmpi ne, %7, %8 : vector<256x1xi32>
    %c0_i32_3 = arith.constant 0 : i32
    %10 = vector.broadcast %c0_i32_3 : i32 to vector<256x1xi32>
    %11 = arith.cmpi slt, %7, %10 : vector<256x1xi32>
    %c0_i32_4 = arith.constant 0 : i32
    %12 = arith.cmpi slt, %5, %c0_i32_4 : i32
    %13 = vector.broadcast %12 : i1 to vector<256x1xi1>
    %14 = vector.broadcast %13 : vector<256x1xi1> to vector<256x1xi1>
    %15 = arith.xori %11, %14 : vector<256x1xi1>
    %16 = arith.andi %15, %9 : vector<256x1xi1>
    %17 = vector.broadcast %5 : i32 to vector<256x1xi32>
    %18 = arith.addi %7, %17 : vector<256x1xi32>
    %19 = arith.select %16, %18, %7 : vector<256x1xi1>, vector<256x1xi32>
    %c0_i32_5 = arith.constant 0 : i32
    %20 = vector.broadcast %c0_i32_5 : i32 to vector<256x1xi32>
    %21 = arith.cmpi eq, %19, %20 : vector<256x1xi32>
    %22 = vector.extract_strided_slice %2 {offsets = [255, 0], sizes = [1, 256], strides = [1, 1]} : vector<256x256xf32> to vector<1x256xf32>
    %23 = vector.extract_strided_slice %2 {offsets = [0, 0], sizes = [255, 256], strides = [1, 1]} : vector<256x256xf32> to vector<255x256xf32>
    %24 = tpu.concatenate %22, %23 in 0 : vector<1x256xf32>, vector<255x256xf32> -> vector<256x256xf32>
    %cst = arith.constant 0.000000e+00 : f32
    %25 = vector.shape_cast %21 : vector<256x1xi1> to vector<256x1xi1>
    %26 = vector.broadcast %25 : vector<256x1xi1> to vector<256x256xi1>
    %27 = vector.broadcast %cst : f32 to vector<256x256xf32>
    %28 = arith.select %26, %27, %24 : vector<256x256xi1>, vector<256x256xf32>
    %c15_i32 = arith.constant 15 : i32
    %29 = vector.broadcast %c15_i32 : i32 to vector<256x1xi32>
    %30 = arith.cmpi eq, %19, %29 : vector<256x1xi32>
    %31 = vector.extract_strided_slice %2 {offsets = [1, 0], sizes = [255, 256], strides = [1, 1]} : vector<256x256xf32> to vector<255x256xf32>
    %32 = vector.extract_strided_slice %2 {offsets = [0, 0], sizes = [1, 256], strides = [1, 1]} : vector<256x256xf32> to vector<1x256xf32>
    %33 = tpu.concatenate %31, %32 in 0 : vector<255x256xf32>, vector<1x256xf32> -> vector<256x256xf32>
    %cst_6 = arith.constant 0.000000e+00 : f32
    %34 = vector.shape_cast %30 : vector<256x1xi1> to vector<256x1xi1>
    %35 = vector.broadcast %34 : vector<256x1xi1> to vector<256x256xi1>
    %36 = vector.broadcast %cst_6 : f32 to vector<256x256xf32>
    %37 = arith.select %35, %36, %33 : vector<256x256xi1>, vector<256x256xf32>
    %cst_7 = arith.constant 0.000000e+00 : bf16
    %38 = vector.broadcast %cst_7 : bf16 to vector<16x768xbf16>
    %c0_8 = arith.constant 0 : index
    %c0_9 = arith.constant 0 : index
    %39 = vector.load %arg7[%c0_8, %c0_9] : memref<288x768xbf16, #tpu.memory_space<vmem>>, vector<16x768xbf16>
    tpu.vector_store %arg7[%c0_8, %c0_9], %38 {strides = array<i32>} : memref<288x768xbf16, #tpu.memory_space<vmem>>, vector<16x768xbf16>,
    %c272 = arith.constant 272 : index
    %c0_10 = arith.constant 0 : index
    %40 = vector.load %arg7[%c272, %c0_10] : memref<288x768xbf16, #tpu.memory_space<vmem>>, vector<16x768xbf16>
    tpu.vector_store %arg7[%c272, %c0_10], %38 {strides = array<i32>} : memref<288x768xbf16, #tpu.memory_space<vmem>>, vector<16x768xbf16>,
    %41 = arith.truncf %28 : vector<256x256xf32> to vector<256x256xbf16>
    %c16 = arith.constant 16 : index
    %c0_11 = arith.constant 0 : index
    %42 = vector.load %arg7[%c16, %c0_11] : memref<288x768xbf16, #tpu.memory_space<vmem>>, vector<256x256xbf16>
    tpu.vector_store %arg7[%c16, %c0_11], %41 {strides = array<i32>} : memref<288x768xbf16, #tpu.memory_space<vmem>>, vector<256x256xbf16>,
    %c16_12 = arith.constant 16 : index
    %c256 = arith.constant 256 : index
    %43 = vector.load %arg7[%c16_12, %c256] : memref<288x768xbf16, #tpu.memory_space<vmem>>, vector<256x256xbf16>
    tpu.vector_store %arg7[%c16_12, %c256], %1 {strides = array<i32>} : memref<288x768xbf16, #tpu.memory_space<vmem>>, vector<256x256xbf16>,
    %44 = arith.truncf %37 : vector<256x256xf32> to vector<256x256xbf16>
    %c16_13 = arith.constant 16 : index
    %c512 = arith.constant 512 : index
    %45 = vector.load %arg7[%c16_13, %c512] : memref<288x768xbf16, #tpu.memory_space<vmem>>, vector<256x256xbf16>
    tpu.vector_store %arg7[%c16_13, %c512], %44 {strides = array<i32>} : memref<288x768xbf16, #tpu.memory_space<vmem>>, vector<256x256xbf16>,
    %c0_14 = arith.constant 0 : index
    %c0_15 = arith.constant 0 : index
    %46 = vector.load %arg7[%c0_14, %c0_15] : memref<288x768xbf16, #tpu.memory_space<vmem>>, vector<256x768xbf16>
    %c0_16 = arith.constant 0 : index
    %c0_17 = arith.constant 0 : index
    %c0_18 = arith.constant 0 : index
    %47 = vector.load %arg2[%c0_16, %c0_17, %c0_18] : memref<3x768x256xbf16, #tpu.memory_space<vmem>>, vector<1x768x256xbf16>
    %48 = vector.shape_cast %47 : vector<1x768x256xbf16> to vector<768x256xbf16>
    %cst_19 = arith.constant dense<0.000000e+00> : vector<256x256xf32>
    %49 = tpu.matmul %46, %48, %cst_19 {dimension_numbers = #tpu.dot_dimension_numbers<[1], [0], [0], [1], [0, 0, 1, 1], [], []>} : vector<256x768xbf16>, vector<768x256xbf16>, vector<256x256xf32> -> vector<256x256xf32>
    %c16_20 = arith.constant 16 : index
    %c0_21 = arith.constant 0 : index
    %50 = vector.load %arg7[%c16_20, %c0_21] : memref<288x768xbf16, #tpu.memory_space<vmem>>, vector<256x768xbf16>
    %c1 = arith.constant 1 : index
    %c0_22 = arith.constant 0 : index
    %c0_23 = arith.constant 0 : index
    %51 = vector.load %arg2[%c1, %c0_22, %c0_23] : memref<3x768x256xbf16, #tpu.memory_space<vmem>>, vector<1x768x256xbf16>
    %52 = vector.shape_cast %51 : vector<1x768x256xbf16> to vector<768x256xbf16>
    %cst_24 = arith.constant dense<0.000000e+00> : vector<256x256xf32>
    %53 = tpu.matmul %50, %52, %cst_24 {dimension_numbers = #tpu.dot_dimension_numbers<[1], [0], [0], [1], [0, 0, 1, 1], [], []>} : vector<256x768xbf16>, vector<768x256xbf16>, vector<256x256xf32> -> vector<256x256xf32>
    %54 = arith.addf %49, %53 : vector<256x256xf32>
    %c32 = arith.constant 32 : index
    %c0_25 = arith.constant 0 : index
    %55 = vector.load %arg7[%c32, %c0_25] : memref<288x768xbf16, #tpu.memory_space<vmem>>, vector<256x768xbf16>
    %c2 = arith.constant 2 : index
    %c0_26 = arith.constant 0 : index
    %c0_27 = arith.constant 0 : index
    %56 = vector.load %arg2[%c2, %c0_26, %c0_27] : memref<3x768x256xbf16, #tpu.memory_space<vmem>>, vector<1x768x256xbf16>
    %57 = vector.shape_cast %56 : vector<1x768x256xbf16> to vector<768x256xbf16>
    %cst_28 = arith.constant dense<0.000000e+00> : vector<256x256xf32>
    %58 = tpu.matmul %55, %57, %cst_28 {dimension_numbers = #tpu.dot_dimension_numbers<[1], [0], [0], [1], [0, 0, 1, 1], [], []>} : vector<256x768xbf16>, vector<768x256xbf16>, vector<256x256xf32> -> vector<256x256xf32>
    %59 = arith.addf %54, %58 : vector<256x256xf32>
    %c0_29 = arith.constant 0 : index
    %c0_30 = arith.constant 0 : index
    %60 = vector.load %arg3[%c0_29, %c0_30] : memref<1x256xf32, #tpu.memory_space<vmem>>, vector<1x256xf32>
    %61 = vector.broadcast %60 : vector<1x256xf32> to vector<256x256xf32>
    %62 = arith.addf %59, %61 : vector<256x256xf32>
    %cst_31 = arith.constant 0.000000e+00 : f32
    %63 = vector.broadcast %cst_31 : f32 to vector<256x256xf32>
    %64 = arith.maximumf %62, %63 : vector<256x256xf32>
    %65 = arith.truncf %64 : vector<256x256xf32> to vector<256x256xbf16>
    %c0_32 = arith.constant 0 : index
    %c0_33 = arith.constant 0 : index
    %66 = vector.load %arg4[%c0_32, %c0_33] : memref<256x128xbf16, #tpu.memory_space<vmem>>, vector<256x128xbf16>
    %cst_34 = arith.constant dense<0.000000e+00> : vector<256x128xf32>
    %67 = tpu.matmul %65, %66, %cst_34 {dimension_numbers = #tpu.dot_dimension_numbers<[1], [0], [0], [1], [0, 0, 1, 1], [], []>} : vector<256x256xbf16>, vector<256x128xbf16>, vector<256x128xf32> -> vector<256x128xf32>
    %c0_35 = arith.constant 0 : index
    %c0_36 = arith.constant 0 : index
    %68 = vector.load %arg5[%c0_35, %c0_36] : memref<1x128xf32, #tpu.memory_space<vmem>>, vector<1x128xf32>
    %69 = vector.broadcast %68 : vector<1x128xf32> to vector<256x128xf32>
    %70 = arith.addf %67, %69 : vector<256x128xf32>
    %c0_37 = arith.constant 0 : index
    %c0_38 = arith.constant 0 : index
    %c0_39 = arith.constant 0 : index
    %71 = vector.load %arg6[%c0_37, %c0_38, %c0_39] : memref<1x256x128xf32, #tpu.memory_space<vmem>>, vector<1x256x128xf32>
    %72 = vector.shape_cast %71 : vector<1x256x128xf32> to vector<256x128xf32>
    %73 = vector.shape_cast %70 : vector<256x128xf32> to vector<1x256x128xf32>
    tpu.vector_store %arg6[%c0_37, %c0_38, %c0_39], %73 {strides = array<i32>} : memref<1x256x128xf32, #tpu.memory_space<vmem>>, vector<1x256x128xf32>,
    return
  }
  func.func @transform_0(%arg0: i32) -> (i32, i32, i32) {
    %c0_i32 = arith.constant 0 : i32
    %c0_i32_0 = arith.constant 0 : i32
    %c0_i32_1 = arith.constant 0 : i32
    return %arg0, %c0_i32, %c0_i32_0 : i32, i32, i32
  }
  func.func @transform_1(%arg0: i32) -> (i32, i32, i32) {
    %c0_i32 = arith.constant 0 : i32
    %c0_i32_0 = arith.constant 0 : i32
    %c0_i32_1 = arith.constant 0 : i32
    %c0_i32_2 = arith.constant 0 : i32
    return %c0_i32, %c0_i32_0, %c0_i32_1 : i32, i32, i32
  }
  func.func @transform_2(%arg0: i32) -> (i32, i32) {
    %c0_i32 = arith.constant 0 : i32
    %c0_i32_0 = arith.constant 0 : i32
    %c0_i32_1 = arith.constant 0 : i32
    return %c0_i32, %c0_i32_0 : i32, i32
  }
  func.func @transform_3(%arg0: i32) -> (i32, i32) {
    %c0_i32 = arith.constant 0 : i32
    %c0_i32_0 = arith.constant 0 : i32
    %c0_i32_1 = arith.constant 0 : i32
    return %c0_i32, %c0_i32_0 : i32, i32
  }
  func.func @transform_4(%arg0: i32) -> (i32, i32) {
    %c0_i32 = arith.constant 0 : i32
    %c0_i32_0 = arith.constant 0 : i32
    %c0_i32_1 = arith.constant 0 : i32
    return %c0_i32, %c0_i32_0 : i32, i32
  }
  func.func @transform_5(%arg0: i32) -> (i32, i32, i32) {
    %c0_i32 = arith.constant 0 : i32
    %c0_i32_0 = arith.constant 0 : i32
    %c0_i32_1 = arith.constant 0 : i32
    return %arg0, %c0_i32, %c0_i32_0 : i32, i32, i32
  }
}

</mosaic_0001>

<bundles_post_ra>
// kernel: dimension_adapter.1
= control target key start
LH: loop header
LB: loop body
LE: loop exit
PB: predicated region body
PF: predicated region fallthrough
CT: control target
= control target key end

     0   :  { %s11320_s0 = inlined_call_operand.vmem [shape: bf16[2,256,256], index: 0, kind: input, shape index: {}]   ;;  %s11321_s1 = inlined_call_operand.hbm [shape: bf16[3,768,256], index: 1, kind: input, shape index: {}]   ;;  %s11322_s2 = inlined_call_operand.hbm [shape: f32[1,256], index: 2, kind: input, shape index: {}]   ;;  %s11323_s3 = inlined_call_operand.hbm [shape: bf16[256,128], index: 3, kind: input, shape index: {}]   ;;  %s11324_s4 = inlined_call_operand.hbm [shape: f32[1,128], index: 4, kind: input, shape index: {}]   ;;  %s11325_s5 = inlined_call_operand.hbm [shape: f32[2,256,128], index: 5, kind: output, shape index: {}]  }
   0x1   :  { %11660 = sst [smem:[#allocation133_spill]] %s11321_s1 }
   0x2   :  { %10 = vsyncpa [#allocation4], 0 }
   0x3   :  { %11 = vsyncpa [#allocation7], 0 }
   0x4   :  { %12 = vsyncpa [#allocation10], 0 }
   0x5   :  { %13 = vsyncpa [#allocation5], 0 }
   0x6   :  { %15 = vsyncpa [#allocation5 + $0x1], 0  ;;  %s8805_s18 = smov 0   ;;  %s8807_s19 = smov 0  }
   0x7   :  { %s8809_s20 = smov 0   ;;  %s8811_s21 = smov 0  }
   0x8 LB: > { %s8826_s22 = sadd.s32 4294967295, %s8760_s21   ;;  %s6244_s23 = sadd.s32 4294967294, %s8760_s21   ;;  %s8760_s21 = sphi %s8811_s21, %s12298_s21   ;;  %s8756_s20 = sphi %s8809_s20, %s12297_s20   ;;  %s8752_s19 = sphi %s8807_s19, %s12296_s19   ;;  %s8748_s18 = sphi %s8805_s18, %s12295_s18  }
   0x9   : > { %s8830_s24 = sadd.s32 1, %s8760_s21   ;;  %s138_s25 = sadd.s32 1, %s8756_s20 }
   0xa   : > { %s135_s26 = ssub.s32 %s8760_s21, %s8830_s24  ;;  %p148_p0 = scmp.ne.s32.totalorder %s8756_s20, %s8752_s19 }
   0xb   : > { %p136_p1 = scmp.eq.s32.totalorder %s135_s26, 0  ;;  %p149_p2 = scmp.eq.s32.totalorder %s8826_s22, 1 }
   0xc   : > { %p154_p3 = scmp.ne.s32.totalorder %s8752_s19, %s8748_s18  ;;  %p155_p4 = scmp.eq.s32.totalorder %s6244_s23, 1 }
   0xd   : > { %s8841_s27 = scalar_select %p136_p1, %s8756_s20, %s138_s25  }
   0xe   : > { %p8843_p5 = por %p149_p2, %p148_p0  ;;  %p8847_p6 = por %p155_p4, %p154_p3 }
   0xf   : > { %p6245_p7 = scmp.ge.s32.totalorder %s8760_s21, 1  ;;  %p162_p8 = scmp.lt.s32.totalorder %s8760_s21, 3 }
  0x10   : > { %s11661_s28 = scalar_select %p8843_p5, 1, 0 }
  0x11   : > { %s11662_s29 = scalar_select %p8847_p6, 1, 0 }
  0x12   : > { %p11326_p9 = scmp.eq.s32.totalorder %s8826_s22, 0  ;;  %p8854_p10 = pnand %p6245_p7, %p162_p8 }
  0x13   : > { %s8762_s6 = smov [#allocation6]   ;;  %s8763_s8 = smov [#allocation3]  }
  0x14   : > { %s11663_s30 = scalar_select %p8854_p10, 1, 0 }
  0x15   : > { %s188_s7 = sshll.u32 %s8762_s6, 4  ;;  %p7981_p11 = pneg %p8854_p10  ;;  %s189_s7 = int_to_ptr.vmem [resolvable:$true] %s188_s7 }
  0x16   : > { %s174_s9 = sshll.u32 %s8763_s8, 4  ;;  %s8764_s11 = smov [#allocation8]   ;;  %s8866_s9 = int_to_ptr.vmem [resolvable:$true] %s174_s9 }
  0x17   : > { %p8862_p12 = pnand %p11326_p9, %p7981_p11  ;;  %s8868_s12 = sshll.u32 %s8764_s11, 4  ;;  %s199_s12 = int_to_ptr.vmem [resolvable:$true] %s8868_s12 }
  0x18   : > { %s8574_s15 = scalar_lea.hbm %s11322_s2, 32 }
  0x19   : > { %p8575_p13 = scmp.ne.s32.totalorder %s11322_s2, %s8574_s15  ;;  %p8878_p0 = pneg %p8862_p12 }
  0x1a   : > { %p8581_p3 = scmp.lt.u32.totalorder %s8574_s15, %s11322_s2 }
  0x1b   : > { %p8577_p1 = pnand %p8878_p0, %p8575_p13 }
  0x1d   : > { %p8578_p2 = pneg %p8577_p1 }
  0x1f   : > { %p8583_p4 = pnand %p8581_p3, %p8578_p2 }
  0x21   : > { %8586 = shalt.err (!%p8583_p4)
}
  0x22   : > { %s8587_s6 = scalar_lea.vmem %s189_s7, 32  ;;  %p8595_p9 = scmp.lt.s32.totalorder %s189_s7, %s189_s7 }
  0x23   : > { %p8588_p7 = scmp.ne.s32.totalorder %s189_s7, %s8587_s6  ;;  %p8596_p6 = scmp.lt.s32.totalorder %s8587_s6, %s8587_s6 }
  0x25   : > { %p8590_p8 = pnand %p8588_p7, %p8878_p0  ;;  %p8597_p5 = por %p8596_p6, %p8595_p9 }
  0x27   : > { %p8591_p11 = pneg %p8590_p8 }
  0x29   : > { %p8598_p10 = pnand %p8597_p5, %p8591_p11 }
  0x2b   : > { %8601 = shalt.err (!%p8598_p10)
}
  0x2c   : > { %7987 = dma.hbm_to_vmem [thread:$0]  (!%p8862_p12), %s11322_s2, 32, %s189_s7, [#allocation7]  }
  0x2d   : > { %s11666_s1 = sld [smem:[#allocation133_spill]] }
  0x33   : > { %s8602_s15 = scalar_lea.hbm %s11666_s1, 36864 }
  0x34   : > { %p8603_p13 = scmp.ne.s32.totalorder %s11666_s1, %s8602_s15  ;;  %p8609_p5 = scmp.lt.u32.totalorder %s8602_s15, %s11666_s1 }
  0x36   : > { %p8605_p1 = pnand %p8603_p13, %p8878_p0 }
  0x38   : > { %p8606_p6 = pneg %p8605_p1 }
  0x3a   : > { %p8611_p9 = pnand %p8609_p5, %p8606_p6 }
  0x3c   : > { %8614 = shalt.err (!%p8611_p9)
}
  0x3d   : > { %s8615_s7 = scalar_lea.vmem %s8866_s9, 36864  ;;  %p8623_p4 = scmp.lt.s32.totalorder %s8866_s9, %s8866_s9 }
  0x3e   : > { %p8616_p10 = scmp.ne.s32.totalorder %s8866_s9, %s8615_s7  ;;  %p8624_p7 = scmp.lt.s32.totalorder %s8615_s7, %s8615_s7 }
  0x40   : > { %p8618_p2 = pnand %p8616_p10, %p8878_p0  ;;  %p8625_p8 = por %p8624_p7, %p8623_p4 }
  0x42   : > { %p8619_p3 = pneg %p8618_p2 }
  0x44   : > { %p8626_p11 = pnand %p8625_p8, %p8619_p3 }
  0x46   : > { %8629 = shalt.err (!%p8626_p11)
}
  0x47   : > { %s8765_s6 = smov 128   ;;  %s8766_s8 = smov 8  }
  0x48   : > { %7984 = dma.hbm_to_vmem [thread:$0]  (!%p8862_p12), %s11666_s1, 36864, %s8866_s9, [#allocation4], %s8765_s6, %s8765_s6, %s8766_s8  }
  0x49   : > { %s8630_s16 = scalar_lea.hbm %s11323_s3, 2048 }
  0x4a   : > { %p8631_p13 = scmp.ne.s32.totalorder %s11323_s3, %s8630_s16  ;;  %p8637_p5 = scmp.lt.u32.totalorder %s8630_s16, %s11323_s3 }
  0x4c   : > { %p8633_p1 = pnand %p8631_p13, %p8878_p0 }
  0x4e   : > { %p8634_p6 = pneg %p8633_p1 }
  0x50   : > { %p8639_p9 = pnand %p8637_p5, %p8634_p6 }
  0x52   : > { %8642 = shalt.err (!%p8639_p9)
}
  0x53   : > { %s8643_s11 = scalar_lea.vmem %s199_s12, 2048  ;;  %p8651_p4 = scmp.lt.s32.totalorder %s199_s12, %s199_s12 }
  0x54   : > { %p8644_p10 = scmp.ne.s32.totalorder %s199_s12, %s8643_s11  ;;  %p8652_p7 = scmp.lt.s32.totalorder %s8643_s11, %s8643_s11 }
  0x56   : > { %p8646_p2 = pnand %p8644_p10, %p8878_p0  ;;  %p8653_p8 = por %p8652_p7, %p8651_p4 }
  0x58   : > { %p8647_p3 = pneg %p8646_p2 }
  0x5a   : > { %p8654_p11 = pnand %p8653_p8, %p8647_p3 }
  0x5c   : > { %8657 = shalt.err (!%p8654_p11)
}
  0x5d   : > { %s8767_s9 = smov 64   ;;  %s8768_s6 = smov 4  }
  0x5e   : > { %7990 = dma.hbm_to_vmem [thread:$0]  (!%p8862_p12), %s11323_s3, 2048, %s199_s12, [#allocation7], %s8767_s9, %s8767_s9, %s8768_s6  }
  0x5f   : > { %s8769_s14 = smov [#allocation9]   ;;  %s8658_s25 = scalar_lea.hbm %s11324_s4, 16 }
  0x60   : > { %s212_s15 = sshll.u32 %s8769_s14, 4  ;;  %p8659_p13 = scmp.ne.s32.totalorder %s11324_s4, %s8658_s25  ;;  %s213_s15 = int_to_ptr.vmem [resolvable:$true] %s212_s15 }
  0x61   : > { %p8665_p5 = scmp.lt.u32.totalorder %s8658_s25, %s11324_s4 }
  0x62   : > { %p8661_p1 = pnand %p8659_p13, %p8878_p0 }
  0x64   : > { %p8662_p6 = pneg %p8661_p1 }
  0x66   : > { %p8667_p9 = pnand %p8665_p5, %p8662_p6 }
  0x68   : > { %8670 = shalt.err (!%p8667_p9)
}
  0x69   : > { %s8671_s12 = scalar_lea.vmem %s213_s15, 16  ;;  %s8678_s9 = scalar_lea.vmem %s213_s15, 32 }
  0x6a   : > { %p8672_p10 = scmp.ne.s32.totalorder %s213_s15, %s8671_s12  ;;  %p8679_p4 = scmp.lt.s32.totalorder %s213_s15, %s213_s15 }
  0x6b   : > { %p8680_p7 = scmp.lt.s32.totalorder %s8678_s9, %s8671_s12 }
  0x6c   : > { %p8674_p2 = pnand %p8672_p10, %p8878_p0 }
  0x6d   : > { %p8681_p8 = por %p8680_p7, %p8679_p4 }
  0x6e   : > { %p8675_p3 = pneg %p8674_p2 }
  0x70   : > { %p8682_p11 = pnand %p8681_p8, %p8675_p3 }
  0x72   : > { %8685 = shalt.err (!%p8682_p11)
}
  0x73   : > { %7993 = dma.hbm_to_vmem [thread:$0]  (!%p8862_p12), %s11324_s4, 16, %s213_s15, [#allocation10]  }
  0x74   : > { %p11667_p13 = scmp.ne.s32.totalorder %s11663_s30, 0 }
  0x76   : > { %233 = sbr.rel (%p11667_p13) target bundleno = 1299 (0x513), region = 40 }
  0x7d   : > { %p11668_p1 = scmp.eq.s32.totalorder %s8826_s22, 0 }
  0x7f   : > { %8731 = dma.done.wait (%p11668_p1), [#allocation4], 36864   ;;  %p11669_p0 = pmov %p11668_p1 }
  0x81   : > { %8733 = vsyncadd (%p11669_p0), [#allocation4], 4294930432  ;;  %p11670_p6 = pmov %p11669_p0 }
  0x82   : > { %p11671_p5 = pmov %p11669_p0 }
  0x83   : > { %8735 = dma.done.wait (%p11670_p6), [#allocation7], 2080  }
  0x84   : > { %8737 = vsyncadd (%p11671_p5), [#allocation7], 4294965216  ;;  %p11672_p9 = pmov %p11669_p0 }
  0x85   : > { %p11673_p12 = pmov %p11669_p0 }
  0x86   : > { %8739 = dma.done.wait (%p11672_p9), [#allocation10], 16  }
  0x87   : > { %8741 = vsyncadd (%p11673_p12), [#allocation10], 4294967280  ;;  %v375_v0 = vlaneseq  ;;  %v11349_v1 = vmov 0   ;;  %v8083_v10 = vld [vmem:[#allocation3 + $0x304] ss:$8 sps:$4 sm:$0xff]   ;;  %p273_p10 = scmp.lt.s32.totalorder %s8826_s22, 1 }
  0x88   : > { %3957 = vmatprep.mubr.bf16.mxu0 %v11349_v1  ;;  %v8085_v13 = vld [vmem:[#allocation3 + $0x104] ss:$8 sps:$4 sm:$0xff]   ;;  %2673 = vmatprep.subr.bf16.mxu1 %v8083_v10  ;;  %v8087_v15 = vld [vmem:[#allocation3 + $0x300] ss:$8 sps:$4 sm:$0xff]   ;;  %v8089_v17 = vld [vmem:[#allocation3 + $0x314] ss:$8 sps:$4 sm:$0xff]  }
  0x89   : > { %v8969_v2 = vshrl.u32 %v375_v0, 7  ;;  %v8088_v16 = vld [vmem:[#allocation3 + $0x100] ss:$8 sps:$4 sm:$0xff]   ;;  %3925 = vmatprep.subr.bf16.mxu0 %v8085_v13  ;;  %2674 = vmatpush1.bf16.msra.mxu1 %v8087_v15  ;;  %v8091_v19 = vld [vmem:[#allocation3 + $0x114] ss:$8 sps:$4 sm:$0xff]   ;;  %s274_s1 = scalar_select %p273_p10, %s8826_s22, 1 }
  0x8a   : > { %3926 = vmatpush1.bf16.msra.mxu0 %v8088_v16  ;;  %v8093_v20 = vld [vmem:[#allocation3 + $0x310] ss:$8 sps:$4 sm:$0xff]   ;;  %2675 = vmatprep.subr.bf16.mxu1 %v8089_v17  ;;  %v8095_v23 = vld [vmem:[#allocation3 + $0x324] ss:$8 sps:$4 sm:$0xff]   ;;  %v8099_v27 = vld [vmem:[#allocation3 + $0x320] ss:$8 sps:$4 sm:$0xff]  }
  0x8b   : > { %11674 = vst [vmem:[#allocation16_spill] sm:$0xff] %v8969_v2  ;;  %v412_v3 = vand.u32 15, %v8969_v2  ;;  %v8973_v4 = vadd.s32 16, %v8969_v2  ;;  %v8976_v5 = vadd.s32 32, %v8969_v2  ;;  %v8979_v6 = vadd.s32 48, %v8969_v2  ;;  %3927 = vmatprep.subr.bf16.mxu0 %v8091_v19  ;;  %s6601_s30 = sshll.u32 %s274_s1, 8 }
  0x8c   : > { %v8983_v8 = vadd.s32 64, %v8969_v2  ;;  %v8986_v9 = vadd.s32 80, %v8969_v2  ;;  %v8990_v12 = vadd.s32 96, %v8969_v2  ;;  %v8094_v21 = vld [vmem:[#allocation3 + $0x110] ss:$8 sps:$4 sm:$0xff]   ;;  %v8995_v22 = vadd.s32 112, %v8969_v2  ;;  %s9029_s13 = scalar_lea.vmem %s11320_s0, %s6601_s30 }
  0x8d   : > { %v426_v7 = vand.u32 15, %v8973_v4  ;;  %v440_v11 = vand.u32 15, %v8976_v5  ;;  %v454_v14 = vand.u32 15, %v8979_v6  ;;  %v8097_v26 = vld [vmem:[#allocation3 + $0x124] ss:$8 sps:$4 sm:$0xff]   ;;  %2676 = vmatpush1.bf16.msra.mxu1 %v8093_v20  ;;  %v9001_v33 = vadd.s32 128, %v8969_v2 }
  0x8e   : > { %v8100_v28 = vld [vmem:[#allocation3 + $0x120] ss:$8 sps:$4 sm:$0xff]   ;;  %3928 = vmatpush1.bf16.msra.mxu0 %v8094_v21  ;;  %v8101_v29 = vld [vmem:[#allocation3 + $0x334] ss:$8 sps:$4 sm:$0xff]   ;;  %2677 = vmatprep.subr.bf16.mxu1 %v8095_v23  ;;  %v8105_v32 = vld [vmem:[#allocation3 + $0x330] ss:$8 sps:$4 sm:$0xff]  }
  0x8f   : > { %3929 = vmatprep.subr.bf16.mxu0 %v8097_v26  ;;  %v8103_v30 = vld [vmem:[#allocation3 + $0x134] ss:$8 sps:$4 sm:$0xff]   ;;  %v9004_v34 = vadd.s32 144, %v8969_v2  ;;  %v8106_v35 = vld [vmem:[#allocation3 + $0x130] ss:$8 sps:$4 sm:$0xff]   ;;  %v9008_v39 = vadd.s32 160, %v8969_v2 }
  0x90   : > { %v8107_v36 = vld [vmem:[#allocation3 + $0x344] ss:$8 sps:$4 sm:$0xff]   ;;  %v8111_v40 = vld [vmem:[#allocation3 + $0x340] ss:$8 sps:$4 sm:$0xff]   ;;  %v8113_v43 = vld [vmem:[#allocation3 + $0x354] ss:$8 sps:$4 sm:$0xff]  }
  0x91   : > { %2678 = vmatpush1.bf16.msra.mxu1 %v8099_v27  ;;  %v8109_v37 = vld [vmem:[#allocation3 + $0x144] ss:$8 sps:$4 sm:$0xff]   ;;  %11675 = vst [vmem:[#allocation17_spill] sm:$0xff] %v9008_v39  ;;  %v8112_v41 = vld [vmem:[#allocation3 + $0x140] ss:$8 sps:$4 sm:$0xff]   ;;  %v9013_v47 = vadd.s32 176, %v8969_v2 }
  0x92   : > { %3930 = vmatpush1.bf16.msra.mxu0 %v8100_v28  ;;  %2679 = vmatprep.subr.bf16.mxu1 %v8101_v29  ;;  %v8115_v44 = vld [vmem:[#allocation3 + $0x154] ss:$8 sps:$4 sm:$0xff]   ;;  %v8117_v46 = vld [vmem:[#allocation3 + $0x350] ss:$8 sps:$4 sm:$0xff]   ;;  %v8119_v49 = vld [vmem:[#allocation3 + $0x364] ss:$8 sps:$4 sm:$0xff]  }
  0x93   : > { %3931 = vmatprep.subr.bf16.mxu0 %v8103_v30  ;;  %11676 = vst [vmem:[#allocation18_spill] sm:$0xff] %v9013_v47  ;;  %v8118_v48 = vld [vmem:[#allocation3 + $0x150] ss:$8 sps:$4 sm:$0xff]   ;;  %v8121_v50 = vld [vmem:[#allocation3 + $0x164] ss:$8 sps:$4 sm:$0xff]   ;;  %v9017_v57 = vadd.s32 192, %v8969_v2 }
  0x94   : > { %v8123_v52 = vld [vmem:[#allocation3 + $0x360] ss:$8 sps:$4 sm:$0xff]   ;;  %v8125_v54 = vld [vmem:[#allocation3 + $0x374] ss:$8 sps:$4 sm:$0xff]   ;;  %v8129_v56 = vld [vmem:[#allocation3 + $0x370] ss:$8 sps:$4 sm:$0xff]  }
  0x95   : > { %2680 = vmatpush1.bf16.msra.mxu1 %v8105_v32  ;;  %v8124_v53 = vld [vmem:[#allocation3 + $0x160] ss:$8 sps:$4 sm:$0xff]   ;;  %v8127_v55 = vld [vmem:[#allocation3 + $0x174] ss:$8 sps:$4 sm:$0xff]   ;;  %11677 = vst [vmem:[#allocation19_spill] sm:$0xff] %v9017_v57  ;;  %v9023_v15 = vadd.s32 208, %v8969_v2 }
  0x96   : > { %3932 = vmatpush1.bf16.msra.mxu0 %v8106_v35  ;;  %2681 = vmatprep.subr.bf16.mxu1 %v8107_v36  ;;  %v8130_v58 = vld [vmem:[#allocation3 + $0x170] ss:$8 sps:$4 sm:$0xff]   ;;  %v8131_v59 = vld [vmem:[#allocation3 + $0x384] ss:$8 sps:$4 sm:$0xff]   ;;  %v8135_v62 = vld [vmem:[#allocation3 + $0x380] ss:$8 sps:$4 sm:$0xff]  }
  0x97   : > { %3933 = vmatprep.subr.bf16.mxu0 %v8109_v37  ;;  %v8133_v60 = vld [vmem:[#allocation3 + $0x184] ss:$8 sps:$4 sm:$0xff]   ;;  %v8136_v63 = vld [vmem:[#allocation3 + $0x180] ss:$8 sps:$4 sm:$0xff]   ;;  %v8137_v0 = vld [vmem:[#allocation3 + $0x394] ss:$8 sps:$4 sm:$0xff]  }
  0x98   : > { %v8139_v10 = vld [vmem:[#allocation3 + $0x194] ss:$8 sps:$4 sm:$0xff]   ;;  %v8141_v13 = vld [vmem:[#allocation3 + $0x390] ss:$8 sps:$4 sm:$0xff]   ;;  %11678 = vst [vmem:[#allocation20_spill] sm:$0xff] %v9023_v15  ;;  %v9032_v28 = vld [vmem:[%s9029_s13] sm:$0xff] }
  0x99   : > { %2682 = vmatpush1.bf16.msra.mxu1 %v8111_v40  ;;  %v8142_v16 = vld [vmem:[#allocation3 + $0x190] ss:$8 sps:$4 sm:$0xff]   ;;  %v8143_v17 = vld [vmem:[#allocation3 + $0x3a4] ss:$8 sps:$4 sm:$0xff]   ;;  %v8147_v21 = vld [vmem:[#allocation3 + $0x3a0] ss:$8 sps:$4 sm:$0xff]   ;;  %v11340_v35 = vunpack.c.h.bf16 %v9032_v28 }
  0x9a   : > { %3934 = vmatpush1.bf16.msra.mxu0 %v8112_v41  ;;  %2683 = vmatprep.subr.bf16.mxu1 %v8113_v43  ;;  %v8145_v19 = vld [vmem:[#allocation3 + $0x1a4] ss:$8 sps:$4 sm:$0xff]   ;;  %v8148_v23 = vld [vmem:[#allocation3 + $0x1a0] ss:$8 sps:$4 sm:$0xff]   ;;  %v8149_v26 = vld [vmem:[#allocation3 + $0x3b4] ss:$8 sps:$4 sm:$0xff]  }
  0x9b   : > { %3935 = vmatprep.subr.bf16.mxu0 %v8115_v44  ;;  %v8151_v27 = vld [vmem:[#allocation3 + $0x1b4] ss:$8 sps:$4 sm:$0xff]   ;;  %v8153_v29 = vld [vmem:[#allocation3 + $0x3b0] ss:$8 sps:$4 sm:$0xff]   ;;  %v9035_v30 = vld [vmem:[%s9029_s13 + $0x8] sm:$0xff]  ;;  %vm11495_vm0 = vcmask 1040384  }
  0x9c   : > { %v9038_v32 = vld [vmem:[%s9029_s13 + $0xf8] sm:$0xff]  ;;  %v11338_v37 = vunpack.c.h.bf16 %v9035_v30  ;;  %v8155_v41 = vld [vmem:[#allocation3 + $0x3c4] ss:$8 sps:$4 sm:$0xff]   ;;  %v894_v44 = vrot.slane %v11340_v35, 7  ;;  %vm8006_vm1 = vcmp.ne.s32.totalorder %v412_v3, 0  ;;  %vm11498_vm2 = vmmov 1  }
  0x9d   : > { %2684 = vmatpush1.bf16.msra.mxu1 %v8117_v46  ;;  %11679 = vst [vmem:[#allocation21_spill] sm:$0xff] %v9038_v32  ;;  %v8154_v36 = vld [vmem:[#allocation3 + $0x1b0] ss:$8 sps:$4 sm:$0xff]   ;;  %v11330_v40 = vunpack.c.h.bf16 %v9038_v32  ;;  %v8157_v43 = vld [vmem:[#allocation3 + $0x1c4] ss:$8 sps:$4 sm:$0xff]   ;;  %vm9060_vm3 = vmpackc.low %vm11498_vm2, %vm8006_vm1  ;;  %vm9106_vm4 = vcmp.ne.s32.totalorder %v426_v7, 0 }
  0x9e   : > { %3936 = vmatpush1.bf16.msra.mxu0 %v8118_v48  ;;  %2685 = vmatprep.subr.bf16.mxu1 %v8119_v49  ;;  %v9053_v48 = vrot.slane %v11338_v37, 7  ;;  %v8159_v49 = vld [vmem:[#allocation3 + $0x3c0] ss:$8 sps:$4 sm:$0xff]   ;;  %v9111_v20 = vld [vmem:[%s9029_s13 + $0x38] sm:$0xff]  ;;  %vm9148_vm5 = vcmp.ne.s32.totalorder %v440_v11, 0  ;;  %vm9171_vm6 = vmpackc.low %vm11498_vm2, %vm9106_vm4  ;;  %vm9237_vm7 = vcmp.ne.s32.totalorder %v454_v14, 0 }
  0x9f   : > { %3937 = vmatprep.subr.bf16.mxu0 %v8121_v50  ;;  %v9049_v46 = vrot.slane %v11330_v40, 7  ;;  %v8160_v50 = vld [vmem:[#allocation3 + $0x1c0] ss:$8 sps:$4 sm:$0xff]   ;;  %11686 = vst [vmem:[#allocation24_spill] sm:$0xff] %v9111_v20  ;;  %v8177_v42 = vld [vmem:[#allocation3 + $0x3f0] ss:$8 sps:$4 sm:$0xff]   ;;  %vm9281_vm8 = vmpackc.low %vm11498_vm2, %vm9148_vm5 }
  0xa0   : > { %v9122_v7 = vld [vmem:[%s9029_s13 + $0x40] sm:$0xff]  ;;  %v9125_v51 = vld [vmem:[%s9029_s13 + $0x48] sm:$0xff]  ;;  %v9227_v25 = vld [vmem:[%s9029_s13 + $0x70] sm:$0xff]  ;;  %vm11502_vm4 = vcmask 1046528   ;;  %s270_s14 = sand.u32 1, %s8752_s19   ;;  %s6602_s17 = sshll.u32 %s8826_s22, 12 }
  0xa1   : > { %2686 = vmatpush1.bf16.msra.mxu1 %v8123_v52  ;;  %v8161_v52 = vld [vmem:[#allocation3 + $0x3d4] ss:$8 sps:$4 sm:$0xff]   ;;  %v1082_v3 = vsel %vm11495_vm0, %v9049_v46, %v894_v44  ;;  %v11345_v37 = vunpack.c.h.bf16 %v9125_v51  ;;  %11700 = vst [vmem:[#allocation34_spill] sm:$0xff] %v9227_v25  ;;  %vm9352_vm10 = vmpackc.low %vm11498_vm2, %vm9237_vm7  ;;  %s6256_s15 = sshll.u32 %s270_s14, 8  ;;  %s11270_s11 = scalar_lea.hbm %s11325_s5, %s6602_s17 }
  0xa2   : > { %3938 = vmatpush1.bf16.msra.mxu0 %v8124_v53  ;;  %2687 = vmatprep.subr.bf16.mxu1 %v8125_v54  ;;  %v898_v53 = vsel %vm11495_vm0, %v894_v44, %v9053_v48  ;;  %v11680_v54 = vmov 0  ;;  %v8172_v44 = vld [vmem:[#allocation3 + $0x1e0] ss:$8 sps:$4 sm:$0xff]   ;;  %v9250_v18 = vld [vmem:[%s9029_s13 + $0x50] sm:$0xff]  ;;  %s11203_s16 = scalar_lea.vmem [#allocation11], %s6256_s15  ;;  %s11279_s22 = scalar_lea.sflag [#allocation5], %s270_s14 }
  0xa3   : > { %3939 = vmatprep.subr.bf16.mxu0 %v8127_v55  ;;  %v11681_v54 = vsel %vm9060_vm3, 4294967295, %v11680_v54  ;;  %v11335_v55 = vunpack.c.l.bf16 %v9032_v28  ;;  %v8238_v47 = vld [vmem:[#allocation3 + $0x434] ss:$8 sps:$4 sm:$0xff]   ;;  %s6141_s25 = sshll.u32 %s11203_s16, 4  ;;  %p12293_p3 = scmp.ne.s32.totalorder %s11661_s28, 0  ;;  %s11272_s25 = int_to_ptr.vmem [resolvable:$true] %s6141_s25 }
  0xa4   : > { %11682 = vst [vmem:[#allocation22_spill] sm:$0xff] %v11681_v54  ;;  %s8686_s12 = scalar_lea.vmem %s11272_s25, 4096  ;;  %s8772_s9 = smov [#allocation11]  }
  0xa5   : > { %2688 = vmatpush1.bf16.msra.mxu1 %v8129_v56  ;;  %v11334_v56 = vunpack.c.l.bf16 %v9035_v30  ;;  %p8687_p2 = scmp.ne.s32.totalorder %s11272_s25, %s8686_s12  ;;  %s8690_s6 = sshll.u32 %s8772_s9, 4  ;;  %s8691_s6 = int_to_ptr.vmem [resolvable:$false] %s8690_s6 }
  0xa6   : > { %3940 = vmatpush1.bf16.msra.mxu0 %v8130_v58  ;;  %2689 = vmatprep.subr.bf16.mxu1 %v8131_v59  ;;  %v8163_v58 = vld [vmem:[#allocation3 + $0x1d4] ss:$8 sps:$4 sm:$0xff]   ;;  %v9066_v59 = vpack.c.bf16 %v898_v53, %v1082_v3  ;;  %s8692_s8 = scalar_lea.vmem %s8691_s6, 8192  ;;  %p8693_p8 = scmp.lt.s32.totalorder %s11272_s25, %s8691_s6 }
  0xa7   : > { %3941 = vmatprep.subr.bf16.mxu0 %v8133_v60  ;;  %v11329_v60 = vunpack.c.l.bf16 %v9038_v32  ;;  %v9099_v53 = vld [vmem:[%s9029_s13 + $0x30] sm:$0xff]  ;;  %p8688_p4 = pnand %p8687_p2, %p12293_p3  ;;  %p8694_p11 = scmp.lt.s32.totalorder %s8692_s8, %s8686_s12 }
  0xa8   : > { %11683 = vst [vmem:[#allocation23_spill] sm:$0xff] %v9066_v59  ;;  %6606 = vmatprep.mubr.msk.bf16.mxu1 %vm9060_vm3, %v9066_v59  ;;  %v8175_v3 = vld [vmem:[#allocation3 + $0x1f4] ss:$8 sps:$4 sm:$0xff]   ;;  %v11347_v45 = vunpack.c.h.bf16 %v9099_v53  ;;  %v9258_v6 = vcombine.high %v9099_v53, %v9111_v20  ;;  %v9262_v14 = vcombine.low %v9099_v53, %v9111_v20 }
  0xa9   : > { %2690 = vmatpush1.bf16.msra.mxu1 %v8135_v62  ;;  %v9070_v62 = vld [vmem:[%s9029_s13 + $0x10] sm:$0xff]  ;;  %p8689_p7 = pneg %p8688_p4  ;;  %p8695_p13 = por %p8694_p11, %p8693_p8 }
  0xaa   : > { %3942 = vmatpush1.bf16.msra.mxu0 %v8136_v63  ;;  %2691 = vmatprep.subr.bf16.mxu1 %v8137_v0  ;;  %v8165_v63 = vld [vmem:[#allocation3 + $0x3d0] ss:$8 sps:$4 sm:$0xff]   ;;  %11709 = vst [vmem:[#allocation41_spill] sm:$0xff] %v9258_v6  ;;  %11710 = vst [vmem:[#allocation42_spill] sm:$0xff] %v9262_v14 }
  0xab   : > { %3943 = vmatprep.subr.bf16.mxu0 %v8139_v10  ;;  %v8166_v0 = vld [vmem:[#allocation3 + $0x1d0] ss:$8 sps:$4 sm:$0xff]   ;;  %p8696_p1 = pnand %p8695_p13, %p8689_p7 }
  0xac   : > { %v9073_v10 = vld [vmem:[%s9029_s13 + $0x18] sm:$0xff] }
  0xad   : > { %2692 = vmatpush1.bf16.msra.mxu1 %v8141_v13  ;;  %v9079_v13 = vld [vmem:[%s9029_s13 + $0x20] sm:$0xff] }
  0xae   : > { %3944 = vmatpush1.bf16.msra.mxu0 %v8142_v16  ;;  %2693 = vmatprep.subr.bf16.mxu1 %v8143_v17  ;;  %v8167_v16 = vld [vmem:[#allocation3 + $0x3e4] ss:$8 sps:$4 sm:$0xff]   ;;  %v893_v17 = vrot.slane %v11335_v55, 7  ;;  %v8178_v55 = vld [vmem:[#allocation3 + $0x1f0] ss:$8 sps:$4 sm:$0xff]  }
  0xaf   : > { %3945 = vmatprep.subr.bf16.mxu0 %v8145_v19  ;;  %v895_v19 = vrot.slane %v11334_v56, 7  ;;  %v11343_v56 = vunpack.c.l.bf16 %v9111_v20 }
  0xb1   : > { %2694 = vmatpush1.bf16.msra.mxu1 %v8147_v21  ;;  %v11337_v21 = vunpack.c.h.bf16 %v9070_v62 }
  0xb2   : > { %3946 = vmatpush1.bf16.msra.mxu0 %v8148_v23  ;;  %2695 = vmatprep.subr.bf16.mxu1 %v8149_v26  ;;  %v9087_v23 = vld [vmem:[%s9029_s13 + $0x28] sm:$0xff] }
  0xb3   : > { %3947 = vmatprep.subr.bf16.mxu0 %v8151_v27  ;;  %v8169_v26 = vld [vmem:[#allocation3 + $0x1e4] ss:$8 sps:$4 sm:$0xff]   ;;  %v9091_v27 = vrot.slane %v11329_v60, 7  ;;  %v901_v60 = vrot.slane %v11337_v21, 7  ;;  %v11344_v21 = vunpack.c.h.bf16 %v9122_v7  ;;  %v9247_v24 = vcombine.low %v9079_v13, %v9087_v23 }
  0xb5   : > { %2696 = vmatpush1.bf16.msra.mxu1 %v8153_v29  ;;  %v11331_v29 = vunpack.c.h.bf16 %v9073_v10  ;;  %v902_v38 = vsel %vm11495_vm0, %v9053_v48, %v901_v60  ;;  %v8179_v48 = vld [vmem:[#allocation3 + $0x200] ss:$8 sps:$4 sm:$0xff]   ;;  %11706 = vst [vmem:[#allocation38_spill] sm:$0xff] %v9247_v24 }
  0xb6   : > { %3948 = vmatpush1.bf16.msra.mxu0 %v8154_v36  ;;  %2697 = vmatprep.subr.bf16.mxu1 %v8155_v41  ;;  %v11332_v36 = vunpack.c.l.bf16 %v9070_v62  ;;  %v11333_v41 = vunpack.c.l.bf16 %v9073_v10 }
  0xb7   : > { %3949 = vmatprep.subr.bf16.mxu0 %v8157_v43  ;;  %v8171_v43 = vld [vmem:[#allocation3 + $0x3e0] ss:$8 sps:$4 sm:$0xff]  }
  0xb8   : > { %v899_v61 = vrot.slane %v11332_v36, 7  ;;  %v903_v4 = vrot.slane %v11333_v41, 7  ;;  %v11341_v36 = vunpack.c.h.bf16 %v9111_v20  ;;  %v11342_v41 = vunpack.c.l.bf16 %v9099_v53  ;;  %v8236_v20 = vld [vmem:[#allocation3 + $0x430] ss:$8 sps:$4 sm:$0xff]  }
  0xb9   : > { %2698 = vmatpush1.bf16.msra.mxu1 %v8159_v49  ;;  %v11336_v49 = vunpack.c.h.bf16 %v9079_v13 }
  0xba   : > { %3950 = vmatpush1.bf16.msra.mxu0 %v8160_v50  ;;  %2699 = vmatprep.subr.bf16.mxu1 %v8161_v52  ;;  %v8173_v50 = vld [vmem:[#allocation3 + $0x3f4] ss:$8 sps:$4 sm:$0xff]   ;;  %v11339_v52 = vunpack.c.h.bf16 %v9087_v23  ;;  %v900_v35 = vsel %vm11495_vm0, %v895_v19, %v899_v61  ;;  %v921_v5 = vrot.slane %v11341_v36, 7  ;;  %v915_v11 = vrot.slane %v11342_v41, 7 }
  0xbb   : > { %3951 = vmatprep.subr.bf16.mxu0 %v8163_v58  ;;  %v896_v58 = vsel %vm11495_vm0, %v893_v17, %v895_v19  ;;  %v8186_v19 = vld [vmem:[#allocation3 + $0x214] ss:$8 sps:$4 sm:$0xff]   ;;  %v9179_v36 = vcombine.high %v9032_v28, %v9035_v30  ;;  %v925_v41 = vrot.slane %v11344_v21, 7  ;;  %v9202_v21 = vld [vmem:[%s9029_s13 + $0x68] sm:$0xff] }
  0xbd   : > { %2700 = vmatpush1.bf16.msra.mxu1 %v8165_v63  ;;  %v1081_v63 = vsel %vm11495_vm0, %v9091_v27, %v893_v17  ;;  %v11346_v17 = vunpack.c.l.bf16 %v9087_v23  ;;  %11694 = vst [vmem:[#allocation28_spill] sm:$0xff] %v9179_v36 }
  0xbe   : > { %3952 = vmatpush1.bf16.msra.mxu0 %v8166_v0  ;;  %2701 = vmatprep.subr.bf16.mxu1 %v8167_v16  ;;  %v905_v0 = vrot.slane %v11331_v29, 7  ;;  %v909_v16 = vrot.slane %v11336_v49, 7  ;;  %v913_v29 = vrot.slane %v11339_v52, 7  ;;  %v9137_v49 = vpack.c.bf16 %v896_v58, %v1081_v63  ;;  %v8181_v52 = vld [vmem:[#allocation3 + $0x204] ss:$8 sps:$4 sm:$0xff]  }
  0xbf   : > { %3953 = vmatprep.subr.bf16.mxu0 %v8169_v26  ;;  %v11348_v26 = vunpack.c.l.bf16 %v9079_v13  ;;  %v9166_v63 = vrot.slane %v11343_v56, 7  ;;  %v9191_v56 = vcombine.low %v9032_v28, %v9035_v30 }
  0xc0   : > { %11687 = vst [vmem:[#allocation25_spill] sm:$0xff] %v9137_v49  ;;  %v906_v31 = vsel %vm11495_vm0, %v901_v60, %v905_v0  ;;  %v910_v58 = vsel %vm11495_vm0, %v905_v0, %v909_v16  ;;  %v917_v60 = vrot.slane %v11347_v45, 7  ;;  %v11690_v0 = vmov 0  ;;  %v8218_v45 = vld [vmem:[#allocation3 + $0x400] ss:$8 sps:$4 sm:$0xff]  }
  0xc1   : > { %2702 = vmatpush1.bf16.msra.mxu1 %v8171_v43  ;;  %v904_v43 = vsel %vm11495_vm0, %v899_v61, %v903_v4  ;;  %v914_v61 = vsel %vm11495_vm0, %v909_v16, %v913_v29  ;;  %v11691_v0 = vsel %vm9171_vm6, 4294967295, %v11690_v0  ;;  %v9175_v16 = vpack.c.bf16 %v906_v31, %v902_v38  ;;  %11696 = vst [vmem:[#allocation30_spill] sm:$0xff] %v9191_v56 }
  0xc2   : > { %3954 = vmatpush1.bf16.msra.mxu0 %v8172_v44  ;;  %2703 = vmatprep.subr.bf16.mxu1 %v8173_v50  ;;  %v907_v50 = vrot.slane %v11348_v26, 7  ;;  %11692 = vst [vmem:[#allocation26_spill] sm:$0xff] %v11691_v0  ;;  %v9187_v40 = vpack.c.bf16 %v904_v43, %v900_v35  ;;  %v9195_v31 = vcombine.high %v9070_v62, %v9073_v10  ;;  %v8191_v26 = vld [vmem:[#allocation3 + $0x224] ss:$8 sps:$4 sm:$0xff]   ;;  %v11720_v44 = vunpack.c.h.bf16 %v9227_v25 }
  0xc3   : > { %3955 = vmatprep.subr.bf16.mxu0 %v8175_v3  ;;  %v911_v3 = vrot.slane %v11346_v17, 7  ;;  %11693 = vst [vmem:[#allocation27_spill] sm:$0xff] %v9175_v16  ;;  %v9199_v38 = vcombine.low %v9070_v62, %v9073_v10  ;;  %v9204_v17 = vpack.c.bf16 %v914_v61, %v910_v58  ;;  %v918_v43 = vsel %vm11495_vm0, %v913_v29, %v917_v60 }
  0xc4   : > { %11695 = vst [vmem:[#allocation29_spill] sm:$0xff] %v9187_v40  ;;  %11697 = vst [vmem:[#allocation31_spill] sm:$0xff] %v9195_v31  ;;  %v908_v35 = vsel %vm11495_vm0, %v903_v4, %v907_v50  ;;  %v922_v58 = vsel %vm11495_vm0, %v917_v60, %v921_v5  ;;  %v920_v4 = vsel %vm11495_vm0, %v915_v11, %v9166_v63  ;;  %v9267_v60 = vld [vmem:[%s9029_s13 + $0x58] sm:$0xff]  ;;  %v949_v54 = vrot.slane %v11720_v44, 7 }
  0xc5   : > { %2704 = vmatpush1.bf16.msra.mxu1 %v8177_v42  ;;  %v9185_v42 = vrot.slane %v11345_v37, 7  ;;  %11698 = vst [vmem:[#allocation32_spill] sm:$0xff] %v9199_v38  ;;  %v8184_v37 = vld [vmem:[#allocation3 + $0x210] ss:$8 sps:$4 sm:$0xff]   ;;  %11699 = vst [vmem:[#allocation33_spill] sm:$0xff] %v9204_v17  ;;  %v916_v61 = vsel %vm11495_vm0, %v911_v3, %v915_v11  ;;  %v11722_v44 = vand.u32 15, %v8983_v8 }
  0xc6   : > { %3956 = vmatpush1.bf16.msra.mxu0 %v8178_v55  ;;  %v8220_v55 = vld [vmem:[#allocation3 + $0x404] ss:$8 sps:$4 sm:$0xff]   ;;  %v9230_v11 = vld [vmem:[%s9029_s13 + $0x78] sm:$0xff] }
  0xc7   : > { %4118 = vmatprep.subr.bf16.mxu0 %v8181_v52  ;;  %v912_v52 = vsel %vm11495_vm0, %v907_v50, %v911_v3  ;;  %2866 = vmatprep.subr.bf16.mxu1 %v8220_v55  ;;  %v8227_v50 = vld [vmem:[#allocation3 + $0x414] ss:$8 sps:$4 sm:$0xff]   ;;  %v926_v55 = vsel %vm11495_vm0, %v921_v5, %v925_v41  ;;  %11701 = vst [vmem:[#allocation35_spill] sm:$0xff] %v9230_v11  ;;  %v11721_v59 = vunpack.c.h.bf16 %v9230_v11  ;;  %vm9312_vm9 = vcmp.ne.s32.totalorder %v11722_v44, 0 }
  0xc8   : > { %6610 = vmatmul.mubr.msk.bf16.vlgmr.msra.gmra.mrb[0].mxu1 %vm9060_vm3, %v9137_v49  ;;  %v11725_v49 = vunpack.c.l.bf16 %v9202_v21  ;;  %vm9437_vm12 = vmpackc.low %vm11498_vm2, %vm9312_vm9  ;;  %vm11934_vm3 = vcmask 1046528  }
  0xc9   : > { %3958 = vmatmul.mubr.bf16.vlgmr.msra.gmra.mrb[0].mxu0 %v11349_v1  ;;  %6614 = vmatprep.mubr.msk.bf16.mxu1 %vm9171_vm6, %v9175_v16  ;;  %v930_v1 = vsel %vm11495_vm0, %v925_v41, %v9185_v42  ;;  %v9243_v41 = vcombine.high %v9079_v13, %v9087_v23  ;;  %v953_v32 = vrot.slane %v11721_v59, 7  ;;  %v11368_v16 = vunpack.c.l.bf16 %v9227_v25  ;;  %v8194_v59 = vld [vmem:[#allocation3 + $0x230] ss:$8 sps:$4 sm:$0xff]  }
  0xca   : > { %4119 = vmatpush1.bf16.msra.mxu0 %v8179_v48  ;;  %3967 = vmatprep.mubr.bf16.mxu0 %v9179_v36  ;;  %v9233_v48 = vpack.c.bf16 %v912_v52, %v908_v35  ;;  %v9254_v35 = vpack.c.bf16 %v920_v4, %v916_v61  ;;  %v8225_v52 = vld [vmem:[#allocation3 + $0x410] ss:$8 sps:$4 sm:$0xff]   ;;  %v9264_v3 = vpack.c.bf16 %v930_v1, %v926_v55  ;;  %v9273_v61 = vld [vmem:[%s9029_s13 + $0x80] sm:$0xff]  ;;  %v9276_v4 = vld [vmem:[%s9029_s13 + $0x88] sm:$0xff]  ;;  %v11714_v1 = vmov 0 }
  0xcb   : > { %4120 = vmatprep.subr.bf16.mxu0 %v8186_v19  ;;  %11705 = vst [vmem:[#allocation37_spill] sm:$0xff] %v9243_v41  ;;  %v9252_v19 = vpack.c.bf16 %v922_v58, %v918_v43  ;;  %2867 = vmatpush1.bf16.msra.mxu1 %v8218_v45  ;;  %11712 = vst [vmem:[#allocation44_spill] sm:$0xff] %v9273_v61  ;;  %v11715_v1 = vsel %vm9281_vm8, 4294967295, %v11714_v1  ;;  %v8189_v45 = vld [vmem:[#allocation3 + $0x220] ss:$8 sps:$4 sm:$0xff]   ;;  %v11717_v55 = vunpack.c.l.bf16 %v9122_v7  ;;  %v11718_v43 = vunpack.c.l.bf16 %v9125_v51 }
  0xcc   : > { %11702 = vst [vmem:[#allocation36_spill] sm:$0xff] %v9233_v48  ;;  %11708 = vst [vmem:[#allocation40_spill] sm:$0xff] %v9254_v35  ;;  %2868 = vmatprep.subr.bf16.mxu1 %v8227_v50  ;;  %v11719_v50 = vunpack.c.h.bf16 %v9202_v21  ;;  %v8231_v36 = vld [vmem:[#allocation3 + $0x424] ss:$8 sps:$4 sm:$0xff]   ;;  %v9318_v15 = vrot.slane %v11725_v49, 7  ;;  %v11727_v49 = vunpack.c.l.bf16 %v9230_v11  ;;  %v11728_v0 = vunpack.c.h.bf16 %v9273_v61 }
  0xcd   : > { %11707 = vst [vmem:[#allocation39_spill] sm:$0xff] %v9252_v19  ;;  %11711 = vst [vmem:[#allocation43_spill] sm:$0xff] %v9264_v3  ;;  %v923_v29 = vrot.slane %v11717_v55, 7  ;;  %v9289_v58 = vrot.slane %v11718_v43, 7  ;;  %v8196_v43 = vld [vmem:[#allocation3 + $0x234] ss:$8 sps:$4 sm:$0xff]   ;;  %v11737_v39 = vunpack.c.l.bf16 %v9273_v61 }
  0xce   : > { %11713 = vst [vmem:[#allocation45_spill] sm:$0xff] %v9276_v4  ;;  %4121 = vmatpush1.bf16.msra.mxu0 %v8184_v37  ;;  %11716 = vst [vmem:[#allocation46_spill] sm:$0xff] %v11715_v1  ;;  %v9294_v37 = vrot.slane %v11719_v50, 7  ;;  %v947_v50 = vrot.slane %v11368_v16, 7  ;;  %v951_v44 = vrot.slane %v11727_v49, 7  ;;  %v9344_v49 = vld [vmem:[%s9029_s13 + $0x90] sm:$0xff] }
  0xcf   : > { %4122 = vmatprep.subr.bf16.mxu0 %v8191_v26  ;;  %2869 = vmatpush1.bf16.msra.mxu1 %v8225_v52  ;;  %v954_v26 = vsel %vm11495_vm0, %v949_v54, %v953_v32  ;;  %v924_v16 = vsel %vm11495_vm0, %v9166_v63, %v923_v29  ;;  %11730 = vst [vmem:[#allocation48_spill] sm:$0xff] %v9344_v49  ;;  %v955_v25 = vrot.slane %v11737_v39, 7  ;;  %v8199_v39 = vld [vmem:[#allocation3 + $0x240] ss:$8 sps:$4 sm:$0xff]   ;;  %v8242_v61 = vld [vmem:[#allocation3 + $0x444] ss:$8 sps:$4 sm:$0xff]  }
  0xd0   : > { %6618 = vmatmul.mubr.msk.bf16.gmra.mrb[4].mxu1 %vm9171_vm6, %v9187_v40  ;;  %v950_v52 = vsel %vm11495_vm0, %v9294_v37, %v949_v54  ;;  %v8229_v40 = vld [vmem:[#allocation3 + $0x420] ss:$8 sps:$4 sm:$0xff]   ;;  %v11729_v54 = vunpack.c.h.bf16 %v9276_v4  ;;  %2870 = vmatprep.subr.bf16.mxu1 %v8231_v36  ;;  %v928_v63 = vsel %vm11495_vm0, %v923_v29, %v9289_v58  ;;  %v8249_v55 = vld [vmem:[#allocation3 + $0x454] ss:$8 sps:$4 sm:$0xff]  }
  0xd1   : > { %3968 = vmatmul.mubr.bf16.gmra.mrb[4].mxu0 %v9191_v56  ;;  %6622 = vmatprep.mubr.msk.bf16.mxu1 %vm9281_vm8, %v9204_v17  ;;  %v9329_v8 = vpack.c.bf16 %v954_v26, %v950_v52  ;;  %v957_v56 = vrot.slane %v11728_v0, 7  ;;  %v948_v17 = vsel %vm11495_vm0, %v9318_v15, %v947_v50  ;;  %v11732_v0 = vmov 0  ;;  %v9370_v29 = vld [vmem:[%s9029_s13 + $0xa0] sm:$0xff] }
  0xd2   : > { %3977 = vmatprep.mubr.bf16.mxu0 %v9195_v31  ;;  %v961_v57 = vrot.slane %v11729_v54, 7  ;;  %4123 = vmatpush1.bf16.msra.mxu0 %v8189_v45  ;;  %v9347_v31 = vld [vmem:[%s9029_s13 + $0x98] sm:$0xff]  ;;  %v11733_v0 = vsel %vm9352_vm10, 4294967295, %v11732_v0  ;;  %v8201_v45 = vld [vmem:[#allocation3 + $0x244] ss:$8 sps:$4 sm:$0xff]   ;;  %v952_v54 = vsel %vm11495_vm0, %v947_v50, %v951_v44  ;;  %11739 = vst [vmem:[#allocation53_spill] sm:$0xff] %v9370_v29  ;;  %v11383_v50 = vunpack.c.h.bf16 %v9344_v49 }
  0xd3   : > { %11726 = vst [vmem:[#allocation47_spill] sm:$0xff] %v9329_v8  ;;  %11731 = vst [vmem:[#allocation49_spill] sm:$0xff] %v9347_v31  ;;  %4124 = vmatprep.subr.bf16.mxu0 %v8196_v43  ;;  %v958_v52 = vsel %vm11495_vm0, %v953_v32, %v957_v56  ;;  %v9361_v36 = vpack.c.bf16 %v952_v54, %v948_v17  ;;  %v11738_v43 = vunpack.c.l.bf16 %v9276_v4  ;;  %2871 = vmatpush1.bf16.msra.mxu1 %v8229_v40  ;;  %v9377_v17 = vld [vmem:[%s9029_s13 + $0xa8] sm:$0xff] }
  0xd4   : > { %11734 = vst [vmem:[#allocation50_spill] sm:$0xff] %v11733_v0  ;;  %v962_v26 = vsel %vm11495_vm0, %v957_v56, %v961_v57  ;;  %v11382_v56 = vunpack.c.l.bf16 %v9344_v49  ;;  %2872 = vmatprep.subr.bf16.mxu1 %v8238_v47  ;;  %v956_v40 = vsel %vm11495_vm0, %v951_v44, %v955_v25  ;;  %v965_v47 = vrot.slane %v11383_v50, 7  ;;  %v9408_v50 = vld [vmem:[%s9029_s13 + $0xb0] sm:$0xff] }
  0xd5   : > { %11735 = vst [vmem:[#allocation51_spill] sm:$0xff] %v9361_v36  ;;  %v9363_v5 = vpack.c.bf16 %v962_v26, %v958_v52  ;;  %v959_v11 = vrot.slane %v11738_v43, 7  ;;  %v9379_v26 = vpack.c.bf16 %v928_v63, %v924_v16  ;;  %v8206_v52 = vld [vmem:[#allocation3 + $0x254] ss:$8 sps:$4 sm:$0xff]   ;;  %v11388_v43 = vunpack.c.l.bf16 %v9347_v31 }
  0xd6   : > { %4125 = vmatpush1.bf16.msra.mxu0 %v8194_v59  ;;  %v11742_v16 = vunpack.c.h.bf16 %v9347_v31  ;;  %v963_v63 = vrot.slane %v11382_v56, 7  ;;  %v11744_v56 = vand.u32 15, %v8986_v9  ;;  %v11750_v9 = vmov 0 }
  0xd7   : > { %11736 = vst [vmem:[#allocation52_spill] sm:$0xff] %v9363_v5  ;;  %11740 = vst [vmem:[#allocation54_spill] sm:$0xff] %v9379_v26  ;;  %v960_v54 = vsel %vm11495_vm0, %v955_v25, %v959_v11  ;;  %4126 = vmatprep.subr.bf16.mxu0 %v8201_v45  ;;  %v11743_v25 = vunpack.c.h.bf16 %v9250_v18  ;;  %v8204_v45 = vld [vmem:[#allocation3 + $0x250] ss:$8 sps:$4 sm:$0xff]   ;;  %2873 = vmatpush1.bf16.msra.mxu1 %v8236_v20  ;;  %v11751_v9 = vsel %vm9437_vm12, 4294967295, %v11750_v9 }
  0xd8   : > { %v9384_v32 = vpack.c.bf16 %v960_v54, %v956_v40  ;;  %v969_v59 = vrot.slane %v11742_v16, 7  ;;  %6626 = vmatmul.mubr.msk.bf16.gmra.mrb[8].mxu1 %vm9281_vm8, %v9233_v48  ;;  %v9401_v40 = vld [vmem:[%s9029_s13 + $0x60] sm:$0xff]  ;;  %v967_v54 = vrot.slane %v11388_v43, 7  ;;  %v964_v1 = vsel %vm11495_vm0, %v959_v11, %v963_v63  ;;  %11752 = vst [vmem:[#allocation57_spill] sm:$0xff] %v11751_v9  ;;  %2874 = vmatprep.subr.bf16.mxu1 %v8242_v61  ;;  %v9578_v9 = vld [vmem:[%s9029_s13 + $0xf0] sm:$0xff] }
  0xd9   : > { %3978 = vmatmul.mubr.bf16.gmra.mrb[8].mxu0 %v9199_v38  ;;  %v9398_v44 = vrot.slane %v11743_v25, 7  ;;  %6630 = vmatprep.mubr.msk.bf16.mxu1 %vm9352_vm10, %v9252_v19  ;;  %v966_v25 = vsel %vm11495_vm0, %v961_v57, %v965_v47  ;;  %v9419_v38 = vld [vmem:[%s9029_s13 + $0xb8] sm:$0xff]  ;;  %vm9423_vm11 = vcmp.ne.s32.totalorder %v11744_v56, 0  ;;  %v11748_v57 = vunpack.c.h.bf16 %v9370_v29  ;;  %v8211_v20 = vld [vmem:[#allocation3 + $0x264] ss:$8 sps:$4 sm:$0xff]   ;;  %11776 = vst [vmem:[#allocation69_spill] sm:$0xff] %v9578_v9 }
  0xda   : > { %11741 = vst [vmem:[#allocation55_spill] sm:$0xff] %v9384_v32  ;;  %3987 = vmatprep.mubr.bf16.mxu0 %v9243_v41  ;;  %v970_v48 = vsel %vm11495_vm0, %v965_v47, %v969_v59  ;;  %4127 = vmatpush1.bf16.msra.mxu0 %v8199_v39  ;;  %v968_v41 = vsel %vm11495_vm0, %v963_v63, %v967_v54  ;;  %v11749_v11 = vunpack.c.h.bf16 %v9377_v17  ;;  %v8240_v39 = vld [vmem:[#allocation3 + $0x440] ss:$8 sps:$4 sm:$0xff]   ;;  %v11408_v5 = vunpack.c.l.bf16 %v9419_v38  ;;  %vm9528_vm13 = vmpackc.low %vm11498_vm2, %vm9423_vm11 }
  0xdb   : > { %v9427_v19 = vpack.c.bf16 %v970_v48, %v966_v25  ;;  %v973_v47 = vrot.slane %v11748_v57, 7  ;;  %v11753_v48 = vunpack.c.h.bf16 %v9267_v60  ;;  %4128 = vmatprep.subr.bf16.mxu0 %v8206_v52  ;;  %v9445_v63 = vpack.c.bf16 %v968_v41, %v964_v1  ;;  %v9455_v32 = vld [vmem:[%s9029_s13 + $0xc0] sm:$0xff]  ;;  %v9458_v52 = vld [vmem:[%s9029_s13 + $0xc8] sm:$0xff]  ;;  %v8216_v25 = vld [vmem:[#allocation3 + $0x274] ss:$8 sps:$4 sm:$0xff]   ;;  %2875 = vmatpush1.bf16.msra.mxu1 %v8240_v39 }
  0xdc   : > { %v977_v43 = vrot.slane %v11749_v11, 7  ;;  %v11755_v57 = vunpack.c.l.bf16 %v9370_v29  ;;  %11756 = vst [vmem:[#allocation59_spill] sm:$0xff] %v9458_v52  ;;  %v8209_v1 = vld [vmem:[#allocation3 + $0x260] ss:$8 sps:$4 sm:$0xff]   ;;  %v11407_v41 = vunpack.c.l.bf16 %v9408_v50  ;;  %2876 = vmatprep.subr.bf16.mxu1 %v8249_v55  ;;  %v11411_v39 = vunpack.c.h.bf16 %v9458_v52 }
  0xdd   : > { %11747 = vst [vmem:[#allocation56_spill] sm:$0xff] %v9427_v19  ;;  %v9443_v56 = vrot.slane %v11753_v48, 7  ;;  %11754 = vst [vmem:[#allocation58_spill] sm:$0xff] %v9445_v63  ;;  %v974_v49 = vsel %vm11495_vm0, %v969_v59, %v973_v47  ;;  %v11410_v19 = vunpack.c.h.bf16 %v9408_v50  ;;  %v11758_v59 = vunpack.c.l.bf16 %v9377_v17 }
  0xde   : > { %v971_v11 = vrot.slane %v11755_v57, 7  ;;  %v978_v31 = vsel %vm11495_vm0, %v973_v47, %v977_v43  ;;  %4129 = vmatpush1.bf16.msra.mxu0 %v8204_v45  ;;  %v8247_v47 = vld [vmem:[#allocation3 + $0x450] ss:$8 sps:$4 sm:$0xff]   ;;  %v11759_v63 = vunpack.c.h.bf16 %v9419_v38  ;;  %v8253_v45 = vld [vmem:[#allocation3 + $0x464] ss:$8 sps:$4 sm:$0xff]   ;;  %v983_v55 = vrot.slane %v11408_v5, 7 }
  0xdf   : > { %v9461_v29 = vpack.c.bf16 %v978_v31, %v974_v49  ;;  %v975_v57 = vrot.slane %v11758_v59, 7  ;;  %v981_v48 = vrot.slane %v11410_v19, 7  ;;  %v934_v31 = vsel %vm11495_vm0, %v9185_v42, %v9398_v44  ;;  %4130 = vmatprep.subr.bf16.mxu0 %v8211_v20  ;;  %2877 = vmatpush1.bf16.msra.mxu1 %v8247_v47 }
  0xe0   : > { %v972_v61 = vsel %vm11495_vm0, %v967_v54, %v971_v11  ;;  %v985_v4 = vrot.slane %v11759_v63, 7  ;;  %v11409_v54 = vunpack.c.h.bf16 %v9455_v32  ;;  %6634 = vmatmul.mubr.msk.bf16.gmra.mrb[12].mxu1 %vm9352_vm10, %v9254_v35  ;;  %v979_v20 = vrot.slane %v11407_v41, 7  ;;  %2878 = vmatprep.subr.bf16.mxu1 %v8253_v45 }
  0xe1   : > { %11757 = vst [vmem:[#allocation60_spill] sm:$0xff] %v9461_v29  ;;  %v976_v49 = vsel %vm11495_vm0, %v971_v11, %v975_v57  ;;  %3988 = vmatmul.mubr.bf16.gmra.mrb[12].mxu0 %v9247_v24  ;;  %v982_v59 = vsel %vm11495_vm0, %v977_v43, %v981_v48  ;;  %6638 = vmatprep.mubr.msk.bf16.mxu1 %vm9437_vm12, %v9264_v3  ;;  %v9500_v43 = vrot.slane %v11411_v39, 7  ;;  %v11415_v41 = vunpack.c.l.bf16 %v9455_v32  ;;  %v8260_v39 = vld [vmem:[#allocation3 + $0x474] ss:$8 sps:$4 sm:$0xff]  }
  0xe2   : > { %v9482_v63 = vpack.c.bf16 %v976_v49, %v972_v61  ;;  %v986_v42 = vsel %vm11495_vm0, %v981_v48, %v985_v4  ;;  %3997 = vmatprep.mubr.bf16.mxu0 %v9258_v6  ;;  %v989_v61 = vrot.slane %v11409_v54, 7  ;;  %v938_v48 = vsel %vm11495_vm0, %v9398_v44, %v9443_v56  ;;  %4131 = vmatpush1.bf16.msra.mxu0 %v8209_v1  ;;  %v8214_v49 = vld [vmem:[#allocation3 + $0x270] ss:$8 sps:$4 sm:$0xff]   ;;  %v8224_v54 = vld [vmem:[#allocation3 + $0x284] ss:$8 sps:$4 sm:$0xff]  }
  0xe3   : > { %v9492_v11 = vpack.c.bf16 %v986_v42, %v982_v59  ;;  %v980_v59 = vsel %vm11495_vm0, %v975_v57, %v979_v20  ;;  %v8251_v42 = vld [vmem:[#allocation3 + $0x460] ss:$8 sps:$4 sm:$0xff]   ;;  %v11414_v5 = vunpack.c.l.bf16 %v9458_v52  ;;  %4132 = vmatprep.subr.bf16.mxu0 %v8216_v25  ;;  %v984_v19 = vsel %vm11495_vm0, %v979_v20, %v983_v55 }
  0xe4   : > { %11760 = vst [vmem:[#allocation61_spill] sm:$0xff] %v9482_v63  ;;  %v990_v3 = vsel %vm11495_vm0, %v985_v4, %v989_v61  ;;  %v994_v44 = vsel %vm11495_vm0, %v989_v61, %v9500_v43  ;;  %v9513_v1 = vadd.s32 224, %v8969_v2  ;;  %v9515_v57 = vpack.c.bf16 %v984_v19, %v980_v59  ;;  %2879 = vmatpush1.bf16.msra.mxu1 %v8251_v42 }
  0xe5   : > { %11761 = vst [vmem:[#allocation62_spill] sm:$0xff] %v9492_v11  ;;  %v9517_v47 = vpack.c.bf16 %v994_v44, %v990_v3  ;;  %v987_v25 = vrot.slane %v11415_v41, 7  ;;  %v9523_v20 = vrot.slane %v11414_v5, 7  ;;  %v11764_v4 = vmov 0  ;;  %v8222_v5 = vld [vmem:[#allocation3 + $0x280] ss:$8 sps:$4 sm:$0xff]   ;;  %2880 = vmatprep.subr.bf16.mxu1 %v8260_v39 }
  0xe6   : > { %11762 = vst [vmem:[#allocation63_spill] sm:$0xff] %v9515_v57  ;;  %v11765_v4 = vsel %vm9528_vm13, 4294967295, %v11764_v4  ;;  %v9532_v45 = vpack.c.bf16 %v938_v48, %v934_v31  ;;  %v9536_v3 = vcombine.high %v9122_v7, %v9125_v51  ;;  %v11769_v19 = vunpack.c.l.bf16 %v9250_v18  ;;  %4133 = vmatpush1.bf16.msra.mxu0 %v8214_v49  ;;  %v8235_v31 = vld [vmem:[#allocation3 + $0x294] ss:$8 sps:$4 sm:$0xff]   ;;  %v8258_v48 = vld [vmem:[#allocation3 + $0x470] ss:$8 sps:$4 sm:$0xff]  }
  0xe7   : > { %11763 = vst [vmem:[#allocation64_spill] sm:$0xff] %v9517_v47  ;;  %11766 = vst [vmem:[#allocation65_spill] sm:$0xff] %v11765_v4  ;;  %v11770_v59 = vunpack.c.l.bf16 %v9267_v60  ;;  %v11771_v16 = vunpack.c.h.bf16 %v9401_v40  ;;  %v11430_v35 = vunpack.c.l.bf16 %v9401_v40  ;;  %v988_v0 = vsel %vm11495_vm0, %v983_v55, %v987_v25  ;;  %4134 = vmatprep.subr.bf16.mxu0 %v8224_v54  ;;  %v8233_v55 = vld [vmem:[#allocation3 + $0x290] ss:$8 sps:$4 sm:$0xff]   ;;  %v8262_v54 = vld [vmem:[#allocation3 + $0x480] ss:$8 sps:$4 sm:$0xff]  }
  0xe8   : > { %11767 = vst [vmem:[#allocation66_spill] sm:$0xff] %v9532_v45  ;;  %11768 = vst [vmem:[#allocation67_spill] sm:$0xff] %v9536_v3  ;;  %v931_v61 = vrot.slane %v11769_v19, 7  ;;  %v992_v52 = vsel %vm11495_vm0, %v987_v25, %v9523_v20  ;;  %6642 = vmatmul.mubr.msk.bf16.gmra.mrb[16].mxu1 %vm9437_vm12, %v9379_v26  ;;  %v11773_v49 = vand.u32 15, %v8990_v12  ;;  %v9561_v25 = vld [vmem:[%s9029_s13 + $0xe8] sm:$0xff]  ;;  %v11779_v39 = vand.u32 15, %v8995_v22 }
  0xe9   : > { %v935_v44 = vrot.slane %v11770_v59, 7  ;;  %v941_v41 = vrot.slane %v11771_v16, 7  ;;  %v9548_v19 = vpack.c.bf16 %v992_v52, %v988_v0  ;;  %v8264_v59 = vld [vmem:[#allocation3 + $0x484] ss:$8 sps:$4 sm:$0xff]   ;;  %3998 = vmatmul.mubr.bf16.gmra.mrb[16].mxu0 %v9262_v14  ;;  %6646 = vmatprep.mubr.msk.bf16.mxu1 %vm9528_vm13, %v9532_v45  ;;  %v939_v45 = vrot.slane %v11430_v35, 7 }
  0xea   : > { %vm9556_vm14 = vcmp.ne.s32.totalorder %v11773_v49, 0  ;;  %4007 = vmatprep.mubr.bf16.mxu0 %v9536_v3  ;;  %v932_v0 = vsel %vm11495_vm0, %v9289_v58, %v931_v61  ;;  %v8246_v12 = vld [vmem:[#allocation3 + $0x2a4] ss:$8 sps:$4 sm:$0xff]   ;;  %4135 = vmatpush1.bf16.msra.mxu0 %v8222_v5  ;;  %v8271_v26 = vld [vmem:[#allocation3 + $0x494] ss:$8 sps:$4 sm:$0xff]   ;;  %v11777_v58 = vunpack.c.h.bf16 %v9032_v28  ;;  %vm9586_vm15 = vcmp.ne.s32.totalorder %v11779_v39, 0 }
  0xeb   : > { %11772 = vst [vmem:[#allocation68_spill] sm:$0xff] %v9548_v19  ;;  %v936_v52 = vsel %vm11495_vm0, %v931_v61, %v935_v44  ;;  %v942_v16 = vsel %vm11495_vm0, %v9443_v56, %v941_v41  ;;  %v946_v49 = vsel %vm11495_vm0, %v941_v41, %v9294_v37  ;;  %2881 = vmatpush1.bf16.msra.mxu1 %v8258_v48  ;;  %v11782_v5 = vunpack.c.h.bf16 %v9035_v30  ;;  %vm9602_vm1 = vmpackc.low %vm11498_vm2, %vm9556_vm14 }
  0xec   : > { %v9582_v61 = vrot.slane %v11777_v58, 1  ;;  %4136 = vmatprep.subr.bf16.mxu0 %v8235_v31  ;;  %2882 = vmatprep.subr.bf16.mxu1 %v8264_v59  ;;  %v9593_v41 = vpack.c.bf16 %v936_v52, %v932_v0  ;;  %v9597_v48 = vcombine.low %v9122_v7, %v9125_v51  ;;  %v11785_v22 = vmov 0  ;;  %v8244_v31 = vld [vmem:[#allocation3 + $0x2a0] ss:$8 sps:$4 sm:$0xff]   ;;  %v8257_v52 = vld [vmem:[#allocation3 + $0x2b4] ss:$8 sps:$4 sm:$0xff]   ;;  %vm9688_vm7 = vmpackc.low %vm11498_vm2, %vm9586_vm15 }
  0xed   : > { %v1248_v56 = vrot.slane %v11782_v5, 1  ;;  %v11786_v22 = vsel %vm9602_vm1, 4294967295, %v11785_v22  ;;  %v9607_v39 = vpack.c.bf16 %v946_v49, %v942_v16  ;;  %v9611_v0 = vcombine.high %v9250_v18, %v9267_v60  ;;  %v8269_v58 = vld [vmem:[#allocation3 + $0x490] ss:$8 sps:$4 sm:$0xff]   ;;  %v8275_v49 = vld [vmem:[#allocation3 + $0x4a4] ss:$8 sps:$4 sm:$0xff]  }
  0xee   : > { %11778 = vst [vmem:[#allocation70_spill] sm:$0xff] %v9582_v61  ;;  %11783 = vst [vmem:[#allocation71_spill] sm:$0xff] %v9593_v41  ;;  %v9615_v42 = vadd.s32 240, %v8969_v2  ;;  %v940_v35 = vsel %vm11495_vm0, %v935_v44, %v939_v45  ;;  %v944_v37 = vsel %vm11495_vm0, %v939_v45, %v9318_v15  ;;  %v9622_v16 = vcombine.low %v9250_v18, %v9267_v60  ;;  %v8255_v44 = vld [vmem:[#allocation3 + $0x2b0] ss:$8 sps:$4 sm:$0xff]  }
  0xef   : > { %11784 = vst [vmem:[#allocation72_spill] sm:$0xff] %v9597_v48  ;;  %11787 = vst [vmem:[#allocation73_spill] sm:$0xff] %v11786_v22  ;;  %4137 = vmatpush1.bf16.msra.mxu0 %v8233_v55  ;;  %2883 = vmatpush1.bf16.msra.mxu1 %v8262_v54  ;;  %v11437_v59 = vunpack.c.l.bf16 %v9578_v9  ;;  %v11791_v5 = vunpack.c.h.bf16 %v9561_v25  ;;  %v11792_v6 = vunpack.c.h.bf16 %v9578_v9  ;;  %v9633_v45 = vadd.s32 8, %v8969_v2  ;;  %v8288_v22 = vld [vmem:[#allocation3 + $0x2e0] ss:$8 sps:$4 sm:$0xff]  }
  0xf0   : > { %11788 = vst [vmem:[#allocation74_spill] sm:$0xff] %v9607_v39  ;;  %11789 = vst [vmem:[#allocation75_spill] sm:$0xff] %v9611_v0  ;;  %4138 = vmatprep.subr.bf16.mxu0 %v8246_v12  ;;  %2884 = vmatprep.subr.bf16.mxu1 %v8271_v26  ;;  %v11793_v26 = vunpack.c.l.bf16 %v9561_v25  ;;  %v11794_v54 = vunpack.c.h.bf16 %v9070_v62  ;;  %v9760_v4 = vadd.s32 56, %v8969_v2 }
  0xf1   : > { %11790 = vst [vmem:[#allocation76_spill] sm:$0xff] %v9622_v16  ;;  %v9627_v14 = vrot.slane %v11791_v5, 7  ;;  %v1013_v15 = vrot.slane %v11792_v6, 7  ;;  %6650 = vmatmul.mubr.msk.bf16.gmra.mrb[20].mxu1 %vm9528_vm13, %v9593_v41  ;;  %4008 = vmatmul.mubr.bf16.gmra.mrb[20].mxu0 %v9597_v48  ;;  %v1011_v12 = vrot.slane %v11437_v59, 7  ;;  %v9651_v5 = vpack.c.bf16 %v944_v37, %v940_v35 }
  0xf2   : > { %v9641_v55 = vrot.slane %v11793_v26, 7  ;;  %v1252_v6 = vrot.slane %v11794_v54, 1  ;;  %6654 = vmatprep.mubr.msk.bf16.mxu1 %vm9602_vm1, %v9607_v39  ;;  %4017 = vmatprep.mubr.bf16.mxu0 %v9611_v0  ;;  %v11796_v59 = vand.u32 15, %v9001_v33  ;;  %v8268_v54 = vld [vmem:[#allocation3 + $0x2c4] ss:$8 sps:$4 sm:$0xff]   ;;  %v11801_v0 = vunpack.c.l.bf16 %v9032_v28 }
  0xf3   : > { %11795 = vst [vmem:[#allocation77_spill] sm:$0xff] %v9651_v5  ;;  %v1014_v26 = vsel %vm11495_vm0, %v9627_v14, %v1013_v15  ;;  %v1016_v41 = vsel %vm11495_vm0, %v1013_v15, %v9049_v46  ;;  %4139 = vmatpush1.bf16.msra.mxu0 %v8244_v31  ;;  %2885 = vmatpush1.bf16.msra.mxu1 %v8269_v58  ;;  %v8273_v39 = vld [vmem:[#allocation3 + $0x4a0] ss:$8 sps:$4 sm:$0xff]   ;;  %v8282_v46 = vld [vmem:[#allocation3 + $0x4b4] ss:$8 sps:$4 sm:$0xff]  }
  0xf4   : > { %vm9659_vm5 = vcmp.ne.s32.totalorder %v11796_v59, 0  ;;  %v9663_v9 = vpack.c.bf16 %v1016_v41, %v1014_v26  ;;  %v1012_v35 = vsel %vm11495_vm0, %v9641_v55, %v1011_v12  ;;  %v1015_v37 = vsel %vm11495_vm0, %v1011_v12, %v9091_v27  ;;  %4140 = vmatprep.subr.bf16.mxu0 %v8257_v52  ;;  %2886 = vmatprep.subr.bf16.mxu1 %v8275_v49  ;;  %v8266_v41 = vld [vmem:[#allocation3 + $0x2c0] ss:$8 sps:$4 sm:$0xff]   ;;  %v8280_v15 = vld [vmem:[#allocation3 + $0x4b0] ss:$8 sps:$4 sm:$0xff]  }
  0xf5   : > { %v9669_v33 = vpack.c.bf16 %v1015_v37, %v1012_v35  ;;  %v1249_v31 = vsel %vm11502_vm4, %v9582_v61, %v1248_v56  ;;  %v1253_v58 = vsel %vm11502_vm4, %v1248_v56, %v1252_v6  ;;  %v9679_v48 = vrot.slane %v11801_v0, 1  ;;  %v8279_v28 = vld [vmem:[#allocation3 + $0x2d4] ss:$8 sps:$4 sm:$0xff]   ;;  %vm9745_vm9 = vmpackc.low %vm11498_vm2, %vm9659_vm5 }
  0xf6   : > { %11799 = vst [vmem:[#allocation78_spill] sm:$0xff] %v9663_v9  ;;  %v9675_v26 = vpack.c.bf16 %v1253_v58, %v1249_v31  ;;  %v11803_v27 = vunpack.c.l.bf16 %v9035_v30  ;;  %v11804_v49 = vunpack.c.l.bf16 %v9070_v62  ;;  %v11805_v35 = vmov 0  ;;  %v8286_v62 = vld [vmem:[#allocation3 + $0x4c4] ss:$8 sps:$4 sm:$0xff]  }
  0xf7   : > { %11800 = vst [vmem:[#allocation79_spill] sm:$0xff] %v9669_v33  ;;  %11802 = vst [vmem:[#allocation80_spill] sm:$0xff] %v9679_v48  ;;  %v11806_v35 = vsel %vm9688_vm7, 4294967295, %v11805_v35  ;;  %v9694_v56 = vcombine.high %v9401_v40, %v9202_v21  ;;  %v9697_v0 = vadd.s32 24, %v8969_v2  ;;  %v11809_v30 = vunpack.c.h.bf16 %v9073_v10  ;;  %4141 = vmatpush1.bf16.msra.mxu0 %v8255_v44  ;;  %2887 = vmatpush1.bf16.msra.mxu1 %v8273_v39 }
  0xf8   : > { %v1245_v52 = vrot.slane %v11803_v27, 1  ;;  %v1250_v12 = vrot.slane %v11804_v49, 1  ;;  %11807 = vst [vmem:[#allocation81_spill] sm:$0xff] %v11806_v35  ;;  %v11810_v58 = vunpack.c.h.bf16 %v9079_v13  ;;  %v11811_v49 = vunpack.c.l.bf16 %v9073_v10  ;;  %4142 = vmatprep.subr.bf16.mxu0 %v8268_v54  ;;  %2888 = vmatprep.subr.bf16.mxu1 %v8282_v46  ;;  %v8284_v10 = vld [vmem:[#allocation3 + $0x4c0] ss:$8 sps:$4 sm:$0xff]  }
  0xf9   : > { %11808 = vst [vmem:[#allocation82_spill] sm:$0xff] %v9694_v56  ;;  %v1256_v37 = vrot.slane %v11809_v30, 1  ;;  %v11813_v44 = vunpack.c.l.bf16 %v9079_v13  ;;  %6658 = vmatmul.mubr.msk.bf16.gmra.mrb[24].mxu1 %vm9602_vm1, %v9651_v5  ;;  %4018 = vmatmul.mubr.bf16.gmra.mrb[24].mxu0 %v9622_v16  ;;  %v9731_v13 = vcombine.low %v9401_v40, %v9202_v21  ;;  %v11830_v5 = vld [vmem:[#allocation35_spill] sm:$0xff] }
  0xfa   : > { %v1246_v3 = vsel %vm11502_vm4, %v9679_v48, %v1245_v52  ;;  %v1251_v31 = vsel %vm11502_vm4, %v1245_v52, %v1250_v12  ;;  %v1260_v27 = vrot.slane %v11810_v58, 1  ;;  %v1254_v59 = vrot.slane %v11811_v49, 1  ;;  %v8277_v52 = vld [vmem:[#allocation3 + $0x2d0] ss:$8 sps:$4 sm:$0xff]   ;;  %6662 = vmatprep.mubr.msk.bf16.mxu1 %vm9688_vm7, %v9329_v8  ;;  %4027 = vmatprep.mubr.bf16.mxu0 %v9694_v56  ;;  %v8290_v58 = vld [vmem:[#allocation3 + $0x2e4] ss:$8 sps:$4 sm:$0xff]  }
  0xfb   : > { %v9708_v61 = vpack.c.bf16 %v1251_v31, %v1246_v3  ;;  %v1257_v39 = vsel %vm11502_vm4, %v1252_v6, %v1256_v37  ;;  %v1258_v24 = vrot.slane %v11813_v44, 1  ;;  %v9721_v3 = vadd.s32 40, %v8969_v2  ;;  %11816 = vst [vmem:[#allocation85_spill] sm:$0xff] %v9731_v13  ;;  %4143 = vmatpush1.bf16.msra.mxu0 %v8266_v41  ;;  %2889 = vmatpush1.bf16.msra.mxu1 %v8280_v15  ;;  %v8293_v49 = vld [vmem:[#allocation3 + $0x4d4] ss:$8 sps:$4 sm:$0xff]  }
  0xfc   : > { %v1261_v54 = vsel %vm11502_vm4, %v1256_v37, %v1260_v27  ;;  %v1255_v46 = vsel %vm11502_vm4, %v1250_v12, %v1254_v59  ;;  %v11815_v6 = vunpack.c.h.bf16 %v9087_v23  ;;  %v11819_v48 = vunpack.c.h.bf16 %v9099_v53  ;;  %4144 = vmatprep.subr.bf16.mxu0 %v8279_v28  ;;  %2890 = vmatprep.subr.bf16.mxu1 %v8286_v62  ;;  %v8291_v56 = vld [vmem:[#allocation3 + $0x4d0] ss:$8 sps:$4 sm:$0xff]  }
  0xfd   : > { %11812 = vst [vmem:[#allocation83_spill] sm:$0xff] %v9708_v61  ;;  %11814 = vst [vmem:[#allocation84_spill] sm:$0xff] %v9721_v3  ;;  %v9733_v37 = vpack.c.bf16 %v1261_v54, %v1257_v39  ;;  %v1259_v12 = vsel %vm11502_vm4, %v1254_v59, %v1258_v24  ;;  %v11820_v39 = vmov 0  ;;  %v11823_v59 = vand.u32 15, %v9004_v34  ;;  %v11831_v34 = vld [vmem:[#allocation34_spill] sm:$0xff] }
  0xfe   : > { %v1264_v31 = vrot.slane %v11815_v6, 1  ;;  %v9736_v44 = vpack.c.bf16 %v1259_v12, %v1255_v46  ;;  %v1268_v8 = vrot.slane %v11819_v48, 1  ;;  %v11821_v39 = vsel %vm9745_vm9, 4294967295, %v11820_v39  ;;  %v11828_v46 = vld [vmem:[#allocation24_spill] sm:$0xff] }
  0xff   : > { %11817 = vst [vmem:[#allocation86_spill] sm:$0xff] %v9733_v37  ;;  %11822 = vst [vmem:[#allocation88_spill] sm:$0xff] %v11821_v39  ;;  %vm9751_vm11 = vcmp.ne.s32.totalorder %v11823_v59, 0  ;;  %v11826_v15 = vunpack.c.l.bf16 %v9087_v23  ;;  %v11827_v48 = vunpack.c.l.bf16 %v9099_v53  ;;  %v11829_v12 = vunpack.c.h.bf16 %v11828_v46  ;;  %v8301_v53 = vld [vmem:[#allocation3 + $0x2f4] ss:$8 sps:$4 sm:$0xff]   ;;  %4145 = vmatpush1.bf16.msra.mxu0 %v8277_v52  ;;  %2891 = vmatpush1.bf16.msra.mxu1 %v8284_v10 }
 0x100   : > { %11818 = vst [vmem:[#allocation87_spill] sm:$0xff] %v9736_v44  ;;  %v1265_v30 = vsel %vm11502_vm4, %v1260_v27, %v1264_v31  ;;  %v9766_v59 = vcombine.high %v11831_v34, %v11830_v5  ;;  %v1269_v28 = vsel %vm11502_vm4, %v1264_v31, %v1268_v8  ;;  %v11833_v23 = vunpack.c.h.bf16 %v9122_v7  ;;  %4146 = vmatprep.subr.bf16.mxu0 %v8290_v58  ;;  %vm9849_vm15 = vmpackc.low %vm11498_vm2, %vm9751_vm11 }
 0x101   : > { %v1262_v27 = vrot.slane %v11826_v15, 1  ;;  %v1266_v54 = vrot.slane %v11827_v48, 1  ;;  %v1272_v6 = vrot.slane %v11829_v12, 1  ;;  %v8297_v15 = vld [vmem:[#allocation3 + $0x4e4] ss:$8 sps:$4 sm:$0xff]   ;;  %v9771_v48 = vpack.c.bf16 %v1269_v28, %v1265_v30  ;;  %2892 = vmatprep.subr.bf16.mxu1 %v8293_v49  ;;  %6666 = vmatmul.mubr.msk.bf16.gmra.mrb[28].mxu1 %vm9688_vm7, %v9361_v36 }
 0x102   : > { %11832 = vst [vmem:[#allocation24_spill] sm:$0xff] %v9766_v59  ;;  %v1276_v62 = vrot.slane %v11833_v23, 1  ;;  %v11836_v23 = vunpack.c.l.bf16 %v11828_v46  ;;  %v9784_v30 = vcombine.low %v11831_v34, %v11830_v5  ;;  %v11839_v52 = vunpack.c.l.bf16 %v9122_v7  ;;  %4028 = vmatmul.mubr.bf16.gmra.mrb[28].mxu0 %v9731_v13  ;;  %v8304_v46 = vld [vmem:[#allocation3 + $0x4f4] ss:$8 sps:$4 sm:$0xff]   ;;  %v8307_v28 = vld [vmem:[#allocation3 + $0x604] ss:$8 sps:$4 sm:$0xff]  }
 0x103   : > { %11834 = vst [vmem:[#allocation35_spill] sm:$0xff] %v9771_v48  ;;  %v1263_v16 = vsel %vm11502_vm4, %v1258_v24, %v1262_v27  ;;  %v1267_v44 = vsel %vm11502_vm4, %v1262_v27, %v1266_v54  ;;  %v1273_v37 = vsel %vm11502_vm4, %v1268_v8, %v1272_v6  ;;  %v8295_v8 = vld [vmem:[#allocation3 + $0x4e0] ss:$8 sps:$4 sm:$0xff]   ;;  %v11840_v58 = vunpack.c.h.bf16 %v9125_v51  ;;  %4037 = vmatprep.mubr.bf16.mxu0 %v9766_v59 }
 0x104   : > { %v9776_v3 = vpack.c.bf16 %v1267_v44, %v1263_v16  ;;  %v1277_v31 = vsel %vm11502_vm4, %v1272_v6, %v1276_v62  ;;  %v1270_v61 = vrot.slane %v11836_v23, 1  ;;  %11837 = vst [vmem:[#allocation89_spill] sm:$0xff] %v9784_v30  ;;  %v1274_v10 = vrot.slane %v11839_v52, 1  ;;  %v8299_v16 = vld [vmem:[#allocation3 + $0x2f0] ss:$8 sps:$4 sm:$0xff]   ;;  %v11842_v27 = vld [vmem:[#allocation52_spill] sm:$0xff]  ;;  %4147 = vmatpush1.bf16.msra.mxu0 %v8288_v22  ;;  %2893 = vmatpush1.bf16.msra.mxu1 %v8291_v56 }
 0x105   : > { %v9786_v24 = vpack.c.bf16 %v1277_v31, %v1273_v37  ;;  %v9796_v6 = vadd.s32 72, %v8969_v2  ;;  %v1280_v37 = vrot.slane %v11840_v58, 1  ;;  %v11841_v49 = vunpack.c.h.bf16 %v9250_v18  ;;  %6670 = vmatprep.mubr.msk.bf16.mxu1 %vm9745_vm9, %v11842_v27  ;;  %2894 = vmatprep.subr.bf16.mxu1 %v8297_v15 }
 0x106   : > { %11835 = vst [vmem:[#allocation34_spill] sm:$0xff] %v9776_v3  ;;  %v1271_v44 = vsel %vm11502_vm4, %v1266_v54, %v1270_v61  ;;  %v1275_v31 = vsel %vm11502_vm4, %v1270_v61, %v1274_v10  ;;  %v11843_v54 = vunpack.c.l.bf16 %v9125_v51  ;;  %v11844_v52 = vunpack.c.l.bf16 %v9250_v18  ;;  %v11846_v61 = vld [vmem:[#allocation17_spill] sm:$0xff]  ;;  %4148 = vmatprep.subr.bf16.mxu0 %v8301_v53 }
 0x107   : > { %11838 = vst [vmem:[#allocation90_spill] sm:$0xff] %v9786_v24  ;;  %v1284_v7 = vrot.slane %v11841_v49, 1  ;;  %v9812_v58 = vadd.s32 88, %v8969_v2  ;;  %v9814_v49 = vpack.c.bf16 %v1275_v31, %v1271_v44  ;;  %v1281_v36 = vsel %vm11502_vm4, %v1276_v62, %v1280_v37  ;;  %v11851_v31 = vld [vmem:[#allocation45_spill] sm:$0xff]  ;;  %v11852_v62 = vld [vmem:[#allocation44_spill] sm:$0xff] }
 0x108   : > { %v1278_v23 = vrot.slane %v11843_v54, 1  ;;  %v1282_v12 = vrot.slane %v11844_v52, 1  ;;  %v11847_v59 = vand.u32 15, %v11846_v61  ;;  %v9832_v54 = vcombine.high %v11852_v62, %v11851_v31  ;;  %2895 = vmatpush1.bf16.msra.mxu1 %v8295_v8  ;;  %4149 = vmatpush1.bf16.msra.mxu0 %v8299_v16  ;;  %v8302_v61 = vld [vmem:[#allocation3 + $0x4f0] ss:$8 sps:$4 sm:$0xff]  }
 0x109   : > { %11845 = vst [vmem:[#allocation91_spill] sm:$0xff] %v9814_v49  ;;  %v1285_v35 = vsel %vm11502_vm4, %v1280_v37, %v1284_v7  ;;  %v9840_v15 = vcombine.low %v11852_v62, %v11851_v31  ;;  %v11858_v53 = vunpack.c.l.bf16 %v9267_v60  ;;  %2896 = vmatprep.subr.bf16.mxu1 %v8304_v46  ;;  %4984 = vmatprep.subr.bf16.mxu0 %v8307_v28  ;;  %v11864_v8 = vunpack.c.h.bf16 %v11831_v34 }
 0x10a   : > { %vm9821_vm14 = vcmp.ne.s32.totalorder %v11847_v59, 0  ;;  %v9825_v18 = vpack.c.bf16 %v1285_v35, %v1281_v36  ;;  %v1279_v22 = vsel %vm11502_vm4, %v1274_v10, %v1278_v23  ;;  %v1283_v56 = vsel %vm11502_vm4, %v1278_v23, %v1282_v12  ;;  %11853 = vst [vmem:[#allocation45_spill] sm:$0xff] %v9832_v54  ;;  %4038 = vmatmul.mubr.bf16.gmra.mrb[32].mxu0 %v9784_v30 }
 0x10b   : > { %v9834_v37 = vpack.c.bf16 %v1283_v56, %v1279_v22  ;;  %v11855_v59 = vunpack.c.h.bf16 %v9267_v60  ;;  %11856 = vst [vmem:[#allocation92_spill] sm:$0xff] %v9840_v15  ;;  %v11857_v36 = vunpack.c.h.bf16 %v9401_v40  ;;  %v1286_v10 = vrot.slane %v11858_v53, 1  ;;  %4047 = vmatprep.mubr.bf16.mxu0 %v9832_v54  ;;  %vm9918_vm5 = vmpackc.low %vm11498_vm2, %vm9821_vm14 }
 0x10c   : > { %11850 = vst [vmem:[#allocation17_spill] sm:$0xff] %v9825_v18  ;;  %v11859_v23 = vmov 0  ;;  %v11862_v56 = vunpack.c.l.bf16 %v9401_v40  ;;  %v11863_v60 = vunpack.c.h.bf16 %v9202_v21  ;;  %v1300_v16 = vrot.slane %v11864_v8, 1  ;;  %v8331_v40 = vld [vmem:[#allocation3 + $0x504] ss:$8 sps:$4 sm:$0xff]   ;;  %2897 = vmatpush1.bf16.msra.mxu1 %v8302_v61 }
 0x10d   : > { %11854 = vst [vmem:[#allocation44_spill] sm:$0xff] %v9834_v37  ;;  %v1288_v52 = vrot.slane %v11855_v59, 1  ;;  %v1292_v35 = vrot.slane %v11857_v36, 1  ;;  %v11860_v23 = vsel %vm9849_vm15, 4294967295, %v11859_v23  ;;  %v9857_v36 = vadd.s32 104, %v8969_v2  ;;  %3059 = vmatprep.subr.bf16.mxu1 %v8331_v40 }
 0x10e   : > { %11861 = vst [vmem:[#allocation93_spill] sm:$0xff] %v11860_v23  ;;  %v1290_v59 = vrot.slane %v11862_v56, 1  ;;  %v1296_v53 = vrot.slane %v11863_v60, 1  ;;  %v1287_v44 = vsel %vm11502_vm4, %v1282_v12, %v1286_v10  ;;  %v11866_v56 = vld [vmem:[#allocation55_spill] sm:$0xff]  ;;  %v9908_v30 = vadd.s32 136, %v8969_v2 }
 0x10f   : > { %v1289_v22 = vsel %vm11502_vm4, %v1284_v7, %v1288_v52  ;;  %v1293_v41 = vsel %vm11502_vm4, %v1288_v52, %v1292_v35  ;;  %v11865_v7 = vunpack.c.l.bf16 %v9202_v21  ;;  %6674 = vmatmul.mubr.msk.bf16.gmra.mrb[32].mxu1 %vm9745_vm9, %v11866_v56  ;;  %v11868_v52 = vld [vmem:[#allocation56_spill] sm:$0xff]  ;;  %v11880_v40 = vunpack.c.h.bf16 %v11851_v31 }
 0x110   : > { %v9871_v60 = vpack.c.bf16 %v1293_v41, %v1289_v22  ;;  %v1291_v46 = vsel %vm11502_vm4, %v1286_v10, %v1290_v59  ;;  %v1297_v12 = vsel %vm11502_vm4, %v1292_v35, %v1296_v53  ;;  %6678 = vmatprep.mubr.msk.bf16.mxu1 %vm9849_vm15, %v11868_v52  ;;  %v1301_v8 = vsel %vm11502_vm4, %v1296_v53, %v1300_v16  ;;  %v11871_v10 = vld [vmem:[#allocation49_spill] sm:$0xff]  ;;  %v11872_v56 = vld [vmem:[#allocation48_spill] sm:$0xff] }
 0x111   : > { %v1294_v27 = vrot.slane %v11865_v7, 1  ;;  %v9880_v21 = vpack.c.bf16 %v1291_v46, %v1287_v44  ;;  %v11870_v22 = vunpack.c.l.bf16 %v11831_v34  ;;  %v9888_v28 = vcombine.high %v11872_v56, %v11871_v10 }
 0x112   : > { %11867 = vst [vmem:[#allocation94_spill] sm:$0xff] %v9871_v60  ;;  %v9890_v35 = vpack.c.bf16 %v1301_v8, %v1297_v12  ;;  %v9893_v52 = vadd.s32 120, %v8969_v2  ;;  %v11875_v46 = vunpack.c.h.bf16 %v11830_v5  ;;  %v11877_v34 = vunpack.c.l.bf16 %v11830_v5  ;;  %4048 = vmatmul.mubr.bf16.gmra.mrb[36].mxu0 %v9840_v15 }
 0x113   : > { %11869 = vst [vmem:[#allocation95_spill] sm:$0xff] %v9880_v21  ;;  %v1295_v7 = vsel %vm11502_vm4, %v1290_v59, %v1294_v27  ;;  %v1298_v41 = vrot.slane %v11870_v22, 1  ;;  %11873 = vst [vmem:[#allocation49_spill] sm:$0xff] %v9888_v28  ;;  %v11876_v59 = vunpack.c.h.bf16 %v11852_v62  ;;  %v11879_v12 = vunpack.c.l.bf16 %v11852_v62  ;;  %4057 = vmatprep.mubr.bf16.mxu0 %v9888_v28 }
 0x114   : > { %11874 = vst [vmem:[#allocation48_spill] sm:$0xff] %v9890_v35  ;;  %v1304_v53 = vrot.slane %v11875_v46, 1  ;;  %v1302_v22 = vrot.slane %v11877_v34, 1  ;;  %v1312_v5 = vrot.slane %v11880_v40, 1  ;;  %v11886_v40 = vld [vmem:[#allocation58_spill] sm:$0xff]  ;;  %v11887_v51 = vunpack.c.l.bf16 %v11851_v31 }
 0x115   : > { %v1299_v44 = vsel %vm11502_vm4, %v1294_v27, %v1298_v41  ;;  %v1308_v39 = vrot.slane %v11876_v59, 1  ;;  %v1306_v8 = vrot.slane %v11879_v12, 1  ;;  %v11894_v61 = vunpack.c.h.bf16 %v11871_v10 }
 0x116   : > { %v9902_v54 = vpack.c.bf16 %v1299_v44, %v1295_v7  ;;  %v1305_v27 = vsel %vm11502_vm4, %v1300_v16, %v1304_v53  ;;  %v1303_v59 = vsel %vm11502_vm4, %v1298_v41, %v1302_v22  ;;  %v11881_v7 = vmov 0 }
 0x117   : > { %v1309_v46 = vsel %vm11502_vm4, %v1304_v53, %v1308_v39  ;;  %v11882_v7 = vsel %vm9918_vm5, 4294967295, %v11881_v7  ;;  %v1307_v44 = vsel %vm11502_vm4, %v1302_v22, %v1306_v8  ;;  %v1313_v41 = vsel %vm11502_vm4, %v1308_v39, %v1312_v5  ;;  %6682 = vmatmul.mubr.msk.bf16.gmra.mrb[36].mxu1 %vm9849_vm15, %v11886_v40  ;;  %v11889_v39 = vld [vmem:[#allocation18_spill] sm:$0xff] }
 0x118   : > { %11878 = vst [vmem:[#allocation96_spill] sm:$0xff] %v9902_v54  ;;  %11883 = vst [vmem:[#allocation97_spill] sm:$0xff] %v11882_v7  ;;  %v9922_v62 = vpack.c.bf16 %v1309_v46, %v1305_v27  ;;  %v9925_v34 = vpack.c.bf16 %v1307_v44, %v1303_v59  ;;  %v11885_v53 = vunpack.c.h.bf16 %v11872_v56  ;;  %v1310_v22 = vrot.slane %v11887_v51, 1  ;;  %6686 = vmatprep.mubr.msk.bf16.mxu1 %vm9918_vm5, %v9461_v29 }
 0x119   : > { %v11888_v27 = vunpack.c.l.bf16 %v11872_v56  ;;  %v11890_v59 = vand.u32 15, %v11889_v39  ;;  %v1320_v39 = vrot.slane %v11894_v61, 1  ;;  %v11907_v44 = vunpack.c.h.bf16 %v9377_v17 }
 0x11a   : > { %11884 = vst [vmem:[#allocation98_spill] sm:$0xff] %v9922_v62  ;;  %v1316_v12 = vrot.slane %v11885_v53, 1  ;;  %v1311_v51 = vsel %vm11502_vm4, %v1306_v8, %v1310_v22  ;;  %v8564_v8 = vld [vmem:[%s9029_s13 + $0x98] sm:$0xff] }
 0x11b   : > { %v1314_v46 = vrot.slane %v11888_v27, 1  ;;  %vm9945_vm11 = vcmp.ne.s32.totalorder %v11890_v59, 0  ;;  %v9955_v27 = vadd.s32 152, %v8969_v2  ;;  %v11895_v59 = vld [vmem:[#allocation53_spill] sm:$0xff] }
 0x11c   : > { %v1317_v53 = vsel %vm11502_vm4, %v1312_v5, %v1316_v12  ;;  %v11896_v29 = vunpack.c.h.bf16 %v11895_v59  ;;  %v11897_v5 = vunpack.c.l.bf16 %v11871_v10  ;;  %v1321_v61 = vsel %vm11502_vm4, %v1316_v12, %v1320_v39  ;;  %vm9982_vm14 = vmpackc.low %vm11498_vm2, %vm9945_vm11 }
 0x11d   : > { %v9950_v31 = vpack.c.bf16 %v1317_v53, %v1313_v41  ;;  %v1315_v56 = vsel %vm11502_vm4, %v1310_v22, %v1314_v46  ;;  %v8563_v53 = vld [vmem:[%s9029_s13 + $0x90] sm:$0xff]  ;;  %v11916_v22 = vunpack.c.l.bf16 %v9408_v50 }
 0x11e   : > { %v9957_v16 = vpack.c.bf16 %v1315_v56, %v1311_v51  ;;  %v1324_v40 = vrot.slane %v11896_v29, 1  ;;  %v1318_v41 = vrot.slane %v11897_v5, 1  ;;  %v9967_v23 = vcombine.low %v8563_v53, %v8564_v8 }
 0x11f   : > { %v11899_v51 = vunpack.c.l.bf16 %v11895_v59  ;;  %v11901_v5 = vmov 0  ;;  %6690 = vmatmul.mubr.msk.bf16.gmra.mrb[40].mxu1 %vm9918_vm5, %v9482_v63 }
 0x120   : > { %11893 = vst [vmem:[#allocation18_spill] sm:$0xff] %v9957_v16  ;;  %11898 = vst [vmem:[#allocation53_spill] sm:$0xff] %v9967_v23  ;;  %v9974_v16 = vcombine.high %v11895_v59, %v9377_v17  ;;  %v1325_v29 = vsel %vm11502_vm4, %v1320_v39, %v1324_v40  ;;  %v1319_v10 = vsel %vm11502_vm4, %v1314_v46, %v1318_v41  ;;  %v11902_v5 = vsel %vm9982_vm14, 4294967295, %v11901_v5  ;;  %v9993_v59 = vld [vmem:[%s9029_s13 + $0xd8] sm:$0xff] }
 0x121   : > { %v1322_v56 = vrot.slane %v11899_v51, 1  ;;  %11903 = vst [vmem:[#allocation100_spill] sm:$0xff] %v11902_v5  ;;  %v9986_v53 = vpack.c.bf16 %v1325_v29, %v1321_v61  ;;  %v9990_v51 = vld [vmem:[%s9029_s13 + $0xd0] sm:$0xff]  ;;  %4058 = vmatmul.mubr.bf16.gmra.mrb[40].mxu0 %v9967_v23  ;;  %6694 = vmatprep.mubr.msk.bf16.mxu1 %vm9982_vm14, %v9492_v11  ;;  %v10006_v46 = vadd.s32 168, %v8969_v2  ;;  %v1328_v39 = vrot.slane %v11907_v44, 1  ;;  %v11909_v29 = vld [vmem:[#allocation19_spill] sm:$0xff] }
 0x122   : > { %11900 = vst [vmem:[#allocation99_spill] sm:$0xff] %v9974_v16  ;;  %4067 = vmatprep.mubr.bf16.mxu0 %v9974_v16  ;;  %v1330_v23 = vrot.slane %v11916_v22, 1  ;;  %v8567_v11 = vld [vmem:[%s9029_s13 + $0xb0] sm:$0xff] }
 0x123   : > { %11904 = vst [vmem:[#allocation101_spill] sm:$0xff] %v9986_v53  ;;  %v1323_v8 = vsel %vm11502_vm4, %v1318_v41, %v1322_v56  ;;  %11906 = vst [vmem:[#allocation103_spill] sm:$0xff] %v10006_v46  ;;  %v11908_v41 = vunpack.c.h.bf16 %v9408_v50  ;;  %v1329_v7 = vsel %vm11502_vm4, %v1324_v40, %v1328_v39  ;;  %v8565_v53 = vld [vmem:[%s9029_s13 + $0xa0] sm:$0xff]  ;;  %v10035_v63 = vcombine.high %v8567_v11, %v9419_v38 }
 0x124   : > { %v9995_v12 = vpack.c.bf16 %v1323_v8, %v1319_v10  ;;  %v11910_v10 = vand.u32 15, %v11909_v29  ;;  %v8566_v29 = vld [vmem:[%s9029_s13 + $0xa8] sm:$0xff]  ;;  %v11922_v50 = vunpack.c.h.bf16 %v9993_v59 }
 0x125   : > { %v1332_v61 = vrot.slane %v11908_v41, 1  ;;  %11917 = vst [vmem:[#allocation105_spill] sm:$0xff] %v10035_v63 }
 0x126   : > { %11905 = vst [vmem:[#allocation102_spill] sm:$0xff] %v9995_v12  ;;  %vm10014_vm11 = vcmp.ne.s32.totalorder %v11910_v10, 0  ;;  %v11913_v12 = vunpack.c.l.bf16 %v9377_v17  ;;  %v10027_v10 = vcombine.low %v8565_v53, %v8566_v29  ;;  %v11918_v17 = vmov 0 }
 0x127   : > { %v1333_v44 = vsel %vm11502_vm4, %v1328_v39, %v1332_v61  ;;  %vm10041_vm0 = vmpackc.low %vm11498_vm2, %vm10014_vm11  ;;  %v11921_v53 = vunpack.c.h.bf16 %v9990_v51  ;;  %v1001_v22 = vrot.slane %v11922_v50, 7  ;;  %v10051_v39 = vld [vmem:[%s9029_s13 + $0xe0] sm:$0xff]  ;;  %6698 = vmatmul.mubr.msk.bf16.gmra.mrb[44].mxu1 %vm9982_vm14, %v9515_v57  ;;  %v11928_v50 = vunpack.c.h.bf16 %v9419_v38 }
 0x128   : > { %v1326_v41 = vrot.slane %v11913_v12, 1  ;;  %11914 = vst [vmem:[#allocation19_spill] sm:$0xff] %v10027_v10  ;;  %v10029_v16 = vpack.c.bf16 %v1333_v44, %v1329_v7  ;;  %v11919_v17 = vsel %vm10041_vm0, 4294967295, %v11918_v17  ;;  %6702 = vmatprep.mubr.msk.bf16.mxu1 %vm10041_vm0, %v9517_v47  ;;  %vm11932_vm2 = vcmask 1040384   ;;  %vm11935_vm14 = vmmov %vm11934_vm3 }
 0x129   : > { %11920 = vst [vmem:[#allocation106_spill] sm:$0xff] %v11919_v17  ;;  %v997_v7 = vrot.slane %v11921_v53, 7  ;;  %4068 = vmatmul.mubr.bf16.gmra.mrb[44].mxu0 %v10027_v10  ;;  %v8568_v53 = vld [vmem:[%s9029_s13 + $0xb8] sm:$0xff]  ;;  %v8569_v10 = vld [vmem:[%s9029_s13 + $0xc0] sm:$0xff]  ;;  %v10136_v29 = vadd.s32 200, %v8969_v2 }
 0x12a   : > { %11915 = vst [vmem:[#allocation104_spill] sm:$0xff] %v10029_v16  ;;  %v1327_v40 = vsel %vm11502_vm4, %v1322_v56, %v1326_v41  ;;  %v1331_v12 = vsel %vm11502_vm4, %v1326_v41, %v1330_v23  ;;  %v11924_v56 = vld [vmem:[#allocation20_spill] sm:$0xff]  ;;  %4077 = vmatprep.mubr.bf16.mxu0 %v10035_v63  ;;  %v10081_v57 = vcombine.low %v8567_v11, %v8568_v53  ;;  %vm11933_vm4 = vmmov %vm11932_vm2  ;;  %v11940_v41 = vunpack.c.l.bf16 %v9455_v32 }
 0x12b   : > { %v10053_v44 = vpack.c.bf16 %v1331_v12, %v1327_v40  ;;  %v11925_v8 = vand.u32 15, %v11924_v56  ;;  %v10072_v40 = vadd.s32 184, %v8969_v2  ;;  %v1336_v12 = vrot.slane %v11928_v50, 1  ;;  %v8570_v11 = vld [vmem:[%s9029_s13 + $0xc8] sm:$0xff] }
 0x12c   : > { %v11929_v56 = vunpack.c.h.bf16 %v9455_v32  ;;  %11931 = vst [vmem:[#allocation108_spill] sm:$0xff] %v10081_v57  ;;  %v998_v47 = vsel %vm11932_vm2, %v9500_v43, %v997_v7  ;;  %v1002_v5 = vsel %vm11933_vm4, %v997_v7, %v1001_v22  ;;  %v10095_v53 = vcombine.high %v8569_v10, %v8570_v11  ;;  %vm11943_vm2 = vmmov %vm11934_vm3 }
 0x12d   : > { %11923 = vst [vmem:[#allocation107_spill] sm:$0xff] %v10053_v44  ;;  %vm10061_vm11 = vcmp.ne.s32.totalorder %v11925_v8, 0  ;;  %v1337_v16 = vsel %vm11934_vm3, %v1332_v61, %v1336_v12  ;;  %v11938_v43 = vunpack.c.l.bf16 %v9990_v51  ;;  %v10103_v44 = vrot.slane %v11940_v41, 1 }
 0x12e   : > { %v10078_v8 = vrot.slane %v11929_v56, 1  ;;  %v11936_v56 = vunpack.c.l.bf16 %v9419_v38  ;;  %11937 = vst [vmem:[#allocation109_spill] sm:$0xff] %v10095_v53  ;;  %v10105_v61 = vpack.c.bf16 %v1002_v5, %v998_v47  ;;  %vm11944_vm3 = vmmov 1  }
 0x12f   : > { %v995_v46 = vrot.slane %v11938_v43, 7  ;;  %vm10113_vm4 = vmpackc.low %vm11944_vm3, %vm10061_vm11  ;;  %6706 = vmatmul.mubr.msk.bf16.gmra.mrb[48].mxu1 %vm10041_vm0, %v9548_v19  ;;  %vm11951_vm11 = vcmask 1040384   ;;  %v12058_v19 = vmov 0 }
 0x130   : > { %11930 = vst [vmem:[#allocation20_spill] sm:$0xff] %v10078_v8  ;;  %v1341_v50 = vsel %vm11935_vm14, %v1336_v12, %v10078_v8  ;;  %v1334_v63 = vrot.slane %v11936_v56, 1  ;;  %11941 = vst [vmem:[#allocation111_spill] sm:$0xff] %v10105_v61  ;;  %v11942_v12 = vunpack.c.l.bf16 %v9993_v59  ;;  %v11945_v56 = vmov 0  ;;  %6710 = vmatprep.mubr.msk.bf16.mxu1 %vm10113_vm4, %v10105_v61  ;;  %v11998_v61 = vld [vmem:[#allocation42_spill] sm:$0xff] }
 0x131   : > { %v10099_v7 = vpack.c.bf16 %v1341_v50, %v1337_v16  ;;  %v11946_v56 = vsel %vm10113_vm4, 4294967295, %v11945_v56  ;;  %v11948_v16 = vunpack.c.h.bf16 %v10051_v39  ;;  %vm11949_vm14 = vmmov %vm11943_vm2  ;;  %4078 = vmatmul.mubr.bf16.gmra.mrb[48].mxu0 %v10081_v57 }
 0x132   : > { %v999_v8 = vrot.slane %v11942_v12, 7  ;;  %v1335_v38 = vsel %vm11943_vm2, %v1330_v23, %v1334_v63  ;;  %11947 = vst [vmem:[#allocation112_spill] sm:$0xff] %v11946_v56  ;;  %v1339_v32 = vsel %vm11949_vm14, %v1334_v63, %v10103_v44  ;;  %4087 = vmatprep.mubr.bf16.mxu0 %v10095_v53  ;;  %v996_v23 = vsel %vm11951_vm11, %v9523_v20, %v995_v46  ;;  %vm11952_vm2 = vmmov %vm11951_vm11  ;;  %v11991_v56 = vld [vmem:[#allocation38_spill] sm:$0xff] }
 0x133   : > { %11939 = vst [vmem:[#allocation110_spill] sm:$0xff] %v10099_v7  ;;  %v1005_v50 = vrot.slane %v11948_v16, 7  ;;  %v10121_v47 = vpack.c.bf16 %v1339_v32, %v1335_v38  ;;  %v11521_v63 = vunpack.c.l.bf16 %v10051_v39  ;;  %vm11953_vm14 = vmmov %vm11952_vm2  ;;  %v11955_v12 = vand.u32 15, %v9513_v1  ;;  %v8337_v38 = vld [vmem:[#allocation3 + $0x514] ss:$8 sps:$4 sm:$0xff]  }
 0x134   : > { %v1000_v5 = vsel %vm11952_vm2, %v995_v46, %v999_v8  ;;  %vm11954_vm0 = vmmov %vm11952_vm2  ;;  %v10146_v20 = vcombine.low %v8569_v10, %v8570_v11  ;;  %v10152_v32 = vcombine.high %v9990_v51, %v9993_v59  ;;  %v10173_v11 = vadd.s32 216, %v8969_v2 }
 0x135   : > { %11950 = vst [vmem:[#allocation113_spill] sm:$0xff] %v10121_v47  ;;  %v1006_v41 = vsel %vm11953_vm14, %v1001_v22, %v1005_v50  ;;  %v1010_v43 = vsel %vm11954_vm0, %v1005_v50, %v9627_v14  ;;  %vm8020_vm5 = vcmp.ne.s32.totalorder %v11955_v12, 0  ;;  %v10144_v16 = vpack.c.bf16 %v1000_v5, %v996_v23  ;;  %vm11962_vm11 = vmmov %vm11952_vm2  ;;  %v8571_v12 = vld [vmem:[%s9029_s13 + $0xe8] sm:$0xff] }
 0x136   : > { %v10148_v46 = vpack.c.bf16 %v1010_v43, %v1006_v41  ;;  %11958 = vst [vmem:[#allocation116_spill] sm:$0xff] %v10152_v32  ;;  %v1003_v22 = vrot.slane %v11521_v63, 7  ;;  %vm10157_vm0 = vmpackc.low %vm11944_vm3, %vm8020_vm5  ;;  %v11959_v14 = vmov 0  ;;  %v11964_v50 = vand.u32 15, %v9615_v42  ;;  %v8310_v63 = vld [vmem:[#allocation3 + $0x614] ss:$8 sps:$4 sm:$0xff]  }
 0x137   : > { %11956 = vst [vmem:[#allocation114_spill] sm:$0xff] %v10144_v16  ;;  %v11960_v14 = vsel %vm10157_vm0, 4294967295, %v11959_v14  ;;  %6714 = vmatmul.mubr.msk.bf16.gmra.mrb[52].mxu1 %vm10113_vm4, %v10144_v16  ;;  %vm11963_vm5 = vmmov %vm11952_vm2  ;;  %v10182_v41 = vcombine.low %v9990_v51, %v9993_v59  ;;  %v10202_v42 = vadd.s32 232, %v8969_v2  ;;  %v8329_v23 = vld [vmem:[#allocation3 + $0x500] ss:$8 sps:$4 sm:$0xff]  }
 0x138   : > { %11957 = vst [vmem:[#allocation115_spill] sm:$0xff] %v10148_v46  ;;  %11961 = vst [vmem:[#allocation117_spill] sm:$0xff] %v11960_v14  ;;  %6718 = vmatprep.mubr.msk.bf16.mxu1 %vm10157_vm0, %v10148_v46  ;;  %v1004_v1 = vsel %vm11962_vm11, %v999_v8, %v1003_v22  ;;  %v1008_v10 = vsel %vm11963_vm5, %v1003_v22, %v9641_v55  ;;  %vm8021_vm2 = vcmp.ne.s32.totalorder %v11964_v50, 0  ;;  %v11968_v55 = vmov 0  ;;  %v11983_v14 = vld [vmem:[#allocation83_spill] sm:$0xff] }
 0x139   : > { %4088 = vmatmul.mubr.bf16.gmra.mrb[52].mxu0 %v10146_v20  ;;  %v10178_v5 = vpack.c.bf16 %v1008_v10, %v1004_v1  ;;  %11966 = vst [vmem:[#allocation119_spill] sm:$0xff] %v10182_v41  ;;  %v10186_v8 = vcombine.high %v10051_v39, %v9561_v25  ;;  %vm10189_vm14 = vmpackc.low %vm11944_vm3, %vm8021_vm2  ;;  %v10207_v22 = vcombine.low %v10051_v39, %v8571_v12  ;;  %v11971_v1 = vand.u32 15, %v9633_v45  ;;  %v11972_v10 = vld [vmem:[#allocation28_spill] sm:$0xff]  ;;  %v11976_v45 = vld [vmem:[#allocation30_spill] sm:$0xff] }
 0x13a   : > { %4097 = vmatprep.mubr.bf16.mxu0 %v10152_v32  ;;  %v11969_v55 = vsel %vm10189_vm14, 4294967295, %v11968_v55  ;;  %v11973_v50 = vmov 0   ;;  %v8305_v12 = vld [vmem:[#allocation3 + $0x600] ss:$8 sps:$4 sm:$0xff]   ;;  %v11988_v46 = vmov 0 }
 0x13b   : > { %11965 = vst [vmem:[#allocation118_spill] sm:$0xff] %v10178_v5  ;;  %11967 = vst [vmem:[#allocation120_spill] sm:$0xff] %v10186_v8  ;;  %vm8022_vm11 = vcmp.ne.s32.totalorder %v11971_v1, 15  ;;  %v8308_v1 = vld [vmem:[#allocation3 + $0x610] ss:$8 sps:$4 sm:$0xff]  }
 0x13c   : > { %11970 = vst [vmem:[#allocation121_spill] sm:$0xff] %v11969_v55  ;;  %vm10218_vm5 = vmpackc.low %vm8022_vm11, %vm11944_vm3  ;;  %v11978_v55 = vand.u32 15, %v9697_v0  ;;  %v8346_v0 = vld [vmem:[#allocation3 + $0x534] ss:$8 sps:$4 sm:$0xff]   ;;  %v8349_v16 = vld [vmem:[#allocation3 + $0x544] ss:$8 sps:$4 sm:$0xff]  }
 0x13d   : > { %v8433_v43 = vld [vmem:[#allocation3 + $0x10] ss:$8 sps:$4 sm:$0xff]  }
 0x13e   : > { %vm8023_vm2 = vcmp.ne.s32.totalorder %v11978_v55, 15  ;;  %v8314_v55 = vld [vmem:[#allocation3 + $0x630] ss:$8 sps:$4 sm:$0xff]  }
 0x13f   : > { %6722 = vmatmul.mubr.msk.bf16.gmra.mrb[56].mxu1 %vm10157_vm0, %v10178_v5  ;;  %vm10231_vm11 = vmpackc.low %vm8023_vm2, %vm11944_vm3  ;;  %v8338_v5 = vld [vmem:[#allocation3 + $0x520] ss:$8 sps:$4 sm:$0xff]  }
 0x140   : > { %6726 = vmatprep.mubr.msk.bf16.mxu1 %vm10189_vm14, %v9663_v9  ;;  %v8335_v9 = vld [vmem:[#allocation3 + $0x510] ss:$8 sps:$4 sm:$0xff]  }
 0x141   : > { %4098 = vmatmul.mubr.bf16.gmra.mrb[56].mxu0 %v10182_v41 }
 0x142   : > { %4107 = vmatprep.mubr.bf16.mxu0 %v10186_v8 }
 0x147   : > { %6730 = vmatmul.mubr.msk.bf16.gmra.mrb[60].mxu1 %vm10189_vm14, %v9669_v33  ;;  %v11977_v33 = vld [vmem:[#allocation31_spill] sm:$0xff] }
 0x148   : > { %2898 = vmatprep.mubr.bf16.mxu1 %v11972_v10  ;;  %v8313_v10 = vld [vmem:[#allocation3 + $0x624] ss:$8 sps:$4 sm:$0xff]  }
 0x149   : > { %4108 = vmatmul.mubr.bf16.gmra.mrb[60].mxu0 %v10207_v22 }
 0x14a   : > { %4150 = vmatprep.mubr.bf16.mxu0 %v11973_v50 }
 0x14f   : > { %2899 = vmatmul.mubr.bf16.vlgmr.msra.gmra.mrb[0].mxu1 %v11976_v45  ;;  %v11979_v45 = vmov 0 }
 0x150   : > { %2908 = vmatprep.mubr.bf16.mxu1 %v11977_v33  ;;  %3060 = vmatpush1.bf16.msra.mxu1 %v8329_v23  ;;  %v11980_v45 = vsel %vm10231_vm11, 4294967295, %v11979_v45  ;;  %v8340_v33 = vld [vmem:[#allocation3 + $0x524] ss:$8 sps:$4 sm:$0xff]   ;;  %v11985_v23 = vld [vmem:[#allocation86_spill] sm:$0xff] }
 0x151   : > { %4151 = vmatmul.mubr.bf16.vlgmr.msra.gmra.mrb[0].mxu0 %v11973_v50  ;;  %3061 = vmatprep.subr.bf16.mxu1 %v8337_v38  ;;  %11981 = vst [vmem:[#allocation28_spill] sm:$0xff] %v11980_v45  ;;  %v8316_v50 = vld [vmem:[#allocation3 + $0x634] ss:$8 sps:$4 sm:$0xff]   ;;  %v11984_v38 = vld [vmem:[#allocation37_spill] sm:$0xff] }
 0x152   : > { %4985 = vmatpush1.bf16.msra.mxu0 %v8305_v12  ;;  %6982 = vmatprep.mubr.msk.bf16.mxu0 %vm10218_vm5, %v9675_v26  ;;  %v8311_v12 = vld [vmem:[#allocation3 + $0x620] ss:$8 sps:$4 sm:$0xff]   ;;  %v8447_v45 = vld [vmem:[#allocation3 + $0x44] ss:$8 sps:$4 sm:$0xff]  }
 0x153   : > { %4986 = vmatprep.subr.bf16.mxu0 %v8310_v63  ;;  %v11982_v63 = vld [vmem:[#allocation32_spill] sm:$0xff] }
 0x154   : > { %3062 = vmatpush1.bf16.msra.mxu1 %v8335_v9  ;;  %v8319_v9 = vld [vmem:[#allocation3 + $0x644] ss:$8 sps:$4 sm:$0xff]  }
 0x155   : > { %3063 = vmatprep.subr.bf16.mxu1 %v8340_v33  ;;  %v8347_v33 = vld [vmem:[#allocation3 + $0x540] ss:$8 sps:$4 sm:$0xff]  }
 0x156   : > { %4987 = vmatpush1.bf16.msra.mxu0 %v8308_v1  ;;  %v11986_v1 = vld [vmem:[#allocation84_spill] sm:$0xff] }
 0x157   : > { %4988 = vmatprep.subr.bf16.mxu0 %v8313_v10  ;;  %2909 = vmatmul.mubr.bf16.gmra.mrb[4].mxu1 %v11982_v63  ;;  %v11987_v10 = vand.u32 15, %v11986_v1  ;;  %v8344_v63 = vld [vmem:[#allocation3 + $0x530] ss:$8 sps:$4 sm:$0xff]   ;;  %v11992_v1 = vld [vmem:[#allocation87_spill] sm:$0xff] }
 0x158   : > { %2918 = vmatprep.mubr.bf16.mxu1 %v11984_v38  ;;  %3064 = vmatpush1.bf16.msra.mxu1 %v8338_v5  ;;  %v8317_v38 = vld [vmem:[#allocation3 + $0x640] ss:$8 sps:$4 sm:$0xff]   ;;  %v8355_v5 = vld [vmem:[#allocation3 + $0x554] ss:$8 sps:$4 sm:$0xff]  }
 0x159   : > { %6986 = vmatmul.mubr.msk.bf16.gmra.mrb[4].mxu0 %vm10218_vm5, %v11983_v14  ;;  %vm8024_vm2 = vcmp.ne.s32.totalorder %v11987_v10, 15  ;;  %3065 = vmatprep.subr.bf16.mxu1 %v8346_v0  ;;  %v8320_v0 = vld [vmem:[#allocation3 + $0x650] ss:$8 sps:$4 sm:$0xff]  }
 0x15a   : > { %6990 = vmatprep.mubr.msk.bf16.mxu0 %vm10231_vm11, %v11985_v23  ;;  %4989 = vmatpush1.bf16.msra.mxu0 %v8311_v12  ;;  %vm10246_vm14 = vmpackc.low %vm8024_vm2, %vm11944_vm3  ;;  %v8322_v12 = vld [vmem:[#allocation3 + $0x654] ss:$8 sps:$4 sm:$0xff]   ;;  %v8353_v10 = vld [vmem:[#allocation3 + $0x550] ss:$8 sps:$4 sm:$0xff]  }
 0x15b   : > { %4990 = vmatprep.subr.bf16.mxu0 %v8316_v50  ;;  %v11989_v46 = vsel %vm10246_vm14, 4294967295, %v11988_v46  ;;  %v11993_v50 = vld [vmem:[#allocation41_spill] sm:$0xff] }
 0x15c   : > { %11990 = vst [vmem:[#allocation30_spill] sm:$0xff] %v11989_v46  ;;  %3066 = vmatpush1.bf16.msra.mxu1 %v8344_v63  ;;  %v8325_v63 = vld [vmem:[#allocation3 + $0x664] ss:$8 sps:$4 sm:$0xff]   ;;  %v8454_v46 = vld [vmem:[#allocation3 + $0x60] ss:$8 sps:$4 sm:$0xff]  }
 0x15d   : > { %3067 = vmatprep.subr.bf16.mxu1 %v8349_v16  ;;  %v8356_v16 = vld [vmem:[#allocation3 + $0x560] ss:$8 sps:$4 sm:$0xff]  }
 0x15e   : > { %4991 = vmatpush1.bf16.msra.mxu0 %v8314_v55  ;;  %v11994_v55 = vand.u32 15, %v9760_v4  ;;  %v8364_v4 = vld [vmem:[#allocation3 + $0x574] ss:$8 sps:$4 sm:$0xff]  }
 0x15f   : > { %4992 = vmatprep.subr.bf16.mxu0 %v8319_v9  ;;  %2919 = vmatmul.mubr.bf16.gmra.mrb[8].mxu1 %v11991_v56  ;;  %v11995_v9 = vmov 0  ;;  %v8358_v56 = vld [vmem:[#allocation3 + $0x564] ss:$8 sps:$4 sm:$0xff]  }
 0x160   : > { %2928 = vmatprep.mubr.bf16.mxu1 %v11993_v50  ;;  %vm8025_vm2 = vcmp.ne.s32.totalorder %v11994_v55, 15  ;;  %3068 = vmatpush1.bf16.msra.mxu1 %v8347_v33  ;;  %v8323_v50 = vld [vmem:[#allocation3 + $0x660] ss:$8 sps:$4 sm:$0xff]   ;;  %v8326_v33 = vld [vmem:[#allocation3 + $0x670] ss:$8 sps:$4 sm:$0xff]  }
 0x161   : > { %6994 = vmatmul.mubr.msk.bf16.gmra.mrb[8].mxu0 %vm10231_vm11, %v11992_v1  ;;  %3069 = vmatprep.subr.bf16.mxu1 %v8355_v5  ;;  %vm10261_vm0 = vmpackc.low %vm8025_vm2, %vm11944_vm3  ;;  %v12000_v5 = vand.u32 15, %v9796_v6  ;;  %v8362_v55 = vld [vmem:[#allocation3 + $0x570] ss:$8 sps:$4 sm:$0xff]   ;;  %v8373_v6 = vld [vmem:[#allocation3 + $0x594] ss:$8 sps:$4 sm:$0xff]  }
 0x162   : > { %6998 = vmatprep.mubr.msk.bf16.mxu0 %vm10246_vm14, %v9771_v48  ;;  %4993 = vmatpush1.bf16.msra.mxu0 %v8317_v38  ;;  %v11996_v9 = vsel %vm10261_vm0, 4294967295, %v11995_v9  ;;  %v8328_v38 = vld [vmem:[#allocation3 + $0x674] ss:$8 sps:$4 sm:$0xff]  }
 0x163   : > { %4994 = vmatprep.subr.bf16.mxu0 %v8322_v12  ;;  %11997 = vst [vmem:[#allocation83_spill] sm:$0xff] %v11996_v9  ;;  %v11999_v12 = vld [vmem:[#allocation67_spill] sm:$0xff]  ;;  %vm8026_vm2 = vcmp.ne.s32.totalorder %v12000_v5, 15  ;;  %v8371_v5 = vld [vmem:[#allocation3 + $0x590] ss:$8 sps:$4 sm:$0xff]  }
 0x164   : > { %3070 = vmatpush1.bf16.msra.mxu1 %v8353_v10  ;;  %vm10276_vm4 = vmpackc.low %vm8026_vm2, %vm11944_vm3  ;;  %v8332_v10 = vld [vmem:[#allocation3 + $0x680] ss:$8 sps:$4 sm:$0xff]  }
 0x165   : > { %3071 = vmatprep.subr.bf16.mxu1 %v8358_v56  ;;  %v8365_v56 = vld [vmem:[#allocation3 + $0x580] ss:$8 sps:$4 sm:$0xff]  }
 0x166   : > { %4995 = vmatpush1.bf16.msra.mxu0 %v8320_v0  ;;  %v8334_v0 = vld [vmem:[#allocation3 + $0x684] ss:$8 sps:$4 sm:$0xff]   ;;  %v8463_v9 = vld [vmem:[#allocation3 + $0x80] ss:$8 sps:$4 sm:$0xff]  }
 0x167   : > { %4996 = vmatprep.subr.bf16.mxu0 %v8325_v63  ;;  %2929 = vmatmul.mubr.bf16.gmra.mrb[12].mxu1 %v11998_v61  ;;  %v12001_v63 = vmov 0  ;;  %v12004_v61 = vld [vmem:[#allocation72_spill] sm:$0xff] }
 0x168   : > { %2938 = vmatprep.mubr.bf16.mxu1 %v11999_v12  ;;  %3072 = vmatpush1.bf16.msra.mxu1 %v8356_v16  ;;  %v12002_v63 = vsel %vm10276_vm4, 4294967295, %v12001_v63  ;;  %v8367_v12 = vld [vmem:[#allocation3 + $0x584] ss:$8 sps:$4 sm:$0xff]   ;;  %v8341_v16 = vld [vmem:[#allocation3 + $0x690] ss:$8 sps:$4 sm:$0xff]  }
 0x169   : > { %7002 = vmatmul.mubr.msk.bf16.gmra.mrb[12].mxu0 %vm10246_vm14, %v9776_v3  ;;  %3073 = vmatprep.subr.bf16.mxu1 %v8364_v4  ;;  %12003 = vst [vmem:[#allocation84_spill] sm:$0xff] %v12002_v63  ;;  %v12006_v4 = vand.u32 15, %v9812_v58  ;;  %v8382_v58 = vld [vmem:[#allocation3 + $0x5b4] ss:$8 sps:$4 sm:$0xff]  }
 0x16a   : > { %7006 = vmatprep.mubr.msk.bf16.mxu0 %vm10261_vm0, %v9786_v24  ;;  %4997 = vmatpush1.bf16.msra.mxu0 %v8323_v50  ;;  %v8343_v50 = vld [vmem:[#allocation3 + $0x694] ss:$8 sps:$4 sm:$0xff]  }
 0x16b   : > { %4998 = vmatprep.subr.bf16.mxu0 %v8328_v38  ;;  %v12005_v38 = vld [vmem:[#allocation75_spill] sm:$0xff]  ;;  %vm8027_vm2 = vcmp.ne.s32.totalorder %v12006_v4, 15  ;;  %v8380_v4 = vld [vmem:[#allocation3 + $0x5b0] ss:$8 sps:$4 sm:$0xff]  }
 0x16c   : > { %3074 = vmatpush1.bf16.msra.mxu1 %v8362_v55  ;;  %vm10291_vm15 = vmpackc.low %vm8027_vm2, %vm11944_vm3  ;;  %v8350_v55 = vld [vmem:[#allocation3 + $0x6a0] ss:$8 sps:$4 sm:$0xff]  }
 0x16d   : > { %3075 = vmatprep.subr.bf16.mxu1 %v8367_v12  ;;  %v8374_v12 = vld [vmem:[#allocation3 + $0x5a0] ss:$8 sps:$4 sm:$0xff]  }
 0x16e   : > { %4999 = vmatpush1.bf16.msra.mxu0 %v8326_v33  ;;  %v8352_v33 = vld [vmem:[#allocation3 + $0x6a4] ss:$8 sps:$4 sm:$0xff]  }
 0x16f   : > { %5000 = vmatprep.subr.bf16.mxu0 %v8334_v0  ;;  %2939 = vmatmul.mubr.bf16.gmra.mrb[16].mxu1 %v12004_v61  ;;  %v12007_v0 = vmov 0  ;;  %v12010_v61 = vld [vmem:[#allocation76_spill] sm:$0xff] }
 0x170   : > { %2948 = vmatprep.mubr.bf16.mxu1 %v12005_v38  ;;  %3076 = vmatpush1.bf16.msra.mxu1 %v8365_v56  ;;  %v12008_v0 = vsel %vm10291_vm15, 4294967295, %v12007_v0  ;;  %v8376_v38 = vld [vmem:[#allocation3 + $0x5a4] ss:$8 sps:$4 sm:$0xff]   ;;  %v8359_v56 = vld [vmem:[#allocation3 + $0x6b0] ss:$8 sps:$4 sm:$0xff]  }
 0x171   : > { %7010 = vmatmul.mubr.msk.bf16.gmra.mrb[16].mxu0 %vm10261_vm0, %v9814_v49  ;;  %3077 = vmatprep.subr.bf16.mxu1 %v8373_v6  ;;  %12009 = vst [vmem:[#allocation122_spill] sm:$0xff] %v12008_v0  ;;  %v12012_v6 = vand.u32 15, %v9857_v36  ;;  %v8391_v36 = vld [vmem:[#allocation3 + $0x5d4] ss:$8 sps:$4 sm:$0xff]  }
 0x172   : > { %7014 = vmatprep.mubr.msk.bf16.mxu0 %vm10276_vm4, %v9825_v18  ;;  %5001 = vmatpush1.bf16.msra.mxu0 %v8332_v10  ;;  %v8361_v10 = vld [vmem:[#allocation3 + $0x6b4] ss:$8 sps:$4 sm:$0xff]  }
 0x173   : > { %5002 = vmatprep.subr.bf16.mxu0 %v8343_v50  ;;  %v12011_v50 = vld [vmem:[#allocation82_spill] sm:$0xff]  ;;  %vm8028_vm2 = vcmp.ne.s32.totalorder %v12012_v6, 15 }
 0x174   : > { %3078 = vmatpush1.bf16.msra.mxu1 %v8371_v5  ;;  %vm10306_vm9 = vmpackc.low %vm8028_vm2, %vm11944_vm3  ;;  %v8368_v5 = vld [vmem:[#allocation3 + $0x6c0] ss:$8 sps:$4 sm:$0xff]   ;;  %v8389_v6 = vld [vmem:[#allocation3 + $0x5d0] ss:$8 sps:$4 sm:$0xff]  }
 0x175   : > { %3079 = vmatprep.subr.bf16.mxu1 %v8376_v38  ;;  %v8383_v38 = vld [vmem:[#allocation3 + $0x5c0] ss:$8 sps:$4 sm:$0xff]  }
 0x176   : > { %5003 = vmatpush1.bf16.msra.mxu0 %v8341_v16  ;;  %v8370_v16 = vld [vmem:[#allocation3 + $0x6c4] ss:$8 sps:$4 sm:$0xff]  }
 0x177   : > { %5004 = vmatprep.subr.bf16.mxu0 %v8352_v33  ;;  %2949 = vmatmul.mubr.bf16.gmra.mrb[20].mxu1 %v12010_v61  ;;  %v12013_v33 = vmov 0  ;;  %v12057_v61 = vunpack.c.l.bf16 %v9990_v51 }
 0x178   : > { %2958 = vmatprep.mubr.bf16.mxu1 %v12011_v50  ;;  %3080 = vmatpush1.bf16.msra.mxu1 %v8374_v12  ;;  %v12014_v33 = vsel %vm10306_vm9, 4294967295, %v12013_v33  ;;  %v8385_v50 = vld [vmem:[#allocation3 + $0x5c4] ss:$8 sps:$4 sm:$0xff]   ;;  %v8377_v12 = vld [vmem:[#allocation3 + $0x6d0] ss:$8 sps:$4 sm:$0xff]  }
 0x179   : > { %7018 = vmatmul.mubr.msk.bf16.gmra.mrb[20].mxu0 %vm10276_vm4, %v9834_v37  ;;  %3081 = vmatprep.subr.bf16.mxu1 %v8382_v58  ;;  %12015 = vst [vmem:[#allocation123_spill] sm:$0xff] %v12014_v33  ;;  %v12017_v58 = vand.u32 15, %v9893_v52  ;;  %v8402_v52 = vld [vmem:[#allocation3 + $0x5f4] ss:$8 sps:$4 sm:$0xff]  }
 0x17a   : > { %7022 = vmatprep.mubr.msk.bf16.mxu0 %vm10291_vm15, %v9871_v60  ;;  %5005 = vmatpush1.bf16.msra.mxu0 %v8350_v55  ;;  %v8379_v55 = vld [vmem:[#allocation3 + $0x6d4] ss:$8 sps:$4 sm:$0xff]  }
 0x17b   : > { %5006 = vmatprep.subr.bf16.mxu0 %v8361_v10  ;;  %v12016_v10 = vld [vmem:[#allocation24_spill] sm:$0xff]  ;;  %vm8029_vm2 = vcmp.ne.s32.totalorder %v12017_v58, 15 }
 0x17c   : > { %3082 = vmatpush1.bf16.msra.mxu1 %v8380_v4  ;;  %vm10321_vm7 = vmpackc.low %vm8029_vm2, %vm11944_vm3  ;;  %v8386_v4 = vld [vmem:[#allocation3 + $0x6e0] ss:$8 sps:$4 sm:$0xff]   ;;  %v8405_v58 = vld [vmem:[#allocation3 + $0x704] ss:$8 sps:$4 sm:$0xff]  }
 0x17d   : > { %3083 = vmatprep.subr.bf16.mxu1 %v8385_v50  ;;  %v8399_v50 = vld [vmem:[#allocation3 + $0x6f4] ss:$8 sps:$4 sm:$0xff]  }
 0x17e   : > { %5007 = vmatpush1.bf16.msra.mxu0 %v8359_v56  ;;  %v8388_v56 = vld [vmem:[#allocation3 + $0x6e4] ss:$8 sps:$4 sm:$0xff]  }
 0x17f   : > { %5008 = vmatprep.subr.bf16.mxu0 %v8370_v16  ;;  %2959 = vmatmul.mubr.bf16.gmra.mrb[24].mxu1 %v9731_v13  ;;  %v12018_v16 = vmov 0  ;;  %v12020_v13 = vld [vmem:[#allocation89_spill] sm:$0xff] }
 0x180   : > { %2968 = vmatprep.mubr.bf16.mxu1 %v12016_v10  ;;  %3084 = vmatpush1.bf16.msra.mxu1 %v8383_v38  ;;  %v12019_v16 = vsel %vm10321_vm7, 4294967295, %v12018_v16  ;;  %v8396_v10 = vld [vmem:[#allocation3 + $0x5e4] ss:$8 sps:$4 sm:$0xff]   ;;  %v8397_v38 = vld [vmem:[#allocation3 + $0x6f0] ss:$8 sps:$4 sm:$0xff]  }
 0x181   : > { %7026 = vmatmul.mubr.msk.bf16.gmra.mrb[24].mxu0 %vm10291_vm15, %v9880_v21  ;;  %3085 = vmatprep.subr.bf16.mxu1 %v8391_v36  ;;  %v12022_v36 = vand.u32 15, %v9908_v30  ;;  %v12026_v30 = vand.u32 15, %v9955_v27 }
 0x182   : > { %7030 = vmatprep.mubr.msk.bf16.mxu0 %vm10306_vm9, %v9890_v35  ;;  %5009 = vmatpush1.bf16.msra.mxu0 %v8368_v5  ;;  %v8394_v5 = vld [vmem:[#allocation3 + $0x5e0] ss:$8 sps:$4 sm:$0xff]  }
 0x183   : > { %5010 = vmatprep.subr.bf16.mxu0 %v8379_v55  ;;  %v12021_v55 = vld [vmem:[#allocation45_spill] sm:$0xff]  ;;  %vm8030_vm2 = vcmp.ne.s32.totalorder %v12022_v36, 15  ;;  %v12036_v36 = vmov 0 }
 0x184   : > { %3086 = vmatpush1.bf16.msra.mxu1 %v8389_v6  ;;  %v8429_v6 = vld [vmem:[#allocation3 + $0x4] ss:$8 sps:$4 sm:$0xff]  }
 0x185   : > { %3087 = vmatprep.subr.bf16.mxu1 %v8396_v10  ;;  %v12027_v10 = vmov 0 }
 0x186   : > { %5011 = vmatpush1.bf16.msra.mxu0 %v8377_v12  ;;  %v8400_v12 = vld [vmem:[#allocation3 + $0x5f0] ss:$8 sps:$4 sm:$0xff]  }
 0x187   : > { %5012 = vmatprep.subr.bf16.mxu0 %v8388_v56  ;;  %2969 = vmatmul.mubr.bf16.gmra.mrb[28].mxu1 %v12020_v13  ;;  %v12023_v56 = vmov 0 }
 0x188   : > { %2978 = vmatprep.mubr.bf16.mxu1 %v12021_v55  ;;  %3088 = vmatpush1.bf16.msra.mxu1 %v8394_v5  ;;  %v12031_v5 = vld [vmem:[#allocation18_spill] sm:$0xff]  ;;  %v12054_v55 = vand.u32 15, %v10136_v29 }
 0x189   : > { %7034 = vmatmul.mubr.msk.bf16.gmra.mrb[28].mxu0 %vm10306_vm9, %v9902_v54  ;;  %3089 = vmatprep.subr.bf16.mxu1 %v8402_v52  ;;  %vm10336_vm9 = vmpackc.low %vm8030_vm2, %vm11944_vm3  ;;  %vm8031_vm2 = vcmp.ne.s32.totalorder %v12026_v30, 15  ;;  %v12033_v52 = vld [vmem:[#allocation101_spill] sm:$0xff]  ;;  %v12042_v30 = vld [vmem:[#allocation104_spill] sm:$0xff] }
 0x18a   : > { %7038 = vmatprep.mubr.msk.bf16.mxu0 %vm10321_vm7, %v9922_v62  ;;  %5013 = vmatpush1.bf16.msra.mxu0 %v8386_v4  ;;  %v12024_v56 = vsel %vm10336_vm9, 4294967295, %v12023_v56  ;;  %vm10351_vm1 = vmpackc.low %vm8031_vm2, %vm11944_vm3  ;;  %v12030_v4 = vld [vmem:[#allocation53_spill] sm:$0xff]  ;;  %vm8034_vm15 = vcmp.ne.s32.totalorder %v12054_v55, 15 }
 0x18b   : > { %5014 = vmatprep.subr.bf16.mxu0 %v8399_v50  ;;  %12025 = vst [vmem:[#allocation124_spill] sm:$0xff] %v12024_v56  ;;  %v12028_v10 = vsel %vm10351_vm1, 4294967295, %v12027_v10  ;;  %v12032_v50 = vld [vmem:[#allocation99_spill] sm:$0xff] }
 0x18c   : > { %3090 = vmatpush1.bf16.msra.mxu1 %v8400_v12  ;;  %12029 = vst [vmem:[#allocation125_spill] sm:$0xff] %v12028_v10  ;;  %v12039_v12 = vld [vmem:[#allocation19_spill] sm:$0xff] }
 0x18d   : > { %3732 = vmatprep.subr.bf16.mxu1 %v8429_v6  ;;  %v12041_v6 = vld [vmem:[#allocation105_spill] sm:$0xff] }
 0x18e   : > { %5015 = vmatpush1.bf16.msra.mxu0 %v8397_v38  ;;  %v12034_v38 = vld [vmem:[#allocation103_spill] sm:$0xff] }
 0x18f   : > { %5177 = vmatprep.subr.bf16.mxu0 %v8405_v58  ;;  %2979 = vmatmul.mubr.bf16.gmra.mrb[32].mxu1 %v9840_v15  ;;  %v12035_v27 = vand.u32 15, %v12034_v38  ;;  %v12040_v58 = vld [vmem:[#allocation102_spill] sm:$0xff]  ;;  %v12043_v38 = vand.u32 15, %v10072_v40  ;;  %v12051_v40 = vld [vmem:[#allocation20_spill] sm:$0xff] }
 0x190   : > { %2988 = vmatprep.mubr.bf16.mxu1 %v9888_v28  ;;  %v12049_v28 = vunpack.c.h.bf16 %v9990_v51 }
 0x191   : > { %7042 = vmatmul.mubr.msk.bf16.gmra.mrb[32].mxu0 %vm10321_vm7, %v9925_v34  ;;  %vm8032_vm7 = vcmp.ne.s32.totalorder %v12035_v27, 15  ;;  %v12044_v27 = vmov 0 }
 0x192   : > { %7046 = vmatprep.mubr.msk.bf16.mxu0 %vm10336_vm9, %v9950_v31  ;;  %vm10366_vm2 = vmpackc.low %vm8032_vm7, %vm11944_vm3  ;;  %v1348_v15 = vrot.slane %v12049_v28, 1 }
 0x193   : > { %v12037_v36 = vsel %vm10366_vm2, 4294967295, %v12036_v36 }
 0x194   : > { %12038 = vst [vmem:[#allocation103_spill] sm:$0xff] %v12037_v36 }
 0x197   : > { %2989 = vmatmul.mubr.bf16.gmra.mrb[36].mxu1 %v12030_v4 }
 0x198   : > { %2998 = vmatprep.mubr.bf16.mxu1 %v12032_v50  ;;  %v12047_v50 = vld [vmem:[#allocation59_spill] sm:$0xff] }
 0x199   : > { %7050 = vmatmul.mubr.msk.bf16.gmra.mrb[36].mxu0 %vm10336_vm9, %v12031_v5  ;;  %vm8033_vm9 = vcmp.ne.s32.totalorder %v12043_v38, 15 }
 0x19a   : > { %7054 = vmatprep.mubr.msk.bf16.mxu0 %vm10351_vm1, %v12033_v52  ;;  %vm10381_vm7 = vmpackc.low %vm8033_vm9, %vm11944_vm3  ;;  %vm12052_vm9 = vcmask 1046528  }
 0x19b   : > { %v12045_v27 = vsel %vm10381_vm7, 4294967295, %v12044_v27 }
 0x19c   : > { %12046 = vst [vmem:[#allocation126_spill] sm:$0xff] %v12045_v27 }
 0x19f   : > { %2999 = vmatmul.mubr.bf16.gmra.mrb[40].mxu1 %v12039_v12  ;;  %v12048_v12 = vunpack.c.h.bf16 %v12047_v50 }
 0x1a0   : > { %3008 = vmatprep.mubr.bf16.mxu1 %v12041_v6  ;;  %v12050_v6 = vld [vmem:[#allocation107_spill] sm:$0xff] }
 0x1a1   : > { %7058 = vmatmul.mubr.msk.bf16.gmra.mrb[40].mxu0 %vm10351_vm1, %v12040_v58  ;;  %v1344_v4 = vrot.slane %v12048_v12, 1  ;;  %vm12053_vm1 = vmmov %vm12052_vm9 }
 0x1a2   : > { %7062 = vmatprep.mubr.msk.bf16.mxu0 %vm10366_vm2, %v12042_v30  ;;  %vm12065_vm13 = vmmov %vm12053_vm1 }
 0x1a3   : > { %v1345_v38 = vsel %vm12052_vm9, %v12051_v40, %v1344_v4  ;;  %v1349_v12 = vsel %vm12053_vm1, %v1344_v4, %v1348_v15  ;;  %v12061_v40 = vunpack.c.h.bf16 %v9993_v59  ;;  %v12062_v4 = vunpack.c.h.bf16 %v10051_v39  ;;  %vm12064_vm9 = vmmov %vm12053_vm1 }
 0x1a4   : > { %v10402_v28 = vpack.c.bf16 %v1349_v12, %v1345_v38 }
 0x1a5   : > { %v1352_v17 = vrot.slane %v12061_v40, 1  ;;  %v1356_v29 = vrot.slane %v12062_v4, 1  ;;  %v12069_v40 = vunpack.c.l.bf16 %v9993_v59 }
 0x1a6   : > { %12055 = vst [vmem:[#allocation59_spill] sm:$0xff] %v10402_v28 }
 0x1a7   : > { %3009 = vmatmul.mubr.bf16.gmra.mrb[44].mxu1 %v10081_v57  ;;  %v12056_v57 = vunpack.c.l.bf16 %v12047_v50  ;;  %v1357_v55 = vsel %vm12065_vm13, %v1352_v17, %v1356_v29  ;;  %v12066_v50 = vand.u32 15, %v10173_v11  ;;  %v1350_v4 = vrot.slane %v12069_v40, 1  ;;  %v12075_v11 = vld [vmem:[#allocation69_spill] sm:$0xff]  ;;  %vm12077_vm13 = vmmov %vm12064_vm9  ;;  %v8572_v40 = vld [vmem:[%s9029_s13 + $0xf8] sm:$0xff] }
 0x1a8   : > { %3018 = vmatprep.mubr.bf16.mxu1 %v10095_v53  ;;  %v1346_v53 = vrot.slane %v12057_v61, 1  ;;  %v1353_v61 = vsel %vm12064_vm9, %v1348_v15, %v1352_v17  ;;  %v12074_v15 = vunpack.c.h.bf16 %v9561_v25 }
 0x1a9   : > { %7066 = vmatmul.mubr.msk.bf16.gmra.mrb[44].mxu0 %vm10366_vm2, %v12050_v6  ;;  %v1342_v13 = vrot.slane %v12056_v57, 1  ;;  %vm10409_vm2 = vmpackc.low %vm8034_vm15, %vm11944_vm3  ;;  %vm8035_vm4 = vcmp.ne.s32.totalorder %v12066_v50, 15  ;;  %v10434_v12 = vpack.c.bf16 %v1357_v55, %v1353_v61  ;;  %v12081_v55 = vand.u32 15, %v10202_v42 }
 0x1aa   : > { %7070 = vmatprep.mubr.msk.bf16.mxu0 %vm10381_vm7, %v10099_v7  ;;  %v12059_v19 = vsel %vm10409_vm2, 4294967295, %v12058_v19  ;;  %vm12063_vm15 = vmmov %vm12053_vm1  ;;  %v1360_v17 = vrot.slane %v12074_v15, 1  ;;  %v1351_v59 = vsel %vm12077_vm13, %v1346_v53, %v1350_v4  ;;  %v8573_v15 = vld [vmem:[%s9029_s13 + $0xf0] sm:$0xff] }
 0x1ab   : > { %12060 = vst [vmem:[#allocation20_spill] sm:$0xff] %v12059_v19  ;;  %v1343_v57 = vsel %vm12053_vm1, %v10103_v44, %v1342_v13  ;;  %v1347_v51 = vsel %vm12063_vm15, %v1342_v13, %v1346_v53  ;;  %12068 = vst [vmem:[#allocation128_spill] sm:$0xff] %v10434_v12  ;;  %v12071_v13 = vmov 0  ;;  %v12085_v53 = vunpack.c.l.bf16 %v9561_v25  ;;  %v12154_v19 = vld [vmem:[#allocation121_spill] sm:$0xff] }
 0x1ac   : > { %v10432_v38 = vpack.c.bf16 %v1347_v51, %v1343_v57  ;;  %vm10441_vm1 = vmpackc.low %vm8035_vm4, %vm11944_vm3  ;;  %v12076_v57 = vunpack.c.h.bf16 %v12075_v11 }
 0x1ad   : > { %v12072_v13 = vsel %vm10441_vm1, 4294967295, %v12071_v13  ;;  %vm12078_vm4 = vmmov %vm12064_vm9 }
 0x1ae   : > { %12067 = vst [vmem:[#allocation127_spill] sm:$0xff] %v10432_v38  ;;  %12073 = vst [vmem:[#allocation129_spill] sm:$0xff] %v12072_v13  ;;  %v10449_v51 = vrot.slane %v12076_v57, 1  ;;  %v10470_v57 = vcombine.high %v8573_v15, %v8572_v40 }
 0x1af   : > { %3019 = vmatmul.mubr.bf16.gmra.mrb[48].mxu1 %v10146_v20  ;;  %vm12079_vm15 = vmmov %vm12078_vm4 }
 0x1b0   : > { %3028 = vmatprep.mubr.bf16.mxu1 %v10152_v32  ;;  %v12070_v32 = vunpack.c.l.bf16 %v10051_v39  ;;  %vm12080_vm9 = vmmov %vm12078_vm4  ;;  %12083 = vst [vmem:[#allocation130_spill] sm:$0xff] %v10470_v57 }
 0x1b1   : > { %7074 = vmatmul.mubr.msk.bf16.gmra.mrb[48].mxu0 %vm10381_vm7, %v10121_v47  ;;  %v1365_v61 = vsel %vm12080_vm9, %v1360_v17, %v10449_v51  ;;  %vm8036_vm7 = vcmp.ne.s32.totalorder %v12081_v55, 15  ;;  %v8408_v55 = vld [vmem:[#allocation3 + $0x714] ss:$8 sps:$4 sm:$0xff]   ;;  %vm12108_vm9 = vnez %v12008_v0  ;;  %v8481_v0 = vld [vmem:[#allocation3 + $0xc0] ss:$8 sps:$4 sm:$0xff]  }
 0x1b2   : > { %7078 = vmatprep.mubr.msk.bf16.mxu0 %vm10409_vm2, %v10402_v28  ;;  %v1354_v44 = vrot.slane %v12070_v32, 1  ;;  %v1361_v32 = vsel %vm12079_vm15, %v1356_v29, %v1360_v17  ;;  %vm10481_vm13 = vmpackc.low %vm8036_vm7, %vm11944_vm3 }
 0x1b3   : > { %vm12089_vm15 = vmmov %vm12078_vm4 }
 0x1b4   : > { %v1355_v39 = vsel %vm12078_vm4, %v1350_v4, %v1354_v44  ;;  %v12086_v4 = vunpack.c.l.bf16 %v12075_v11  ;;  %v10497_v11 = vadd.s32 248, %v8969_v2  ;;  %v8414_v2 = vld [vmem:[#allocation3 + $0x734] ss:$8 sps:$4 sm:$0xff]  }
 0x1b5   : > { %v10466_v50 = vpack.c.bf16 %v1355_v39, %v1351_v59  ;;  %v10500_v39 = vcombine.low %v8573_v15, %v8572_v40  ;;  %v8427_v40 = vld [vmem:[#allocation3] ss:$8 sps:$4 sm:$0xff]   ;;  %v12093_v15 = vld [vmem:[#allocation29_spill] sm:$0xff] }
 0x1b6   : > { %v10478_v29 = vrot.slane %v12086_v4, 1  ;;  %v12094_v4 = vld [vmem:[#allocation33_spill] sm:$0xff] }
 0x1b7   : > { %3029 = vmatmul.mubr.bf16.gmra.mrb[52].mxu1 %v10182_v41  ;;  %12082 = vst [vmem:[#allocation69_spill] sm:$0xff] %v10466_v50  ;;  %v1358_v41 = vrot.slane %v12085_v53, 1  ;;  %12090 = vst [vmem:[#allocation132_spill] sm:$0xff] %v10500_v39  ;;  %v8435_v53 = vld [vmem:[#allocation3 + $0x14] ss:$8 sps:$4 sm:$0xff]  }
 0x1b8   : > { %3038 = vmatprep.mubr.bf16.mxu1 %v10186_v8  ;;  %v10472_v8 = vpack.c.bf16 %v1365_v61, %v1361_v32  ;;  %v8403_v61 = vld [vmem:[#allocation3 + $0x700] ss:$8 sps:$4 sm:$0xff]   ;;  %v8438_v59 = vld [vmem:[#allocation3 + $0x24] ss:$8 sps:$4 sm:$0xff]  }
 0x1b9   : > { %7082 = vmatmul.mubr.msk.bf16.gmra.mrb[52].mxu0 %vm10409_vm2, %v10432_v38  ;;  %v1359_v25 = vsel %vm12078_vm4, %v1354_v44, %v1358_v41  ;;  %v1363_v42 = vsel %vm12089_vm15, %v1358_v41, %v10478_v29  ;;  %v12091_v41 = vld [vmem:[#allocation27_spill] sm:$0xff]  ;;  %vm12113_vm15 = vnez %v12014_v33  ;;  %v12179_v44 = vld [vmem:[#allocation72_spill] sm:$0xff] }
 0x1ba   : > { %7086 = vmatprep.mubr.msk.bf16.mxu0 %vm10441_vm1, %v10434_v12  ;;  %12084 = vst [vmem:[#allocation131_spill] sm:$0xff] %v10472_v8  ;;  %v10502_v32 = vpack.c.bf16 %v1363_v42, %v1359_v25  ;;  %v8411_v42 = vld [vmem:[#allocation3 + $0x724] ss:$8 sps:$4 sm:$0xff]   ;;  %v8495_v33 = vld [vmem:[#allocation3 + $0x7f4] ss:$8 sps:$4 sm:$0xff]  }
 0x1bb   : > { %v12182_v25 = vld [vmem:[#allocation82_spill] sm:$0xff] }
 0x1bf   : > { %3039 = vmatmul.mubr.bf16.gmra.mrb[56].mxu1 %v10207_v22 }
 0x1c0   : > { %3048 = vmatprep.mubr.bf16.mxu1 %v10470_v57  ;;  %v8445_v57 = vld [vmem:[#allocation3 + $0x40] ss:$8 sps:$4 sm:$0xff]  }
 0x1c1   : > { %7090 = vmatmul.mubr.msk.bf16.gmra.mrb[56].mxu0 %vm10441_vm1, %v10466_v50 }
 0x1c2   : > { %7094 = vmatprep.mubr.msk.bf16.mxu0 %vm10481_vm13, %v10472_v8 }
 0x1c7   : > { %3049 = vmatmul.mubr.bf16.gmra.mrb[60].mxu1 %v10500_v39  ;;  %v8420_v39 = vld [vmem:[#allocation3 + $0x754] ss:$8 sps:$4 sm:$0xff]  }
 0x1c8   : > { %6734 = vmatprep.mubr.msk.bf16.mxu1 %vm10218_vm5, %v9675_v26  ;;  %v8406_v26 = vld [vmem:[#allocation3 + $0x710] ss:$8 sps:$4 sm:$0xff]  }
 0x1c9   : > { %7098 = vmatmul.mubr.msk.bf16.gmra.mrb[60].mxu0 %vm10481_vm13, %v10502_v32 }
 0x1ca   : > { %7102 = vmatprep.mubr.msk.bf16.mxu0 %vm9171_vm6, %v12091_v41 }
 0x1cf   : > { %6738 = vmatmul.mubr.msk.bf16.vlgmr.msra.gmra.mrb[0].mxu1 %vm10218_vm5, %v11983_v14  ;;  %v8409_v14 = vld [vmem:[#allocation3 + $0x720] ss:$8 sps:$4 sm:$0xff]   ;;  %vm12103_vm5 = vnez %v12002_v63 }
 0x1d0   : > { %6742 = vmatprep.mubr.msk.bf16.mxu1 %vm10231_vm11, %v11985_v23  ;;  %3733 = vmatpush1.bf16.msra.mxu1 %v8427_v40  ;;  %v12096_v23 = vld [vmem:[#allocation36_spill] sm:$0xff]  ;;  %v12097_v40 = vld [vmem:[#allocation39_spill] sm:$0xff] }
 0x1d1   : > { %7106 = vmatmul.mubr.msk.bf16.vlgmr.msra.gmra.mrb[0].mxu0 %vm9171_vm6, %v12093_v15  ;;  %3734 = vmatprep.subr.bf16.mxu1 %v8435_v53  ;;  %v8472_v63 = vld [vmem:[#allocation3 + $0xa0] ss:$8 sps:$4 sm:$0xff]  }
 0x1d2   : > { %5178 = vmatpush1.bf16.msra.mxu0 %v8403_v61  ;;  %7110 = vmatprep.mubr.msk.bf16.mxu0 %vm9281_vm8, %v12094_v4  ;;  %v8436_v61 = vld [vmem:[#allocation3 + $0x20] ss:$8 sps:$4 sm:$0xff]  }
 0x1d3   : > { %5179 = vmatprep.subr.bf16.mxu0 %v8408_v55  ;;  %v8444_v55 = vld [vmem:[#allocation3 + $0x34] ss:$8 sps:$4 sm:$0xff]   ;;  %v12184_v53 = vld [vmem:[#allocation24_spill] sm:$0xff] }
 0x1d4   : > { %3735 = vmatpush1.bf16.msra.mxu1 %v8433_v43  ;;  %v8442_v43 = vld [vmem:[#allocation3 + $0x30] ss:$8 sps:$4 sm:$0xff]  }
 0x1d5   : > { %3736 = vmatprep.subr.bf16.mxu1 %v8438_v59  ;;  %v12100_v59 = vld [vmem:[#allocation43_spill] sm:$0xff] }
 0x1d6   : > { %5180 = vmatpush1.bf16.msra.mxu0 %v8406_v26  ;;  %v8412_v26 = vld [vmem:[#allocation3 + $0x730] ss:$8 sps:$4 sm:$0xff]  }
 0x1d7   : > { %5181 = vmatprep.subr.bf16.mxu0 %v8411_v42  ;;  %6746 = vmatmul.mubr.msk.bf16.gmra.mrb[4].mxu1 %vm10231_vm11, %v11992_v1  ;;  %v8417_v42 = vld [vmem:[#allocation3 + $0x744] ss:$8 sps:$4 sm:$0xff]   ;;  %v8415_v1 = vld [vmem:[#allocation3 + $0x740] ss:$8 sps:$4 sm:$0xff]  }
 0x1d8   : > { %6750 = vmatprep.mubr.msk.bf16.mxu1 %vm10246_vm14, %v9771_v48  ;;  %3737 = vmatpush1.bf16.msra.mxu1 %v8436_v61  ;;  %v12099_v48 = vld [vmem:[#allocation40_spill] sm:$0xff]  ;;  %v8418_v61 = vld [vmem:[#allocation3 + $0x750] ss:$8 sps:$4 sm:$0xff]  }
 0x1d9   : > { %7114 = vmatmul.mubr.msk.bf16.gmra.mrb[4].mxu0 %vm9281_vm8, %v12096_v23  ;;  %3738 = vmatprep.subr.bf16.mxu1 %v8444_v55  ;;  %v8423_v55 = vld [vmem:[#allocation3 + $0x764] ss:$8 sps:$4 sm:$0xff]  }
 0x1da   : > { %7118 = vmatprep.mubr.msk.bf16.mxu0 %vm9352_vm10, %v12097_v40  ;;  %5182 = vmatpush1.bf16.msra.mxu0 %v8409_v14  ;;  %v12186_v14 = vld [vmem:[#allocation45_spill] sm:$0xff] }
 0x1db   : > { %5183 = vmatprep.subr.bf16.mxu0 %v8414_v2  ;;  %v8453_v2 = vld [vmem:[#allocation3 + $0x54] ss:$8 sps:$4 sm:$0xff]  }
 0x1dc   : > { %3739 = vmatpush1.bf16.msra.mxu1 %v8442_v43  ;;  %v8456_v43 = vld [vmem:[#allocation3 + $0x64] ss:$8 sps:$4 sm:$0xff]  }
 0x1dd   : > { %3740 = vmatprep.subr.bf16.mxu1 %v8447_v45  ;;  %v8462_v45 = vld [vmem:[#allocation3 + $0x74] ss:$8 sps:$4 sm:$0xff]  }
 0x1de   : > { %5184 = vmatpush1.bf16.msra.mxu0 %v8412_v26  ;;  %v8451_v26 = vld [vmem:[#allocation3 + $0x50] ss:$8 sps:$4 sm:$0xff]  }
 0x1df   : > { %5185 = vmatprep.subr.bf16.mxu0 %v8417_v42  ;;  %6754 = vmatmul.mubr.msk.bf16.gmra.mrb[8].mxu1 %vm10246_vm14, %v9776_v3  ;;  %v8421_v42 = vld [vmem:[#allocation3 + $0x760] ss:$8 sps:$4 sm:$0xff]   ;;  %v8426_v3 = vld [vmem:[#allocation3 + $0x774] ss:$8 sps:$4 sm:$0xff]  }
 0x1e0   : > { %6758 = vmatprep.mubr.msk.bf16.mxu1 %vm10261_vm0, %v9786_v24  ;;  %3741 = vmatpush1.bf16.msra.mxu1 %v8445_v57  ;;  %v12102_v24 = vld [vmem:[#allocation54_spill] sm:$0xff]  ;;  %v12105_v57 = vld [vmem:[#allocation65_spill] sm:$0xff] }
 0x1e1   : > { %7122 = vmatmul.mubr.msk.bf16.gmra.mrb[8].mxu0 %vm9352_vm10, %v12099_v48  ;;  %3742 = vmatprep.subr.bf16.mxu1 %v8453_v2  ;;  %vm12106_vm7 = vnez %v12105_v57  ;;  %v8432_v2 = vld [vmem:[#allocation3 + $0x784] ss:$8 sps:$4 sm:$0xff]  }
 0x1e2   : > { %7126 = vmatprep.mubr.msk.bf16.mxu0 %vm9437_vm12, %v12100_v59  ;;  %5186 = vmatpush1.bf16.msra.mxu0 %v8415_v1  ;;  %v12104_v1 = vld [vmem:[#allocation66_spill] sm:$0xff]  ;;  %v12188_v57 = vld [vmem:[#allocation49_spill] sm:$0xff] }
 0x1e3   : > { %5187 = vmatprep.subr.bf16.mxu0 %v8420_v39  ;;  %v8424_v39 = vld [vmem:[#allocation3 + $0x770] ss:$8 sps:$4 sm:$0xff]  }
 0x1e4   : > { %3743 = vmatpush1.bf16.msra.mxu1 %v8451_v26  ;;  %v8465_v26 = vld [vmem:[#allocation3 + $0x84] ss:$8 sps:$4 sm:$0xff]  }
 0x1e5   : > { %3744 = vmatprep.subr.bf16.mxu1 %v8456_v43  ;;  %v8439_v43 = vld [vmem:[#allocation3 + $0x790] ss:$8 sps:$4 sm:$0xff]  }
 0x1e6   : > { %5188 = vmatpush1.bf16.msra.mxu0 %v8418_v61  ;;  %v8460_v61 = vld [vmem:[#allocation3 + $0x70] ss:$8 sps:$4 sm:$0xff]  }
 0x1e7   : > { %5189 = vmatprep.subr.bf16.mxu0 %v8423_v55  ;;  %6762 = vmatmul.mubr.msk.bf16.gmra.mrb[12].mxu1 %vm10261_vm0, %v9814_v49  ;;  %v8430_v55 = vld [vmem:[#allocation3 + $0x780] ss:$8 sps:$4 sm:$0xff]   ;;  %v8441_v49 = vld [vmem:[#allocation3 + $0x794] ss:$8 sps:$4 sm:$0xff]  }
 0x1e8   : > { %6766 = vmatprep.mubr.msk.bf16.mxu1 %vm12103_vm5, %v9825_v18  ;;  %3745 = vmatpush1.bf16.msra.mxu1 %v8454_v46  ;;  %v12107_v18 = vld [vmem:[#allocation71_spill] sm:$0xff]  ;;  %v12109_v46 = vld [vmem:[#allocation74_spill] sm:$0xff] }
 0x1e9   : > { %7130 = vmatmul.mubr.msk.bf16.gmra.mrb[12].mxu0 %vm9437_vm12, %v12102_v24  ;;  %3746 = vmatprep.subr.bf16.mxu1 %v8462_v45  ;;  %v8450_v45 = vld [vmem:[#allocation3 + $0x7a4] ss:$8 sps:$4 sm:$0xff]  }
 0x1ea   : > { %7134 = vmatprep.mubr.msk.bf16.mxu0 %vm12106_vm7, %v12104_v1  ;;  %5190 = vmatpush1.bf16.msra.mxu0 %v8421_v42  ;;  %v12110_v42 = vld [vmem:[#allocation73_spill] sm:$0xff] }
 0x1eb   : > { %5191 = vmatprep.subr.bf16.mxu0 %v8426_v3  ;;  %v8471_v3 = vld [vmem:[#allocation3 + $0x94] ss:$8 sps:$4 sm:$0xff]   ;;  %vm12111_vm4 = vnez %v12110_v42 }
 0x1ec   : > { %3747 = vmatpush1.bf16.msra.mxu1 %v8460_v61  ;;  %v8474_v61 = vld [vmem:[#allocation3 + $0xa4] ss:$8 sps:$4 sm:$0xff]   ;;  %v12191_v42 = vld [vmem:[#allocation19_spill] sm:$0xff] }
 0x1ed   : > { %3748 = vmatprep.subr.bf16.mxu1 %v8465_v26  ;;  %v8457_v26 = vld [vmem:[#allocation3 + $0x7b0] ss:$8 sps:$4 sm:$0xff]  }
 0x1ee   : > { %5192 = vmatpush1.bf16.msra.mxu0 %v8424_v39  ;;  %v8469_v39 = vld [vmem:[#allocation3 + $0x90] ss:$8 sps:$4 sm:$0xff]  }
 0x1ef   : > { %5193 = vmatprep.subr.bf16.mxu0 %v8432_v2  ;;  %6770 = vmatmul.mubr.msk.bf16.gmra.mrb[16].mxu1 %vm12103_vm5, %v9834_v37  ;;  %v8448_v2 = vld [vmem:[#allocation3 + $0x7a0] ss:$8 sps:$4 sm:$0xff]   ;;  %v8459_v37 = vld [vmem:[#allocation3 + $0x7b4] ss:$8 sps:$4 sm:$0xff]  }
 0x1f0   : > { %6774 = vmatprep.mubr.msk.bf16.mxu1 %vm12108_vm9, %v9871_v60  ;;  %3749 = vmatpush1.bf16.msra.mxu1 %v8463_v9  ;;  %v12112_v60 = vld [vmem:[#allocation77_spill] sm:$0xff]  ;;  %v12114_v9 = vld [vmem:[#allocation47_spill] sm:$0xff] }
 0x1f1   : > { %7138 = vmatmul.mubr.msk.bf16.gmra.mrb[16].mxu0 %vm12106_vm7, %v12107_v18  ;;  %3750 = vmatprep.subr.bf16.mxu1 %v8471_v3  ;;  %v8468_v3 = vld [vmem:[#allocation3 + $0x7c4] ss:$8 sps:$4 sm:$0xff]  }
 0x1f2   : > { %7142 = vmatprep.mubr.msk.bf16.mxu0 %vm12111_vm4, %v12109_v46  ;;  %5194 = vmatpush1.bf16.msra.mxu0 %v8430_v55  ;;  %v12115_v55 = vld [vmem:[#allocation81_spill] sm:$0xff] }
 0x1f3   : > { %5195 = vmatprep.subr.bf16.mxu0 %v8441_v49  ;;  %v8480_v49 = vld [vmem:[#allocation3 + $0xb4] ss:$8 sps:$4 sm:$0xff]   ;;  %vm12116_vm5 = vnez %v12115_v55  ;;  %v12196_v55 = vld [vmem:[#allocation109_spill] sm:$0xff] }
 0x1f4   : > { %3751 = vmatpush1.bf16.msra.mxu1 %v8469_v39  ;;  %v8483_v39 = vld [vmem:[#allocation3 + $0xc4] ss:$8 sps:$4 sm:$0xff]  }
 0x1f5   : > { %3752 = vmatprep.subr.bf16.mxu1 %v8474_v61  ;;  %v8475_v61 = vld [vmem:[#allocation3 + $0x7d0] ss:$8 sps:$4 sm:$0xff]  }
 0x1f6   : > { %5196 = vmatpush1.bf16.msra.mxu0 %v8439_v43  ;;  %v8478_v43 = vld [vmem:[#allocation3 + $0xb0] ss:$8 sps:$4 sm:$0xff]  }
 0x1f7   : > { %5197 = vmatprep.subr.bf16.mxu0 %v8450_v45  ;;  %6778 = vmatmul.mubr.msk.bf16.gmra.mrb[20].mxu1 %vm12108_vm9, %v9880_v21  ;;  %v8466_v45 = vld [vmem:[#allocation3 + $0x7c0] ss:$8 sps:$4 sm:$0xff]   ;;  %v8477_v21 = vld [vmem:[#allocation3 + $0x7d4] ss:$8 sps:$4 sm:$0xff]   ;;  %vm12118_vm9 = vnez %v12019_v16 }
 0x1f8   : > { %6782 = vmatprep.mubr.msk.bf16.mxu1 %vm12113_vm15, %v9890_v35  ;;  %3753 = vmatpush1.bf16.msra.mxu1 %v8472_v63  ;;  %v12117_v35 = vld [vmem:[#allocation51_spill] sm:$0xff]  ;;  %v12119_v63 = vld [vmem:[#allocation52_spill] sm:$0xff] }
 0x1f9   : > { %7146 = vmatmul.mubr.msk.bf16.gmra.mrb[20].mxu0 %vm12111_vm4, %v12112_v60  ;;  %3754 = vmatprep.subr.bf16.mxu1 %v8480_v49  ;;  %v8486_v49 = vld [vmem:[#allocation3 + $0x7e4] ss:$8 sps:$4 sm:$0xff]  }
 0x1fa   : > { %7150 = vmatprep.mubr.msk.bf16.mxu0 %vm12116_vm5, %v12114_v9  ;;  %5198 = vmatpush1.bf16.msra.mxu0 %v8448_v2  ;;  %v12120_v2 = vld [vmem:[#allocation88_spill] sm:$0xff] }
 0x1fb   : > { %5199 = vmatprep.subr.bf16.mxu0 %v8459_v37  ;;  %v8489_v37 = vld [vmem:[#allocation3 + $0xd4] ss:$8 sps:$4 sm:$0xff]   ;;  %vm12121_vm0 = vnez %v12120_v2  ;;  %v8547_v2 = vld [vmem:[#allocation8 + $0x40] sm:$0xff]  }
 0x1fc   : > { %3755 = vmatpush1.bf16.msra.mxu1 %v8478_v43  ;;  %v8492_v43 = vld [vmem:[#allocation3 + $0xe4] ss:$8 sps:$4 sm:$0xff]  }
 0x1fd   : > { %3756 = vmatprep.subr.bf16.mxu1 %v8483_v39  ;;  %v8493_v39 = vld [vmem:[#allocation3 + $0x7f0] ss:$8 sps:$4 sm:$0xff]  }
 0x1fe   : > { %5200 = vmatpush1.bf16.msra.mxu0 %v8457_v26  ;;  %v8487_v26 = vld [vmem:[#allocation3 + $0xd0] ss:$8 sps:$4 sm:$0xff]  }
 0x1ff   : > { %5201 = vmatprep.subr.bf16.mxu0 %v8468_v3  ;;  %6786 = vmatmul.mubr.msk.bf16.gmra.mrb[24].mxu1 %vm12113_vm15, %v9902_v54  ;;  %v8484_v3 = vld [vmem:[#allocation3 + $0x7e0] ss:$8 sps:$4 sm:$0xff]   ;;  %vm12123_vm15 = vnez %v12024_v56 }
 0x200   : > { %6790 = vmatprep.mubr.msk.bf16.mxu1 %vm12118_vm9, %v9922_v62  ;;  %3757 = vmatpush1.bf16.msra.mxu1 %v8481_v0  ;;  %v8490_v54 = vld [vmem:[#allocation3 + $0xe0] ss:$8 sps:$4 sm:$0xff]  }
 0x201   : > { %7154 = vmatmul.mubr.msk.bf16.gmra.mrb[24].mxu0 %vm12116_vm5, %v12117_v35  ;;  %3758 = vmatprep.subr.bf16.mxu1 %v8489_v37  ;;  %v12122_v62 = vld [vmem:[#allocation55_spill] sm:$0xff]  ;;  %v12124_v0 = vld [vmem:[#allocation56_spill] sm:$0xff]  ;;  %v8496_v37 = vld [vmem:[#allocation3 + $0xf0] ss:$8 sps:$4 sm:$0xff]  }
 0x202   : > { %7158 = vmatprep.mubr.msk.bf16.mxu0 %vm12121_vm0, %v12119_v63  ;;  %5202 = vmatpush1.bf16.msra.mxu0 %v8466_v45  ;;  %v12125_v45 = vld [vmem:[#allocation93_spill] sm:$0xff] }
 0x203   : > { %5203 = vmatprep.subr.bf16.mxu0 %v8477_v21  ;;  %v8498_v21 = vld [vmem:[#allocation3 + $0xf4] ss:$8 sps:$4 sm:$0xff]   ;;  %vm12126_vm14 = vnez %v12125_v45 }
 0x204   : > { %3759 = vmatpush1.bf16.msra.mxu1 %v8487_v26  ;;  %v12132_v26 = vld [vmem:[#allocation61_spill] sm:$0xff] }
 0x205   : > { %3760 = vmatprep.subr.bf16.mxu1 %v8492_v43  ;;  %v12135_v43 = vld [vmem:[#allocation100_spill] sm:$0xff] }
 0x206   : > { %5204 = vmatpush1.bf16.msra.mxu0 %v8475_v61  ;;  %v8501_v61 = vld [vmem:[#allocation3 + $0x804] ss:$8 sps:$4 sm:$0xff]  }
 0x207   : > { %5205 = vmatprep.subr.bf16.mxu0 %v8486_v49  ;;  %6794 = vmatmul.mubr.msk.bf16.gmra.mrb[28].mxu1 %vm12118_vm9, %v9925_v34  ;;  %v12127_v49 = vld [vmem:[#allocation58_spill] sm:$0xff]  ;;  %vm12128_vm9 = vnez %v12028_v10 }
 0x208   : > { %6798 = vmatprep.mubr.msk.bf16.mxu1 %vm12123_vm15, %v9950_v31  ;;  %3761 = vmatpush1.bf16.msra.mxu1 %v8490_v54  ;;  %v12130_v54 = vld [vmem:[#allocation97_spill] sm:$0xff] }
 0x209   : > { %7162 = vmatmul.mubr.msk.bf16.gmra.mrb[28].mxu0 %vm12121_vm0, %v12122_v62  ;;  %3762 = vmatprep.subr.bf16.mxu1 %v8498_v21  ;;  %vm12131_vm11 = vnez %v12130_v54  ;;  %v12137_v21 = vld [vmem:[#allocation63_spill] sm:$0xff] }
 0x20a   : > { %7166 = vmatprep.mubr.msk.bf16.mxu0 %vm12126_vm14, %v12124_v0  ;;  %5206 = vmatpush1.bf16.msra.mxu0 %v8484_v3  ;;  %v12134_v3 = vld [vmem:[#allocation62_spill] sm:$0xff] }
 0x20b   : > { %5207 = vmatprep.subr.bf16.mxu0 %v8495_v33  ;;  %v12129_v33 = vld [vmem:[#allocation60_spill] sm:$0xff] }
 0x20c   : > { %3763 = vmatpush1.bf16.msra.mxu1 %v8496_v37  ;;  %v12140_v37 = vld [vmem:[#allocation106_spill] sm:$0xff] }
 0x20d   : > { %7339 = vmatprep.subr.bf16.mxu1 %v8547_v2 }
 0x20e   : > { %5208 = vmatpush1.bf16.msra.mxu0 %v8493_v39  ;;  %v12139_v39 = vld [vmem:[#allocation64_spill] sm:$0xff] }
 0x20f   : > { %5370 = vmatprep.subr.bf16.mxu0 %v8501_v61  ;;  %6802 = vmatmul.mubr.msk.bf16.gmra.mrb[32].mxu1 %vm12123_vm15, %v12031_v5  ;;  %vm12133_vm15 = vnez %v12037_v36  ;;  %v12142_v61 = vld [vmem:[#allocation68_spill] sm:$0xff] }
 0x210   : > { %6806 = vmatprep.mubr.msk.bf16.mxu1 %vm12128_vm9, %v12033_v52  ;;  %v12144_v36 = vld [vmem:[#allocation112_spill] sm:$0xff] }
 0x211   : > { %7170 = vmatmul.mubr.msk.bf16.gmra.mrb[32].mxu0 %vm12126_vm14, %v12127_v49  ;;  %vm12136_vm14 = vnez %v12135_v43  ;;  %v12214_v43 = vld [vmem:[#allocation83_spill] sm:$0xff] }
 0x212   : > { %7174 = vmatprep.mubr.msk.bf16.mxu0 %vm12131_vm11, %v12129_v33 }
 0x217   : > { %6810 = vmatmul.mubr.msk.bf16.gmra.mrb[36].mxu1 %vm12128_vm9, %v12040_v58  ;;  %vm12138_vm9 = vnez %v12045_v27  ;;  %v12148_v27 = vld [vmem:[#allocation117_spill] sm:$0xff] }
 0x218   : > { %6814 = vmatprep.mubr.msk.bf16.mxu1 %vm12133_vm15, %v12042_v30 }
 0x219   : > { %7178 = vmatmul.mubr.msk.bf16.gmra.mrb[36].mxu0 %vm12131_vm11, %v12132_v26  ;;  %vm12141_vm11 = vnez %v12140_v37 }
 0x21a   : > { %7182 = vmatprep.mubr.msk.bf16.mxu0 %vm12136_vm14, %v12134_v3 }
 0x21f   : > { %6818 = vmatmul.mubr.msk.bf16.gmra.mrb[40].mxu1 %vm12133_vm15, %v12050_v6  ;;  %v12143_v6 = vld [vmem:[#allocation111_spill] sm:$0xff]  ;;  %vm12145_vm15 = vnez %v12144_v36 }
 0x220   : > { %6822 = vmatprep.mubr.msk.bf16.mxu1 %vm12138_vm9, %v10099_v7  ;;  %v12146_v7 = vld [vmem:[#allocation114_spill] sm:$0xff] }
 0x221   : > { %7186 = vmatmul.mubr.msk.bf16.gmra.mrb[40].mxu0 %vm12136_vm14, %v12137_v21 }
 0x222   : > { %7190 = vmatprep.mubr.msk.bf16.mxu0 %vm12141_vm11, %v12139_v39 }
 0x227   : > { %6826 = vmatmul.mubr.msk.bf16.gmra.mrb[44].mxu1 %vm12138_vm9, %v10121_v47  ;;  %v12147_v47 = vld [vmem:[#allocation115_spill] sm:$0xff]  ;;  %vm12149_vm9 = vnez %v12148_v27 }
 0x228   : > { %6830 = vmatprep.mubr.msk.bf16.mxu1 %vm10409_vm2, %v10402_v28  ;;  %v12150_v28 = vld [vmem:[#allocation21_spill] sm:$0xff] }
 0x229   : > { %7194 = vmatmul.mubr.msk.bf16.gmra.mrb[44].mxu0 %vm12141_vm11, %v12142_v61  ;;  %v12151_v30 = vunpack.c.h.bf16 %v12150_v28  ;;  %v12160_v5 = vunpack.c.l.bf16 %v12150_v28 }
 0x22a   : > { %7198 = vmatprep.mubr.msk.bf16.mxu0 %vm12145_vm15, %v12143_v6 }
 0x22b   : > { %v1368_v58 = vrot.slane %v12151_v30, 1  ;;  %v12157_v30 = vld [vmem:[#allocation70_spill] sm:$0xff]  ;;  %v1366_v56 = vrot.slane %v12160_v5, 1 }
 0x22f   : > { %6834 = vmatmul.mubr.msk.bf16.gmra.mrb[48].mxu1 %vm10409_vm2, %v10432_v38  ;;  %v12152_v38 = vld [vmem:[#allocation118_spill] sm:$0xff]  ;;  %vm12155_vm2 = vnez %v12154_v19  ;;  %v12168_v19 = vld [vmem:[#allocation31_spill] sm:$0xff] }
 0x230   : > { %6838 = vmatprep.mubr.msk.bf16.mxu1 %vm10441_vm1, %v10434_v12  ;;  %v12153_v12 = vld [vmem:[#allocation78_spill] sm:$0xff] }
 0x231   : > { %7202 = vmatmul.mubr.msk.bf16.gmra.mrb[48].mxu0 %vm12145_vm15, %v12146_v7  ;;  %vm12156_vm15 = vcmask 1046528  }
 0x232   : > { %7206 = vmatprep.mubr.msk.bf16.mxu0 %vm12149_vm9, %v12147_v47  ;;  %v1369_v10 = vsel %vm12156_vm15, %v10449_v51, %v1368_v58  ;;  %vm12158_vm11 = vmmov %vm12156_vm15  ;;  %v8499_v51 = vld [vmem:[#allocation3 + $0x800] ss:$8 sps:$4 sm:$0xff]  }
 0x233   : > { %v1437_v52 = vsel %vm12158_vm11, %v1368_v58, %v12157_v30  ;;  %v1367_v5 = vsel %vm12158_vm11, %v10478_v29, %v1366_v56  ;;  %v12169_v29 = vld [vmem:[#allocation32_spill] sm:$0xff]  ;;  %v8502_v30 = vld [vmem:[#allocation3 + $0x810] ss:$8 sps:$4 sm:$0xff]  }
 0x234   : > { %v10690_v13 = vpack.c.bf16 %v1437_v52, %v1369_v10  ;;  %v12164_v10 = vmov 0   ;;  %v12165_v52 = vld [vmem:[#allocation80_spill] sm:$0xff] }
 0x237   : > { %6842 = vmatmul.mubr.msk.bf16.gmra.mrb[52].mxu1 %vm10441_vm1, %v10466_v50  ;;  %v12159_v50 = vand.u32 15, %v10497_v11  ;;  %v12171_v11 = vld [vmem:[#allocation22_spill] sm:$0xff] }
 0x238   : > { %6846 = vmatprep.mubr.msk.bf16.mxu1 %vm10481_vm13, %v10472_v8 }
 0x239   : > { %7210 = vmatmul.mubr.msk.bf16.gmra.mrb[52].mxu0 %vm12149_vm9, %v12152_v38  ;;  %vm8037_vm1 = vcmp.ne.s32.totalorder %v12159_v50, 15  ;;  %v8504_v50 = vld [vmem:[#allocation3 + $0x814] ss:$8 sps:$4 sm:$0xff]  }
 0x23a   : > { %7214 = vmatprep.mubr.msk.bf16.mxu0 %vm12155_vm2, %v12153_v12  ;;  %vm10695_vm9 = vmpackc.low %vm8037_vm1, %vm11944_vm3  ;;  %v12163_v12 = vld [vmem:[#allocation79_spill] sm:$0xff] }
 0x23b   : > { %vm12166_vm3 = vmmov %vm12158_vm11  ;;  %vm12230_vm11 = vnez %v12019_v16  ;;  %v12239_v16 = vld [vmem:[#allocation103_spill] sm:$0xff] }
 0x23c   : > { %v1436_v58 = vsel %vm12166_vm3, %v1366_v56, %v12165_v52  ;;  %v12170_v56 = vld [vmem:[#allocation23_spill] sm:$0xff] }
 0x23d   : > { %v10713_v28 = vpack.c.bf16 %v1436_v58, %v1367_v5  ;;  %v8507_v5 = vld [vmem:[#allocation3 + $0x824] ss:$8 sps:$4 sm:$0xff]   ;;  %v8505_v52 = vld [vmem:[#allocation3 + $0x820] ss:$8 sps:$4 sm:$0xff]   ;;  %v8510_v58 = vld [vmem:[#allocation3 + $0x834] ss:$8 sps:$4 sm:$0xff]  }
 0x23f   : > { %6850 = vmatmul.mubr.msk.bf16.gmra.mrb[56].mxu1 %vm10481_vm13, %v10502_v32  ;;  %12167 = vst [vmem:[#allocation27_spill] sm:$0xff] %v10713_v28 }
 0x240   : > { %6854 = vmatprep.mubr.msk.bf16.mxu1 %vm10695_vm9, %v10690_v13 }
 0x241   : > { %7218 = vmatmul.mubr.msk.bf16.gmra.mrb[56].mxu0 %vm12155_vm2, %v12163_v12  ;;  %vm12172_vm2 = vnez %v12171_v11  ;;  %v12173_v12 = vld [vmem:[#allocation37_spill] sm:$0xff]  ;;  %v12177_v11 = vld [vmem:[#allocation42_spill] sm:$0xff] }
 0x242   : > { %5166 = vmatprep.mubr.bf16.mxu0 %v12164_v10 }
 0x247   : > { %6858 = vmatmul.mubr.msk.bf16.gmra.mrb[60].mxu1 %vm10695_vm9, %v10713_v28  ;;  %v12175_v28 = vld [vmem:[#allocation38_spill] sm:$0xff] }
 0x248   : > { %3764 = vmatprep.mubr.bf16.mxu1 %v12164_v10 }
 0x249   : > { %5167 = vmatmul.mubr.bf16.gmra.mrb[60].mxu0 %v12164_v10 }
 0x24a   : > { %5209 = vmatprep.mubr.bf16.mxu0 %v12168_v19  ;;  %v12174_v19 = vld [vmem:[#allocation25_spill] sm:$0xff] }
 0x24f   : > { %3765 = vmatmul.mubr.bf16.vlgmr.msra.gmra.mrb[0].mxu1 %v12164_v10 }
 0x250   : > { %6862 = vmatprep.mubr.msk.bf16.mxu1 %vm12172_vm2, %v12170_v56  ;;  %v8511_v56 = vld [vmem:[#allocation3 + $0x840] ss:$8 sps:$4 sm:$0xff]  }
 0x251   : > { %5210 = vmatmul.mubr.bf16.vlgmr.msra.gmra.mrb[0].mxu0 %v12169_v29  ;;  %v8508_v29 = vld [vmem:[#allocation3 + $0x830] ss:$8 sps:$4 sm:$0xff]  }
 0x252   : > { %5371 = vmatpush1.bf16.msra.mxu0 %v8499_v51  ;;  %5219 = vmatprep.mubr.bf16.mxu0 %v12173_v12  ;;  %v12176_v51 = vld [vmem:[#allocation41_spill] sm:$0xff] }
 0x253   : > { %5372 = vmatprep.subr.bf16.mxu0 %v8504_v50  ;;  %v8513_v50 = vld [vmem:[#allocation3 + $0x844] ss:$8 sps:$4 sm:$0xff]  }
 0x254   : > { %v8519_v12 = vld [vmem:[#allocation3 + $0x864] ss:$8 sps:$4 sm:$0xff]  }
 0x256   : > { %5373 = vmatpush1.bf16.msra.mxu0 %v8502_v30  ;;  %v8516_v30 = vld [vmem:[#allocation3 + $0x854] ss:$8 sps:$4 sm:$0xff]  }
 0x257   : > { %5374 = vmatprep.subr.bf16.mxu0 %v8507_v5  ;;  %6866 = vmatmul.mubr.msk.bf16.gmra.mrb[4].mxu1 %vm12172_vm2, %v12174_v19  ;;  %v8517_v5 = vld [vmem:[#allocation3 + $0x860] ss:$8 sps:$4 sm:$0xff]  }
 0x258   : > { %6870 = vmatprep.mubr.msk.bf16.mxu1 %vm9171_vm6, %v12091_v41  ;;  %v12178_v41 = vld [vmem:[#allocation67_spill] sm:$0xff] }
 0x259   : > { %5220 = vmatmul.mubr.bf16.gmra.mrb[4].mxu0 %v12175_v28  ;;  %v8514_v28 = vld [vmem:[#allocation3 + $0x850] ss:$8 sps:$4 sm:$0xff]   ;;  %v8523_v19 = vld [vmem:[#allocation3 + $0x880] ss:$8 sps:$4 sm:$0xff]  }
 0x25a   : > { %5229 = vmatprep.mubr.bf16.mxu0 %v12176_v51  ;;  %5375 = vmatpush1.bf16.msra.mxu0 %v8505_v52  ;;  %v8522_v52 = vld [vmem:[#allocation3 + $0x874] ss:$8 sps:$4 sm:$0xff]  }
 0x25b   : > { %5376 = vmatprep.subr.bf16.mxu0 %v8510_v58  ;;  %v8525_v58 = vld [vmem:[#allocation3 + $0x884] ss:$8 sps:$4 sm:$0xff]   ;;  %v8528_v51 = vld [vmem:[#allocation3 + $0x894] ss:$8 sps:$4 sm:$0xff]  }
 0x25e   : > { %5377 = vmatpush1.bf16.msra.mxu0 %v8508_v29  ;;  %v8531_v29 = vld [vmem:[#allocation3 + $0x8a4] ss:$8 sps:$4 sm:$0xff]  }
 0x25f   : > { %5378 = vmatprep.subr.bf16.mxu0 %v8513_v50  ;;  %6874 = vmatmul.mubr.msk.bf16.gmra.mrb[8].mxu1 %vm9171_vm6, %v12093_v15  ;;  %v12180_v15 = vld [vmem:[#allocation75_spill] sm:$0xff]  ;;  %vm12192_vm6 = vnez %v12125_v45  ;;  %v12200_v45 = vld [vmem:[#allocation120_spill] sm:$0xff] }
 0x260   : > { %6878 = vmatprep.mubr.msk.bf16.mxu1 %vm9281_vm8, %v12094_v4  ;;  %v8520_v4 = vld [vmem:[#allocation3 + $0x870] ss:$8 sps:$4 sm:$0xff]   ;;  %v8529_v50 = vld [vmem:[#allocation3 + $0x8a0] ss:$8 sps:$4 sm:$0xff]  }
 0x261   : > { %5230 = vmatmul.mubr.bf16.gmra.mrb[8].mxu0 %v12177_v11  ;;  %v8535_v11 = vld [vmem:[#allocation3 + $0x8c0] ss:$8 sps:$4 sm:$0xff]  }
 0x262   : > { %5239 = vmatprep.mubr.bf16.mxu0 %v12178_v41  ;;  %5379 = vmatpush1.bf16.msra.mxu0 %v8511_v56  ;;  %v8534_v56 = vld [vmem:[#allocation3 + $0x8b4] ss:$8 sps:$4 sm:$0xff]  }
 0x263   : > { %5380 = vmatprep.subr.bf16.mxu0 %v8516_v30  ;;  %v8537_v30 = vld [vmem:[#allocation3 + $0x8c4] ss:$8 sps:$4 sm:$0xff]   ;;  %v8540_v41 = vld [vmem:[#allocation3 + $0x8d4] ss:$8 sps:$4 sm:$0xff]  }
 0x266   : > { %5381 = vmatpush1.bf16.msra.mxu0 %v8514_v28  ;;  %v8543_v28 = vld [vmem:[#allocation3 + $0x8e4] ss:$8 sps:$4 sm:$0xff]  }
 0x267   : > { %5382 = vmatprep.subr.bf16.mxu0 %v8519_v12  ;;  %6882 = vmatmul.mubr.msk.bf16.gmra.mrb[12].mxu1 %vm9281_vm8, %v12096_v23  ;;  %v12181_v23 = vld [vmem:[#allocation76_spill] sm:$0xff]  ;;  %vm12195_vm8 = vnez %v12130_v54 }
 0x268   : > { %6886 = vmatprep.mubr.msk.bf16.mxu1 %vm9352_vm10, %v12097_v40  ;;  %v8526_v40 = vld [vmem:[#allocation3 + $0x890] ss:$8 sps:$4 sm:$0xff]   ;;  %v8541_v12 = vld [vmem:[#allocation3 + $0x8e0] ss:$8 sps:$4 sm:$0xff]  }
 0x269   : > { %5240 = vmatmul.mubr.bf16.gmra.mrb[12].mxu0 %v12179_v44  ;;  %v8550_v54 = vld [vmem:[#allocation8 + $0x8] sm:$0xff]  }
 0x26a   : > { %5249 = vmatprep.mubr.bf16.mxu0 %v12180_v15  ;;  %5383 = vmatpush1.bf16.msra.mxu0 %v8517_v5  ;;  %v8546_v5 = vld [vmem:[#allocation3 + $0x8f4] ss:$8 sps:$4 sm:$0xff]   ;;  %v12218_v44 = vld [vmem:[#allocation84_spill] sm:$0xff] }
 0x26b   : > { %5384 = vmatprep.subr.bf16.mxu0 %v8522_v52  ;;  %v12189_v52 = vld [vmem:[#allocation53_spill] sm:$0xff]  ;;  %v12220_v15 = vld [vmem:[#allocation44_spill] sm:$0xff] }
 0x26e   : > { %5385 = vmatpush1.bf16.msra.mxu0 %v8520_v4  ;;  %v12221_v4 = vld [vmem:[#allocation94_spill] sm:$0xff] }
 0x26f   : > { %5386 = vmatprep.subr.bf16.mxu0 %v8525_v58  ;;  %6890 = vmatmul.mubr.msk.bf16.gmra.mrb[16].mxu1 %vm9352_vm10, %v12099_v48  ;;  %v12183_v48 = vld [vmem:[#allocation85_spill] sm:$0xff]  ;;  %vm12199_vm10 = vnez %v12140_v37  ;;  %v12216_v37 = vld [vmem:[#allocation91_spill] sm:$0xff]  ;;  %v12222_v58 = vld [vmem:[#allocation122_spill] sm:$0xff] }
 0x270   : > { %6894 = vmatprep.mubr.msk.bf16.mxu1 %vm9437_vm12, %v12100_v59  ;;  %v8532_v59 = vld [vmem:[#allocation3 + $0x8b0] ss:$8 sps:$4 sm:$0xff]  }
 0x271   : > { %5250 = vmatmul.mubr.bf16.gmra.mrb[16].mxu0 %v12181_v23  ;;  %v12224_v23 = vld [vmem:[#allocation95_spill] sm:$0xff] }
 0x272   : > { %5259 = vmatprep.mubr.bf16.mxu0 %v12182_v25  ;;  %5387 = vmatpush1.bf16.msra.mxu0 %v8523_v19  ;;  %v8555_v19 = vld [vmem:[#allocation8 + $0x60] sm:$0xff]  }
 0x273   : > { %5388 = vmatprep.subr.bf16.mxu0 %v8528_v51  ;;  %v8556_v51 = vld [vmem:[#allocation8 + $0x20] sm:$0xff]  }
 0x274   : > { %v12225_v25 = vld [vmem:[#allocation48_spill] sm:$0xff] }
 0x276   : > { %5389 = vmatpush1.bf16.msra.mxu0 %v8526_v40  ;;  %v12226_v40 = vld [vmem:[#allocation123_spill] sm:$0xff] }
 0x277   : > { %5390 = vmatprep.subr.bf16.mxu0 %v8531_v29  ;;  %6898 = vmatmul.mubr.msk.bf16.gmra.mrb[20].mxu1 %vm9437_vm12, %v12102_v24  ;;  %v12185_v24 = vld [vmem:[#allocation89_spill] sm:$0xff]  ;;  %vm12201_vm12 = vnez %v12144_v36  ;;  %vm12227_vm15 = vnez %v12226_v40  ;;  %v12228_v29 = vld [vmem:[#allocation96_spill] sm:$0xff] }
 0x278   : > { %6902 = vmatprep.mubr.msk.bf16.mxu1 %vm12106_vm7, %v12104_v1  ;;  %v8538_v1 = vld [vmem:[#allocation3 + $0x8d0] ss:$8 sps:$4 sm:$0xff]  }
 0x279   : > { %5260 = vmatmul.mubr.bf16.gmra.mrb[20].mxu0 %v12183_v48  ;;  %v8551_v36 = vld [vmem:[#allocation8 + $0x50] sm:$0xff]   ;;  %v8558_v48 = vld [vmem:[#allocation8 + $0x28] sm:$0xff]  }
 0x27a   : > { %5269 = vmatprep.mubr.bf16.mxu0 %v12184_v53  ;;  %5391 = vmatpush1.bf16.msra.mxu0 %v8529_v50  ;;  %v12229_v50 = vld [vmem:[#allocation98_spill] sm:$0xff]  ;;  %v12231_v53 = vld [vmem:[#allocation124_spill] sm:$0xff] }
 0x27b   : > { %5392 = vmatprep.subr.bf16.mxu0 %v8534_v56  ;;  %v8557_v56 = vld [vmem:[#allocation8 + $0x68] sm:$0xff]   ;;  %vm12232_vm3 = vnez %v12231_v53 }
 0x27e   : > { %5393 = vmatpush1.bf16.msra.mxu0 %v8532_v59  ;;  %v12233_v59 = vld [vmem:[#allocation18_spill] sm:$0xff] }
 0x27f   : > { %5394 = vmatprep.subr.bf16.mxu0 %v8537_v30  ;;  %6906 = vmatmul.mubr.msk.bf16.gmra.mrb[24].mxu1 %vm12106_vm7, %v12107_v18  ;;  %v12187_v18 = vld [vmem:[#allocation92_spill] sm:$0xff]  ;;  %vm12219_vm7 = vnez %v12218_v44  ;;  %v12234_v30 = vld [vmem:[#allocation101_spill] sm:$0xff] }
 0x280   : > { %6910 = vmatprep.mubr.msk.bf16.mxu1 %vm12111_vm4, %v12109_v46  ;;  %v8544_v46 = vld [vmem:[#allocation3 + $0x8f0] ss:$8 sps:$4 sm:$0xff]  }
 0x281   : > { %5270 = vmatmul.mubr.bf16.gmra.mrb[24].mxu0 %v12185_v24  ;;  %v8560_v24 = vld [vmem:[#allocation8 + $0x30] sm:$0xff]  }
 0x282   : > { %5279 = vmatprep.mubr.bf16.mxu0 %v12186_v14  ;;  %5395 = vmatpush1.bf16.msra.mxu0 %v8535_v11  ;;  %v12235_v11 = vld [vmem:[#allocation125_spill] sm:$0xff]  ;;  %v12237_v14 = vld [vmem:[#allocation102_spill] sm:$0xff] }
 0x283   : > { %5396 = vmatprep.subr.bf16.mxu0 %v8540_v41  ;;  %vm12236_vm2 = vnez %v12235_v11  ;;  %v8559_v41 = vld [vmem:[#allocation8 + $0x70] sm:$0xff]  }
 0x286   : > { %5397 = vmatpush1.bf16.msra.mxu0 %v8538_v1  ;;  %v12242_v1 = vld [vmem:[#allocation110_spill] sm:$0xff] }
 0x287   : > { %5398 = vmatprep.subr.bf16.mxu0 %v8543_v28  ;;  %6914 = vmatmul.mubr.msk.bf16.gmra.mrb[28].mxu1 %vm12111_vm4, %v12112_v60  ;;  %v12190_v60 = vld [vmem:[#allocation99_spill] sm:$0xff]  ;;  %vm12223_vm4 = vnez %v12222_v58  ;;  %v12243_v28 = vld [vmem:[#allocation126_spill] sm:$0xff] }
 0x288   : > { %6918 = vmatprep.mubr.msk.bf16.mxu1 %vm12116_vm5, %v12114_v9  ;;  %v12193_v9 = vld [vmem:[#allocation105_spill] sm:$0xff] }
 0x289   : > { %5280 = vmatmul.mubr.bf16.gmra.mrb[28].mxu0 %v12187_v18  ;;  %v12245_v18 = vld [vmem:[#allocation113_spill] sm:$0xff] }
 0x28a   : > { %5289 = vmatprep.mubr.bf16.mxu0 %v12188_v57  ;;  %5399 = vmatpush1.bf16.msra.mxu0 %v8541_v12  ;;  %v8561_v12 = vld [vmem:[#allocation8 + $0x78] sm:$0xff]  }
 0x28b   : > { %5400 = vmatprep.subr.bf16.mxu0 %v8546_v5  ;;  %v8562_v5 = vld [vmem:[#allocation8 + $0x38] sm:$0xff]  }
 0x28c   : > { %v12246_v57 = vld [vmem:[#allocation59_spill] sm:$0xff] }
 0x28e   : > { %5401 = vmatpush1.bf16.msra.mxu0 %v8544_v46  ;;  %v12247_v46 = vld [vmem:[#allocation20_spill] sm:$0xff] }
 0x28f   : > { %6922 = vmatmul.mubr.msk.bf16.gmra.mrb[32].mxu1 %vm12116_vm5, %v12117_v35  ;;  %v12194_v35 = vld [vmem:[#allocation108_spill] sm:$0xff]  ;;  %vm12215_vm5 = vnez %v12214_v43 }
 0x290   : > { %6926 = vmatprep.mubr.msk.bf16.mxu1 %vm12121_vm0, %v12119_v63  ;;  %v12198_v63 = vld [vmem:[#allocation119_spill] sm:$0xff] }
 0x291   : > { %5290 = vmatmul.mubr.bf16.gmra.mrb[32].mxu0 %v12189_v52 }
 0x292   : > { %5299 = vmatprep.mubr.bf16.mxu0 %v12190_v60 }
 0x297   : > { %6930 = vmatmul.mubr.msk.bf16.gmra.mrb[36].mxu1 %vm12121_vm0, %v12122_v62  ;;  %v12197_v62 = vld [vmem:[#allocation116_spill] sm:$0xff]  ;;  %vm12204_vm0 = vnez %v12148_v27  ;;  %v12212_v27 = vld [vmem:[#allocation34_spill] sm:$0xff] }
 0x298   : > { %6934 = vmatprep.mubr.msk.bf16.mxu1 %vm12192_vm6, %v12124_v0  ;;  %v8548_v0 = vld [vmem:[#allocation8] sm:$0xff]  }
 0x299   : > { %5300 = vmatmul.mubr.bf16.gmra.mrb[36].mxu0 %v12191_v42  ;;  %7340 = vmatpush3.bf16.msra.mxu1 %v8548_v0 }
 0x29a   : > { %5309 = vmatprep.mubr.bf16.mxu0 %v12193_v9 }
 0x29f   : > { %6938 = vmatmul.mubr.msk.bf16.gmra.mrb[40].mxu1 %vm12192_vm6, %v12127_v49  ;;  %v12203_v49 = vld [vmem:[#allocation132_spill] sm:$0xff]  ;;  %vm12240_vm6 = vnez %v12239_v16 }
 0x2a0   : > { %6942 = vmatprep.mubr.msk.bf16.mxu1 %vm12195_vm8, %v12129_v33  ;;  %v8549_v33 = vld [vmem:[#allocation8 + $0x48] sm:$0xff]  }
 0x2a1   : > { %5310 = vmatmul.mubr.bf16.gmra.mrb[40].mxu0 %v12194_v35  ;;  %7341 = vmatprep.subr.bf16.mxu1 %v8549_v33  ;;  %v12249_v35 = vld [vmem:[#allocation127_spill] sm:$0xff] }
 0x2a2   : > { %5319 = vmatprep.mubr.bf16.mxu0 %v12196_v55  ;;  %7342 = vmatpush3.bf16.msra.mxu1 %v8550_v54  ;;  %v12250_v55 = vld [vmem:[#allocation128_spill] sm:$0xff] }
 0x2a3   : > { %7343 = vmatprep.subr.bf16.mxu1 %v8551_v36 }
 0x2a7   : > { %6946 = vmatmul.mubr.msk.bf16.gmra.mrb[44].mxu1 %vm12195_vm8, %v12132_v26  ;;  %v12208_v26 = vld [vmem:[#allocation87_spill] sm:$0xff]  ;;  %vm12244_vm8 = vnez %v12243_v28 }
 0x2a8   : > { %6950 = vmatprep.mubr.msk.bf16.mxu1 %vm12136_vm14, %v12134_v3  ;;  %v12210_v3 = vld [vmem:[#allocation30_spill] sm:$0xff] }
 0x2a9   : > { %5320 = vmatmul.mubr.bf16.gmra.mrb[44].mxu0 %v10146_v20  ;;  %v12202_v20 = vld [vmem:[#allocation130_spill] sm:$0xff]  ;;  %vm12211_vm1 = vnez %v12210_v3  ;;  %v12255_v3 = vld [vmem:[#allocation27_spill] sm:$0xff] }
 0x2aa   : > { %5329 = vmatprep.mubr.bf16.mxu0 %v12197_v62  ;;  %v12251_v62 = vld [vmem:[#allocation129_spill] sm:$0xff] }
 0x2af   : > { %6954 = vmatmul.mubr.msk.bf16.gmra.mrb[48].mxu1 %vm12136_vm14, %v12137_v21  ;;  %v8553_v21 = vld [vmem:[#allocation8 + $0x58] sm:$0xff]  }
 0x2b0   : > { %6958 = vmatprep.mubr.msk.bf16.mxu1 %vm12199_vm10, %v12139_v39  ;;  %v8554_v39 = vld [vmem:[#allocation8 + $0x18] sm:$0xff]  }
 0x2b1   : > { %5330 = vmatmul.mubr.bf16.gmra.mrb[48].mxu0 %v12198_v63 }
 0x2b2   : > { %5339 = vmatprep.mubr.bf16.mxu0 %v12200_v45 }
 0x2b7   : > { %6962 = vmatmul.mubr.msk.bf16.gmra.mrb[52].mxu1 %vm12199_vm10, %v12142_v61  ;;  %v12217_v61 = vld [vmem:[#allocation17_spill] sm:$0xff]  ;;  %vm12248_vm10 = vnez %v12247_v46 }
 0x2b8   : > { %6966 = vmatprep.mubr.msk.bf16.mxu1 %vm12201_vm12, %v12143_v6  ;;  %v8552_v6 = vld [vmem:[#allocation8 + $0x10] sm:$0xff]  }
 0x2b9   : > { %5340 = vmatmul.mubr.bf16.gmra.mrb[52].mxu0 %v10207_v22  ;;  %v12205_v22 = vld [vmem:[#allocation86_spill] sm:$0xff]  ;;  %7344 = vmatpush3.bf16.msra.mxu1 %v8552_v6 }
 0x2ba   : > { %5349 = vmatprep.mubr.bf16.mxu0 %v12202_v20  ;;  %7345 = vmatprep.subr.bf16.mxu1 %v8553_v21  ;;  %v12253_v20 = vld [vmem:[#allocation69_spill] sm:$0xff] }
 0x2bd   : > { %7346 = vmatpush3.bf16.msra.mxu1 %v8554_v39 }
 0x2be   : > { %7347 = vmatprep.subr.bf16.mxu1 %v8555_v19 }
 0x2bf   : > { %6970 = vmatmul.mubr.msk.bf16.gmra.mrb[56].mxu1 %vm12201_vm12, %v12146_v7  ;;  %v12206_v7 = vld [vmem:[#allocation28_spill] sm:$0xff]  ;;  %vm12252_vm12 = vnez %v12251_v62 }
 0x2c0   : > { %6974 = vmatprep.mubr.msk.bf16.mxu1 %vm12204_vm0, %v12147_v47  ;;  %vm12207_vm14 = vnez %v12206_v7  ;;  %v12209_v47 = vld [vmem:[#allocation35_spill] sm:$0xff] }
 0x2c1   : > { %5350 = vmatmul.mubr.bf16.gmra.mrb[56].mxu0 %v12203_v49  ;;  %7348 = vmatpush3.bf16.msra.mxu1 %v8556_v51  ;;  %v12254_v49 = vld [vmem:[#allocation131_spill] sm:$0xff] }
 0x2c2   : > { %5359 = vmatprep.mubr.bf16.mxu0 %v12164_v10  ;;  %7349 = vmatprep.subr.bf16.mxu1 %v8557_v56 }
 0x2c5   : > { %7350 = vmatpush3.bf16.msra.mxu1 %v8558_v48 }
 0x2c6   : > { %7351 = vmatprep.subr.bf16.mxu1 %v8559_v41 }
 0x2c7   : > { %6978 = vmatmul.mubr.msk.bf16.gmra.mrb[60].mxu1 %vm12204_vm0, %v12152_v38  ;;  %v12213_v38 = vld [vmem:[#allocation90_spill] sm:$0xff] }
 0x2c9   : > { %5360 = vmatmul.mubr.bf16.gmra.mrb[60].mxu0 %v12164_v10  ;;  %7352 = vmatpush3.bf16.msra.mxu1 %v8560_v24 }
 0x2ca   : > { %7222 = vmatprep.mubr.msk.bf16.mxu0 %vm12207_vm14, %v12205_v22  ;;  %7353 = vmatprep.subr.bf16.mxu1 %v8561_v12 }
 0x2cd   : > { %7354 = vmatpush3.bf16.msra.mxu1 %v8562_v5 }
 0x2d1   : > { %7226 = vmatmul.mubr.msk.bf16.vlgmr.msra.gmra.mrb[0].mxu0 %vm12207_vm14, %v12208_v26 }
 0x2d2   : > { %7230 = vmatprep.mubr.msk.bf16.mxu0 %vm12211_vm1, %v12209_v47 }
 0x2d9   : > { %7234 = vmatmul.mubr.msk.bf16.gmra.mrb[4].mxu0 %vm12211_vm1, %v12212_v27 }
 0x2da   : > { %7238 = vmatprep.mubr.msk.bf16.mxu0 %vm12215_vm5, %v12213_v38 }
 0x2e1   : > { %7242 = vmatmul.mubr.msk.bf16.gmra.mrb[8].mxu0 %vm12215_vm5, %v12216_v37 }
 0x2e2   : > { %7246 = vmatprep.mubr.msk.bf16.mxu0 %vm12219_vm7, %v12217_v61 }
 0x2e9   : > { %7250 = vmatmul.mubr.msk.bf16.gmra.mrb[12].mxu0 %vm12219_vm7, %v12220_v15 }
 0x2ea   : > { %7254 = vmatprep.mubr.msk.bf16.mxu0 %vm12223_vm4, %v12221_v4 }
 0x2f1   : > { %7258 = vmatmul.mubr.msk.bf16.gmra.mrb[16].mxu0 %vm12223_vm4, %v12224_v23 }
 0x2f2   : > { %7262 = vmatprep.mubr.msk.bf16.mxu0 %vm12227_vm15, %v12225_v25 }
 0x2f9   : > { %7266 = vmatmul.mubr.msk.bf16.gmra.mrb[20].mxu0 %vm12227_vm15, %v12228_v29 }
 0x2fa   : > { %7270 = vmatprep.mubr.msk.bf16.mxu0 %vm12230_vm11, %v12229_v50 }
 0x301   : > { %7274 = vmatmul.mubr.msk.bf16.gmra.mrb[24].mxu0 %vm12230_vm11, %v9925_v34  ;;  %v12238_v34 = vld [vmem:[#allocation104_spill] sm:$0xff] }
 0x302   : > { %7278 = vmatprep.mubr.msk.bf16.mxu0 %vm12232_vm3, %v9950_v31  ;;  %v12241_v31 = vld [vmem:[#allocation107_spill] sm:$0xff] }
 0x309   : > { %7282 = vmatmul.mubr.msk.bf16.gmra.mrb[28].mxu0 %vm12232_vm3, %v12233_v59 }
 0x30a   : > { %7286 = vmatprep.mubr.msk.bf16.mxu0 %vm12236_vm2, %v12234_v30 }
 0x311   : > { %7290 = vmatmul.mubr.msk.bf16.gmra.mrb[32].mxu0 %vm12236_vm2, %v12237_v14 }
 0x312   : > { %7294 = vmatprep.mubr.msk.bf16.mxu0 %vm12240_vm6, %v12238_v34 }
 0x319   : > { %7298 = vmatmul.mubr.msk.bf16.gmra.mrb[36].mxu0 %vm12240_vm6, %v12241_v31 }
 0x31a   : > { %7302 = vmatprep.mubr.msk.bf16.mxu0 %vm12244_vm8, %v12242_v1 }
 0x321   : > { %7306 = vmatmul.mubr.msk.bf16.gmra.mrb[40].mxu0 %vm12244_vm8, %v12245_v18 }
 0x322   : > { %7310 = vmatprep.mubr.msk.bf16.mxu0 %vm12248_vm10, %v12246_v57  ;;  %v10912_v52 = vpop.f32.mrb[0].mxu1 }
 0x323   : > { %v10914_v60 = vpop.f32.mrb[1].mxu1 }
 0x324   : > { %v10916_v42 = vpop.f32.mrb[2].mxu1 }
 0x325   : > { %v10918_v9 = vpop.f32.mrb[3].mxu1 }
 0x329   : > { %7314 = vmatmul.mubr.msk.bf16.gmra.mrb[44].mxu0 %vm12248_vm10, %v12249_v35 }
 0x32a   : > { %7318 = vmatprep.mubr.msk.bf16.mxu0 %vm12252_vm12, %v12250_v55  ;;  %v10926_v63 = vpop.f32.mrb[4].mxu1 }
 0x32b   : > { %v10928_v2 = vpop.f32.mrb[5].mxu1 }
 0x32c   : > { %v10930_v0 = vpop.f32.mrb[6].mxu1 }
 0x32d   : > { %v10932_v45 = vpop.f32.mrb[7].mxu1 }
 0x331   : > { %7322 = vmatmul.mubr.msk.bf16.gmra.mrb[48].mxu0 %vm12252_vm12, %v12253_v20 }
 0x332   : > { %7326 = vmatprep.mubr.msk.bf16.mxu0 %vm10481_vm13, %v12254_v49  ;;  %v10940_v33 = vpop.f32.mrb[8].mxu1 }
 0x333   : > { %v10942_v54 = vpop.f32.mrb[9].mxu1 }
 0x334   : > { %v10944_v22 = vpop.f32.mrb[10].mxu1 }
 0x335   : > { %v10946_v7 = vpop.f32.mrb[11].mxu1 }
 0x339   : > { %7330 = vmatmul.mubr.msk.bf16.gmra.mrb[52].mxu0 %vm10481_vm13, %v10502_v32 }
 0x33a   : > { %7334 = vmatprep.mubr.msk.bf16.mxu0 %vm10695_vm9, %v10690_v13  ;;  %v10954_v36 = vpop.f32.mrb[12].mxu1 }
 0x33b   : > { %v10956_v6 = vpop.f32.mrb[13].mxu1 }
 0x33c   : > { %v10958_v26 = vpop.f32.mrb[14].mxu1 }
 0x33d   : > { %v10960_v47 = vpop.f32.mrb[15].mxu1 }
 0x341   : > { %7338 = vmatmul.mubr.msk.bf16.gmra.mrb[56].mxu0 %vm10695_vm9, %v12255_v3 }
 0x342   : > { %5552 = vmatprep.mubr.bf16.mxu0 %v12164_v10  ;;  %v10966_v17 = vpop.f32.mrb[16].mxu1 }
 0x343   : > { %v10968_v32 = vpop.f32.mrb[17].mxu1 }
 0x344   : > { %v10970_v27 = vpop.f32.mrb[18].mxu1 }
 0x345   : > { %v10972_v13 = vpop.f32.mrb[19].mxu1 }
 0x349   : > { %5553 = vmatmul.mubr.bf16.gmra.mrb[60].mxu0 %v12164_v10 }
 0x34a   : > { %v10975_v38 = vpop.f32.mrb[20].mxu1 }
 0x34b   : > { %v10977_v43 = vpop.f32.mrb[21].mxu1 }
 0x34c   : > { %v10979_v21 = vpop.f32.mrb[22].mxu1 }
 0x34d   : > { %v10981_v8 = vpop.f32.mrb[23].mxu1 }
 0x352   : > { %v10983_v39 = vpop.f32.mrb[24].mxu1 }
 0x353   : > { %v10985_v37 = vpop.f32.mrb[25].mxu1 }
 0x354   : > { %v10987_v61 = vpop.f32.mrb[26].mxu1 }
 0x355   : > { %v10989_v44 = vpop.f32.mrb[27].mxu1 }
 0x35a   : > { %v10991_v15 = vpop.f32.mrb[28].mxu1 }
 0x35b   : > { %v10993_v4 = vpop.f32.mrb[29].mxu1 }
 0x35c   : > { %v10995_v10 = vpop.f32.mrb[30].mxu1 }
 0x35d   : > { %v10997_v58 = vpop.f32.mrb[31].mxu1 }
 0x362   : > { %v10999_v19 = vpop.f32.mrb[32].mxu1 }
 0x363   : > { %v11001_v51 = vpop.f32.mrb[33].mxu1 }
 0x364   : > { %v11003_v23 = vpop.f32.mrb[34].mxu1 }
 0x365   : > { %v11005_v25 = vpop.f32.mrb[35].mxu1 }
 0x36a   : > { %v11007_v40 = vpop.f32.mrb[36].mxu1 }
 0x36b   : > { %v11009_v29 = vpop.f32.mrb[37].mxu1 }
 0x36c   : > { %v11011_v50 = vpop.f32.mrb[38].mxu1 }
 0x36d   : > { %v11013_v56 = vpop.f32.mrb[39].mxu1 }
 0x372   : > { %v11015_v48 = vpop.f32.mrb[40].mxu1 }
 0x373   : > { %v11017_v53 = vpop.f32.mrb[41].mxu1 }
 0x374   : > { %v11019_v59 = vpop.f32.mrb[42].mxu1 }
 0x375   : > { %v11021_v30 = vpop.f32.mrb[43].mxu1 }
 0x37a   : > { %v11023_v11 = vpop.f32.mrb[44].mxu1 }
 0x37b   : > { %v11025_v41 = vpop.f32.mrb[45].mxu1 }
 0x37c   : > { %v11027_v24 = vpop.f32.mrb[46].mxu1 }
 0x37d   : > { %12256 = vst [vmem:[#allocation26_spill] sm:$0xff] %v11027_v24  ;;  %v11029_v14 = vpop.f32.mrb[47].mxu1 }
 0x37e   : > { %12257 = vst [vmem:[#allocation29_spill] sm:$0xff] %v11029_v14 }
 0x382   : > { %v11031_v34 = vpop.f32.mrb[48].mxu1 }
 0x383   : > { %12258 = vst [vmem:[#allocation33_spill] sm:$0xff] %v11031_v34  ;;  %v11033_v16 = vpop.f32.mrb[49].mxu1 }
 0x384   : > { %12259 = vst [vmem:[#allocation46_spill] sm:$0xff] %v11033_v16  ;;  %v11035_v31 = vpop.f32.mrb[50].mxu1 }
 0x385   : > { %12260 = vst [vmem:[#allocation36_spill] sm:$0xff] %v11035_v31  ;;  %v11037_v1 = vpop.f32.mrb[51].mxu1 }
 0x386   : > { %12261 = vst [vmem:[#allocation39_spill] sm:$0xff] %v11037_v1 }
 0x38a   : > { %v11039_v28 = vpop.f32.mrb[52].mxu1 }
 0x38b   : > { %12262 = vst [vmem:[#allocation50_spill] sm:$0xff] %v11039_v28  ;;  %v11041_v12 = vpop.f32.mrb[53].mxu1  ;;  %v5627_v28 = vld [vmem:[#allocation6] sm:$0x3] }
 0x38c   : > { %12263 = vst [vmem:[#allocation40_spill] sm:$0xff] %v11041_v12  ;;  %v11043_v5 = vpop.f32.mrb[54].mxu1  ;;  %v12274_v12 = vld [vmem:[#allocation16_spill] sm:$0xff] }
 0x38d   : > { %12264 = vst [vmem:[#allocation43_spill] sm:$0xff] %v11043_v5  ;;  %v11045_v18 = vpop.f32.mrb[55].mxu1  ;;  %v5631_v5 = vsub.s32 0, %v12274_v12 }
 0x38e   : > { %12265 = vst [vmem:[#allocation57_spill] sm:$0xff] %v11045_v18  ;;  %v5635_v18 = vsub.s32 1, %v12274_v12 }
 0x390   : > { %v11067_v1 = vrot.slane %v5627_v28, %v5635_v18 }
 0x392   : > { %v11047_v57 = vpop.f32.mrb[56].mxu1 }
 0x393   : > { %12266 = vst [vmem:[#allocation54_spill] sm:$0xff] %v11047_v57  ;;  %v11049_v46 = vpop.f32.mrb[57].mxu1  ;;  %v11065_v57 = vrot.slane %v5627_v28, %v5631_v5 }
 0x394   : > { %12267 = vst [vmem:[#allocation66_spill] sm:$0xff] %v11049_v46  ;;  %v11051_v35 = vpop.f32.mrb[58].mxu1 }
 0x395   : > { %12268 = vst [vmem:[#allocation65_spill] sm:$0xff] %v11051_v35  ;;  %v11053_v55 = vpop.f32.mrb[59].mxu1 }
 0x396   : > { %12269 = vst [vmem:[#allocation71_spill] sm:$0xff] %v11053_v55 }
 0x39a   : > { %v11055_v62 = vpop.f32.mrb[60].mxu1 }
 0x39b   : > { %12270 = vst [vmem:[#allocation74_spill] sm:$0xff] %v11055_v62  ;;  %v11057_v20 = vpop.f32.mrb[61].mxu1 }
 0x39c   : > { %12271 = vst [vmem:[#allocation73_spill] sm:$0xff] %v11057_v20  ;;  %v11059_v49 = vpop.f32.mrb[62].mxu1 }
 0x39d   : > { %12272 = vst [vmem:[#allocation77_spill] sm:$0xff] %v11059_v49  ;;  %v11061_v3 = vpop.f32.mrb[63].mxu1 }
 0x39e   : > { %12273 = vst [vmem:[#allocation47_spill] sm:$0xff] %v11061_v3 }
 0x3a4   : > { %v5404_v46 = vpop.f32.mrb[0].mxu0 }
 0x3a5   : > { %v7451_v55 = vadd.f32 %v5404_v46, %v10912_v52  ;;  %v5406_v35 = vpop.f32.mrb[1].mxu0 }
 0x3a6   : > { %v7452_v62 = vadd.f32 %v5406_v35, %v10914_v60  ;;  %v5408_v20 = vpop.f32.mrb[2].mxu0 }
 0x3a7   : > { %v5639_v49 = vadd.f32 %v7451_v55, %v11065_v57  ;;  %v7453_v3 = vadd.f32 %v5408_v20, %v10916_v42  ;;  %v5410_v31 = vpop.f32.mrb[3].mxu0 }
 0x3a8   : > { %v5640_v16 = vadd.f32 %v7452_v62, %v11067_v1  ;;  %v7454_v12 = vadd.f32 %v5410_v31, %v10918_v9 }
 0x3a9   : > { %v5641_v5 = vadd.f32 %v7453_v3, %v11065_v57  ;;  %v5703_v18 = vmax.f32 %v5639_v49, 0.0 }
 0x3aa   : > { %v5642_v28 = vadd.f32 %v7454_v12, %v11067_v1  ;;  %v5704_v52 = vmax.f32 %v5640_v16, 0.0 }
 0x3ab   : > { %v5705_v34 = vmax.f32 %v5641_v5, 0.0 }
 0x3ac   : > { %v5706_v46 = vmax.f32 %v5642_v28, 0.0  ;;  %v5414_v14 = vpop.f32.mrb[4].mxu0 }
 0x3ad   : > { %v5767_v60 = vpack.c.bf16 %v5705_v34, %v5703_v18  ;;  %v7455_v35 = vadd.f32 %v5414_v14, %v10926_v63  ;;  %v5416_v55 = vpop.f32.mrb[5].mxu0 }
 0x3ae   : > { %v7456_v42 = vadd.f32 %v5416_v55, %v10928_v2  ;;  %v5418_v20 = vpop.f32.mrb[6].mxu0  ;;  %v5768_v24 = vpack.c.bf16 %v5706_v46, %v5704_v52 }
 0x3af   : > { %v5643_v62 = vadd.f32 %v7455_v35, %v11065_v57  ;;  %v7457_v9 = vadd.f32 %v5418_v20, %v10930_v0  ;;  %v5420_v31 = vpop.f32.mrb[7].mxu0 }
 0x3b0   : > { %v5644_v3 = vadd.f32 %v7456_v42, %v11067_v1  ;;  %v7458_v49 = vadd.f32 %v5420_v31, %v10932_v45  ;;  %5966 = vmatprep.mubr.bf16.mxu1 %v5768_v24 }
 0x3b1   : > { %v5645_v16 = vadd.f32 %v7457_v9, %v11065_v57  ;;  %5967 = vmatmul.mubr.bf16.vlgmr.msra.gmra.mrb[64].mxu1 %v5767_v60  ;;  %v5707_v14 = vmax.f32 %v5643_v62, 0.0 }
 0x3b2   : > { %v5646_v63 = vadd.f32 %v7458_v49, %v11067_v1  ;;  %v5708_v2 = vmax.f32 %v5644_v3, 0.0 }
 0x3b3   : > { %v5709_v34 = vmax.f32 %v5645_v16, 0.0 }
 0x3b4   : > { %v5710_v12 = vmax.f32 %v5646_v63, 0.0  ;;  %v5424_v5 = vpop.f32.mrb[8].mxu0 }
 0x3b5   : > { %v7459_v28 = vadd.f32 %v5424_v5, %v10940_v33  ;;  %v5426_v18 = vpop.f32.mrb[9].mxu0  ;;  %v5769_v0 = vpack.c.bf16 %v5709_v34, %v5707_v14 }
 0x3b6   : > { %v7460_v52 = vadd.f32 %v5426_v18, %v10942_v54  ;;  %v5428_v46 = vpop.f32.mrb[10].mxu0  ;;  %v5770_v35 = vpack.c.bf16 %v5710_v12, %v5708_v2 }
 0x3b7   : > { %v5647_v45 = vadd.f32 %v7459_v28, %v11065_v57  ;;  %v7461_v24 = vadd.f32 %v5428_v46, %v10944_v22  ;;  %v5430_v60 = vpop.f32.mrb[11].mxu0 }
 0x3b8   : > { %v5648_v55 = vadd.f32 %v7460_v52, %v11067_v1  ;;  %v7462_v42 = vadd.f32 %v5430_v60, %v10946_v7  ;;  %5974 = vmatprep.mubr.bf16.mxu1 %v5770_v35 }
 0x3b9   : > { %v5649_v20 = vadd.f32 %v7461_v24, %v11065_v57  ;;  %5975 = vmatmul.mubr.bf16.gmra.mrb[68].mxu1 %v5769_v0  ;;  %v5711_v62 = vmax.f32 %v5647_v45, 0.0 }
 0x3ba   : > { %v5650_v33 = vadd.f32 %v7462_v42, %v11067_v1  ;;  %v5712_v54 = vmax.f32 %v5648_v55, 0.0 }
 0x3bb   : > { %v5713_v9 = vmax.f32 %v5649_v20, 0.0 }
 0x3bc   : > { %v5714_v31 = vmax.f32 %v5650_v33, 0.0  ;;  %v5434_v3 = vpop.f32.mrb[12].mxu0 }
 0x3bd   : > { %v7463_v49 = vadd.f32 %v5434_v3, %v10954_v36  ;;  %v5436_v16 = vpop.f32.mrb[13].mxu0  ;;  %v5771_v22 = vpack.c.bf16 %v5713_v9, %v5711_v62 }
 0x3be   : > { %v7464_v63 = vadd.f32 %v5436_v16, %v10956_v6  ;;  %v5438_v14 = vpop.f32.mrb[14].mxu0  ;;  %v5772_v34 = vpack.c.bf16 %v5714_v31, %v5712_v54 }
 0x3bf   : > { %v5651_v7 = vadd.f32 %v7463_v49, %v11065_v57  ;;  %v7465_v2 = vadd.f32 %v5438_v14, %v10958_v26  ;;  %v5440_v12 = vpop.f32.mrb[15].mxu0 }
 0x3c0   : > { %v5652_v5 = vadd.f32 %v7464_v63, %v11067_v1  ;;  %v7466_v28 = vadd.f32 %v5440_v12, %v10960_v47  ;;  %5982 = vmatprep.mubr.bf16.mxu1 %v5772_v34 }
 0x3c1   : > { %v5653_v18 = vadd.f32 %v7465_v2, %v11065_v57  ;;  %5983 = vmatmul.mubr.bf16.gmra.mrb[72].mxu1 %v5771_v22  ;;  %v5715_v0 = vmax.f32 %v5651_v7, 0.0 }
 0x3c2   : > { %v5654_v36 = vadd.f32 %v7466_v28, %v11067_v1  ;;  %v5716_v6 = vmax.f32 %v5652_v5, 0.0 }
 0x3c3   : > { %v5717_v52 = vmax.f32 %v5653_v18, 0.0 }
 0x3c4   : > { %v5718_v46 = vmax.f32 %v5654_v36, 0.0  ;;  %v5444_v35 = vpop.f32.mrb[16].mxu0 }
 0x3c5   : > { %v7467_v45 = vadd.f32 %v5444_v35, %v10966_v17  ;;  %v5446_v24 = vpop.f32.mrb[17].mxu0  ;;  %v5773_v26 = vpack.c.bf16 %v5717_v52, %v5715_v0 }
 0x3c6   : > { %v7468_v60 = vadd.f32 %v5446_v24, %v10968_v32  ;;  %v5448_v55 = vpop.f32.mrb[18].mxu0  ;;  %v5774_v42 = vpack.c.bf16 %v5718_v46, %v5716_v6 }
 0x3c7   : > { %v5655_v47 = vadd.f32 %v7467_v45, %v11065_v57  ;;  %v7469_v20 = vadd.f32 %v5448_v55, %v10970_v27  ;;  %v5450_v33 = vpop.f32.mrb[19].mxu0 }
 0x3c8   : > { %v5656_v62 = vadd.f32 %v7468_v60, %v11067_v1  ;;  %v7470_v9 = vadd.f32 %v5450_v33, %v10972_v13  ;;  %5990 = vmatprep.mubr.bf16.mxu1 %v5774_v42 }
 0x3c9   : > { %v5657_v54 = vadd.f32 %v7469_v20, %v11065_v57  ;;  %5991 = vmatmul.mubr.bf16.gmra.mrb[76].mxu1 %v5773_v26  ;;  %v5719_v31 = vmax.f32 %v5655_v47, 0.0 }
 0x3ca   : > { %v5658_v17 = vadd.f32 %v7470_v9, %v11067_v1  ;;  %v5720_v32 = vmax.f32 %v5656_v62, 0.0 }
 0x3cb   : > { %v5721_v3 = vmax.f32 %v5657_v54, 0.0 }
 0x3cc   : > { %v5722_v49 = vmax.f32 %v5658_v17, 0.0  ;;  %v5454_v16 = vpop.f32.mrb[20].mxu0 }
 0x3cd   : > { %v7471_v22 = vadd.f32 %v5454_v16, %v10975_v38  ;;  %v5456_v63 = vpop.f32.mrb[21].mxu0  ;;  %v5775_v27 = vpack.c.bf16 %v5721_v3, %v5719_v31 }
 0x3ce   : > { %v7472_v14 = vadd.f32 %v5456_v63, %v10977_v43  ;;  %v5458_v34 = vpop.f32.mrb[22].mxu0  ;;  %v5776_v7 = vpack.c.bf16 %v5722_v49, %v5720_v32 }
 0x3cf   : > { %v5659_v13 = vadd.f32 %v7471_v22, %v11065_v57  ;;  %v7473_v2 = vadd.f32 %v5458_v34, %v10979_v21  ;;  %v5460_v12 = vpop.f32.mrb[23].mxu0 }
 0x3d0   : > { %v5660_v5 = vadd.f32 %v7472_v14, %v11067_v1  ;;  %v7474_v28 = vadd.f32 %v5460_v12, %v10981_v8  ;;  %5998 = vmatprep.mubr.bf16.mxu1 %v5776_v7 }
 0x3d1   : > { %v5661_v18 = vadd.f32 %v7473_v2, %v11065_v57  ;;  %5999 = vmatmul.mubr.bf16.gmra.mrb[80].mxu1 %v5775_v27  ;;  %v5723_v36 = vmax.f32 %v5659_v13, 0.0 }
 0x3d2   : > { %v5662_v38 = vadd.f32 %v7474_v28, %v11067_v1  ;;  %v5724_v43 = vmax.f32 %v5660_v5, 0.0 }
 0x3d3   : > { %v5725_v0 = vmax.f32 %v5661_v18, 0.0 }
 0x3d4   : > { %v5726_v52 = vmax.f32 %v5662_v38, 0.0  ;;  %v5464_v6 = vpop.f32.mrb[24].mxu0 }
 0x3d5   : > { %v7475_v46 = vadd.f32 %v5464_v6, %v10983_v39  ;;  %v5466_v35 = vpop.f32.mrb[25].mxu0  ;;  %v5777_v21 = vpack.c.bf16 %v5725_v0, %v5723_v36 }
 0x3d6   : > { %v7476_v45 = vadd.f32 %v5466_v35, %v10985_v37  ;;  %v5468_v24 = vpop.f32.mrb[26].mxu0  ;;  %v5778_v26 = vpack.c.bf16 %v5726_v52, %v5724_v43 }
 0x3d7   : > { %v5663_v8 = vadd.f32 %v7475_v46, %v11065_v57  ;;  %v7477_v60 = vadd.f32 %v5468_v24, %v10987_v61  ;;  %v5470_v55 = vpop.f32.mrb[27].mxu0 }
 0x3d8   : > { %v5664_v42 = vadd.f32 %v7476_v45, %v11067_v1  ;;  %v7478_v47 = vadd.f32 %v5470_v55, %v10989_v44  ;;  %6006 = vmatprep.mubr.bf16.mxu1 %v5778_v26 }
 0x3d9   : > { %v5665_v20 = vadd.f32 %v7477_v60, %v11065_v57  ;;  %6007 = vmatmul.mubr.bf16.gmra.mrb[84].mxu1 %v5777_v21  ;;  %v5727_v33 = vmax.f32 %v5663_v8, 0.0 }
 0x3da   : > { %v5666_v39 = vadd.f32 %v7478_v47, %v11067_v1  ;;  %v5728_v37 = vmax.f32 %v5664_v42, 0.0 }
 0x3db   : > { %v5729_v62 = vmax.f32 %v5665_v20, 0.0 }
 0x3dc   : > { %v5730_v9 = vmax.f32 %v5666_v39, 0.0  ;;  %v5474_v54 = vpop.f32.mrb[28].mxu0 }
 0x3dd   : > { %v7479_v17 = vadd.f32 %v5474_v54, %v10991_v15  ;;  %v5476_v31 = vpop.f32.mrb[29].mxu0  ;;  %v5779_v61 = vpack.c.bf16 %v5729_v62, %v5727_v33 }
 0x3de   : > { %v7480_v3 = vadd.f32 %v5476_v31, %v10993_v4  ;;  %v5478_v32 = vpop.f32.mrb[30].mxu0  ;;  %v5780_v49 = vpack.c.bf16 %v5730_v9, %v5728_v37 }
 0x3df   : > { %v5667_v44 = vadd.f32 %v7479_v17, %v11065_v57  ;;  %v7481_v16 = vadd.f32 %v5478_v32, %v10995_v10  ;;  %v5480_v22 = vpop.f32.mrb[31].mxu0 }
 0x3e0   : > { %v5668_v63 = vadd.f32 %v7480_v3, %v11067_v1  ;;  %v7482_v27 = vadd.f32 %v5480_v22, %v10997_v58  ;;  %6014 = vmatprep.mubr.bf16.mxu1 %v5780_v49 }
 0x3e1   : > { %v5669_v14 = vadd.f32 %v7481_v16, %v11065_v57  ;;  %6015 = vmatmul.mubr.bf16.gmra.mrb[88].mxu1 %v5779_v61  ;;  %v5731_v34 = vmax.f32 %v5667_v44, 0.0 }
 0x3e2   : > { %v5670_v15 = vadd.f32 %v7482_v27, %v11067_v1  ;;  %v5732_v4 = vmax.f32 %v5668_v63, 0.0 }
 0x3e3   : > { %v5733_v7 = vmax.f32 %v5669_v14, 0.0 }
 0x3e4   : > { %v5734_v13 = vmax.f32 %v5670_v15, 0.0  ;;  %v5484_v2 = vpop.f32.mrb[32].mxu0 }
 0x3e5   : > { %v7483_v12 = vadd.f32 %v5484_v2, %v10999_v19  ;;  %v5486_v5 = vpop.f32.mrb[33].mxu0  ;;  %v5781_v10 = vpack.c.bf16 %v5733_v7, %v5731_v34 }
 0x3e6   : > { %v7484_v28 = vadd.f32 %v5486_v5, %v11001_v51  ;;  %v5488_v18 = vpop.f32.mrb[34].mxu0  ;;  %v5782_v38 = vpack.c.bf16 %v5734_v13, %v5732_v4  ;;  %v12275_v5 = vld [vmem:[#allocation26_spill] sm:$0xff] }
 0x3e7   : > { %v5671_v58 = vadd.f32 %v7483_v12, %v11065_v57  ;;  %v7485_v36 = vadd.f32 %v5488_v18, %v11003_v23  ;;  %v5490_v0 = vpop.f32.mrb[35].mxu0 }
 0x3e8   : > { %v5672_v43 = vadd.f32 %v7484_v28, %v11067_v1  ;;  %v7486_v52 = vadd.f32 %v5490_v0, %v11005_v25  ;;  %6022 = vmatprep.mubr.bf16.mxu1 %v5782_v38  ;;  %v12276_v38 = vld [vmem:[#allocation29_spill] sm:$0xff] }
 0x3e9   : > { %v5673_v6 = vadd.f32 %v7485_v36, %v11065_v57  ;;  %6023 = vmatmul.mubr.bf16.gmra.mrb[92].mxu1 %v5781_v10  ;;  %v5735_v46 = vmax.f32 %v5671_v58, 0.0 }
 0x3ea   : > { %v5674_v19 = vadd.f32 %v7486_v52, %v11067_v1  ;;  %v5736_v51 = vmax.f32 %v5672_v43, 0.0 }
 0x3eb   : > { %v5737_v35 = vmax.f32 %v5673_v6, 0.0 }
 0x3ec   : > { %v5738_v21 = vmax.f32 %v5674_v19, 0.0  ;;  %v5494_v45 = vpop.f32.mrb[36].mxu0  ;;  %v12277_v19 = vld [vmem:[#allocation33_spill] sm:$0xff] }
 0x3ed   : > { %v7487_v24 = vadd.f32 %v5494_v45, %v11007_v40  ;;  %v5496_v26 = vpop.f32.mrb[37].mxu0  ;;  %v5783_v23 = vpack.c.bf16 %v5737_v35, %v5735_v46 }
 0x3ee   : > { %v7488_v8 = vadd.f32 %v5496_v26, %v11009_v29  ;;  %v5498_v60 = vpop.f32.mrb[38].mxu0  ;;  %v5784_v55 = vpack.c.bf16 %v5738_v21, %v5736_v51  ;;  %v12278_v21 = vld [vmem:[#allocation46_spill] sm:$0xff] }
 0x3ef   : > { %v5675_v25 = vadd.f32 %v7487_v24, %v11065_v57  ;;  %v7489_v42 = vadd.f32 %v5498_v60, %v11011_v50  ;;  %v5500_v47 = vpop.f32.mrb[39].mxu0 }
 0x3f0   : > { %v5676_v20 = vadd.f32 %v7488_v8, %v11067_v1  ;;  %v7490_v39 = vadd.f32 %v5500_v47, %v11013_v56  ;;  %6030 = vmatprep.mubr.bf16.mxu1 %v5784_v55  ;;  %v12279_v8 = vld [vmem:[#allocation36_spill] sm:$0xff] }
 0x3f1   : > { %v5677_v33 = vadd.f32 %v7489_v42, %v11065_v57  ;;  %6031 = vmatmul.mubr.bf16.gmra.mrb[96].mxu1 %v5783_v23  ;;  %v5739_v62 = vmax.f32 %v5675_v25, 0.0  ;;  %v12280_v42 = vld [vmem:[#allocation39_spill] sm:$0xff] }
 0x3f2   : > { %v5678_v40 = vadd.f32 %v7490_v39, %v11067_v1  ;;  %v5740_v29 = vmax.f32 %v5676_v20, 0.0 }
 0x3f3   : > { %v5741_v37 = vmax.f32 %v5677_v33, 0.0 }
 0x3f4   : > { %v5742_v9 = vmax.f32 %v5678_v40, 0.0  ;;  %v5504_v54 = vpop.f32.mrb[40].mxu0 }
 0x3f5   : > { %v7491_v17 = vadd.f32 %v5504_v54, %v11015_v48  ;;  %v5506_v31 = vpop.f32.mrb[41].mxu0  ;;  %v5785_v50 = vpack.c.bf16 %v5741_v37, %v5739_v62 }
 0x3f6   : > { %v7492_v61 = vadd.f32 %v5506_v31, %v11017_v53  ;;  %v5508_v3 = vpop.f32.mrb[42].mxu0  ;;  %v5786_v32 = vpack.c.bf16 %v5742_v9, %v5740_v29  ;;  %v12281_v9 = vld [vmem:[#allocation50_spill] sm:$0xff] }
 0x3f7   : > { %v5679_v56 = vadd.f32 %v7491_v17, %v11065_v57  ;;  %v7493_v49 = vadd.f32 %v5508_v3, %v11019_v59  ;;  %v5510_v44 = vpop.f32.mrb[43].mxu0 }
 0x3f8   : > { %v5680_v16 = vadd.f32 %v7492_v61, %v11067_v1  ;;  %v7494_v22 = vadd.f32 %v5510_v44, %v11021_v30  ;;  %6038 = vmatprep.mubr.bf16.mxu1 %v5786_v32 }
 0x3f9   : > { %v5681_v63 = vadd.f32 %v7493_v49, %v11065_v57  ;;  %6039 = vmatmul.mubr.bf16.gmra.mrb[100].mxu1 %v5785_v50  ;;  %v5743_v27 = vmax.f32 %v5679_v56, 0.0  ;;  %v12282_v50 = vld [vmem:[#allocation40_spill] sm:$0xff]  ;;  %v12283_v49 = vld [vmem:[#allocation43_spill] sm:$0xff] }
 0x3fa   : > { %v5682_v48 = vadd.f32 %v7494_v22, %v11067_v1  ;;  %v5744_v53 = vmax.f32 %v5680_v16, 0.0 }
 0x3fb   : > { %v5745_v14 = vmax.f32 %v5681_v63, 0.0  ;;  %v12284_v63 = vld [vmem:[#allocation57_spill] sm:$0xff] }
 0x3fc   : > { %v5746_v15 = vmax.f32 %v5682_v48, 0.0  ;;  %v5514_v34 = vpop.f32.mrb[44].mxu0 }
 0x3fd   : > { %v7495_v7 = vadd.f32 %v5514_v34, %v11023_v11  ;;  %v5516_v4 = vpop.f32.mrb[45].mxu0  ;;  %v5787_v59 = vpack.c.bf16 %v5745_v14, %v5743_v27 }
 0x3fe   : > { %v7496_v13 = vadd.f32 %v5516_v4, %v11025_v41  ;;  %v5518_v2 = vpop.f32.mrb[46].mxu0  ;;  %v5788_v12 = vpack.c.bf16 %v5746_v15, %v5744_v53 }
 0x3ff   : > { %v5683_v30 = vadd.f32 %v7495_v7, %v11065_v57  ;;  %v7497_v10 = vadd.f32 %v5518_v2, %v12275_v5  ;;  %v5520_v28 = vpop.f32.mrb[47].mxu0 }
 0x400   : > { %v5684_v18 = vadd.f32 %v7496_v13, %v11067_v1  ;;  %v7498_v58 = vadd.f32 %v5520_v28, %v12276_v38  ;;  %6046 = vmatprep.mubr.bf16.mxu1 %v5788_v12  ;;  %v12287_v38 = vld [vmem:[#allocation65_spill] sm:$0xff] }
 0x401   : > { %v5685_v36 = vadd.f32 %v7497_v10, %v11065_v57  ;;  %6047 = vmatmul.mubr.bf16.gmra.mrb[104].mxu1 %v5787_v59  ;;  %v5747_v0 = vmax.f32 %v5683_v30, 0.0  ;;  %v12285_v59 = vld [vmem:[#allocation54_spill] sm:$0xff] }
 0x402   : > { %v5686_v11 = vadd.f32 %v7498_v58, %v11067_v1  ;;  %v5748_v41 = vmax.f32 %v5684_v18, 0.0  ;;  %v12286_v30 = vld [vmem:[#allocation66_spill] sm:$0xff] }
 0x403   : > { %v5749_v43 = vmax.f32 %v5685_v36, 0.0 }
 0x404   : > { %v5750_v52 = vmax.f32 %v5686_v11, 0.0  ;;  %v5524_v6 = vpop.f32.mrb[48].mxu0 }
 0x405   : > { %v7499_v46 = vadd.f32 %v5524_v6, %v12277_v19  ;;  %v5526_v35 = vpop.f32.mrb[49].mxu0  ;;  %v5789_v51 = vpack.c.bf16 %v5749_v43, %v5747_v0  ;;  %v12288_v0 = vld [vmem:[#allocation71_spill] sm:$0xff] }
 0x406   : > { %v7500_v45 = vadd.f32 %v5526_v35, %v12278_v21  ;;  %v5528_v24 = vpop.f32.mrb[50].mxu0  ;;  %v5790_v26 = vpack.c.bf16 %v5750_v52, %v5748_v41  ;;  %v12289_v21 = vld [vmem:[#allocation74_spill] sm:$0xff] }
 0x407   : > { %v5687_v23 = vadd.f32 %v7499_v46, %v11065_v57  ;;  %v7501_v60 = vadd.f32 %v5528_v24, %v12279_v8  ;;  %v5530_v55 = vpop.f32.mrb[51].mxu0 }
 0x408   : > { %v5688_v25 = vadd.f32 %v7500_v45, %v11067_v1  ;;  %v7502_v47 = vadd.f32 %v5530_v55, %v12280_v42  ;;  %6054 = vmatprep.mubr.bf16.mxu1 %v5790_v26  ;;  %v12291_v42 = vld [vmem:[#allocation77_spill] sm:$0xff] }
 0x409   : > { %v5689_v20 = vadd.f32 %v7501_v60, %v11065_v57  ;;  %6055 = vmatmul.mubr.bf16.gmra.mrb[108].mxu1 %v5789_v51  ;;  %v5751_v33 = vmax.f32 %v5687_v23, 0.0  ;;  %v12290_v23 = vld [vmem:[#allocation73_spill] sm:$0xff] }
 0x40a   : > { %v5690_v39 = vadd.f32 %v7502_v47, %v11067_v1  ;;  %v5752_v62 = vmax.f32 %v5688_v25, 0.0 }
 0x40b   : > { %v5753_v40 = vmax.f32 %v5689_v20, 0.0 }
 0x40c   : > { %v5754_v37 = vmax.f32 %v5690_v39, 0.0  ;;  %v5534_v29 = vpop.f32.mrb[52].mxu0 }
 0x40d   : > { %v7503_v54 = vadd.f32 %v5534_v29, %v12281_v9  ;;  %v5536_v17 = vpop.f32.mrb[53].mxu0  ;;  %v5791_v31 = vpack.c.bf16 %v5753_v40, %v5751_v33  ;;  %v12292_v33 = vld [vmem:[#allocation47_spill] sm:$0xff] }
 0x40e   : > { %v7504_v61 = vadd.f32 %v5536_v17, %v12282_v50  ;;  %v5538_v3 = vpop.f32.mrb[54].mxu0  ;;  %v5792_v32 = vpack.c.bf16 %v5754_v37, %v5752_v62 }
 0x40f   : > { %v5691_v56 = vadd.f32 %v7503_v54, %v11065_v57  ;;  %v7505_v44 = vadd.f32 %v5538_v3, %v12283_v49  ;;  %v5540_v16 = vpop.f32.mrb[55].mxu0  ;;  %v11200_v3 = vld [vmem:[#allocation9] ss:$0 sm:$0xff] }
 0x410   : > { %v5692_v22 = vadd.f32 %v7504_v61, %v11067_v1  ;;  %v7506_v48 = vadd.f32 %v5540_v16, %v12284_v63  ;;  %6062 = vmatprep.mubr.bf16.mxu1 %v5792_v32 }
 0x411   : > { %v5693_v27 = vadd.f32 %v7505_v44, %v11065_v57  ;;  %6063 = vmatmul.mubr.bf16.gmra.mrb[112].mxu1 %v5791_v31  ;;  %v5755_v53 = vmax.f32 %v5691_v56, 0.0 }
 0x412   : > { %v5694_v14 = vadd.f32 %v7506_v48, %v11067_v1  ;;  %v5756_v34 = vmax.f32 %v5692_v22, 0.0 }
 0x413   : > { %v5757_v15 = vmax.f32 %v5693_v27, 0.0 }
 0x414   : > { %v5758_v7 = vmax.f32 %v5694_v14, 0.0  ;;  %v5544_v4 = vpop.f32.mrb[56].mxu0 }
 0x415   : > { %v7507_v13 = vadd.f32 %v5544_v4, %v12285_v59  ;;  %v5546_v2 = vpop.f32.mrb[57].mxu0  ;;  %v5793_v12 = vpack.c.bf16 %v5757_v15, %v5755_v53 }
 0x416   : > { %v7508_v5 = vadd.f32 %v5546_v2, %v12286_v30  ;;  %v5548_v10 = vpop.f32.mrb[58].mxu0  ;;  %v5794_v28 = vpack.c.bf16 %v5758_v7, %v5756_v34 }
 0x417   : > { %v5695_v18 = vadd.f32 %v7507_v13, %v11065_v57  ;;  %v7509_v58 = vadd.f32 %v5548_v10, %v12287_v38  ;;  %v5550_v36 = vpop.f32.mrb[59].mxu0 }
 0x418   : > { %v5696_v11 = vadd.f32 %v7508_v5, %v11067_v1  ;;  %v7510_v43 = vadd.f32 %v5550_v36, %v12288_v0  ;;  %6070 = vmatprep.mubr.bf16.mxu1 %v5794_v28 }
 0x419   : > { %v5697_v41 = vadd.f32 %v7509_v58, %v11065_v57  ;;  %6071 = vmatmul.mubr.bf16.gmra.mrb[116].mxu1 %v5793_v12  ;;  %v5759_v6 = vmax.f32 %v5695_v18, 0.0 }
 0x41a   : > { %v5698_v52 = vadd.f32 %v7510_v43, %v11067_v1  ;;  %v5760_v46 = vmax.f32 %v5696_v11, 0.0 }
 0x41b   : > { %v5761_v19 = vmax.f32 %v5697_v41, 0.0 }
 0x41c   : > { %v5762_v35 = vmax.f32 %v5698_v52, 0.0  ;;  %v5554_v51 = vpop.f32.mrb[60].mxu0 }
 0x41d   : > { %v7511_v45 = vadd.f32 %v5554_v51, %v12289_v21  ;;  %v5556_v24 = vpop.f32.mrb[61].mxu0  ;;  %v5795_v26 = vpack.c.bf16 %v5761_v19, %v5759_v6 }
 0x41e   : > { %v7512_v8 = vadd.f32 %v5556_v24, %v12290_v23  ;;  %v5558_v60 = vpop.f32.mrb[62].mxu0  ;;  %v5796_v55 = vpack.c.bf16 %v5762_v35, %v5760_v46 }
 0x41f   : > { %v5699_v25 = vadd.f32 %v7511_v45, %v11065_v57  ;;  %v7513_v47 = vadd.f32 %v5558_v60, %v12291_v42  ;;  %v5560_v20 = vpop.f32.mrb[63].mxu0 }
 0x420   : > { %v5700_v39 = vadd.f32 %v7512_v8, %v11067_v1  ;;  %v7514_v40 = vadd.f32 %v5560_v20, %v12292_v33  ;;  %6078 = vmatprep.mubr.bf16.mxu1 %v5796_v55 }
 0x421   : > { %v5701_v62 = vadd.f32 %v7513_v47, %v11065_v57  ;;  %6079 = vmatmul.mubr.bf16.gmra.mrb[120].mxu1 %v5795_v26  ;;  %v5763_v29 = vmax.f32 %v5699_v25, 0.0 }
 0x422   : > { %v5702_v37 = vadd.f32 %v7514_v40, %v11067_v1  ;;  %v5764_v54 = vmax.f32 %v5700_v39, 0.0 }
 0x423   : > { %v5765_v9 = vmax.f32 %v5701_v62, 0.0 }
 0x424   : > { %v5766_v17 = vmax.f32 %v5702_v37, 0.0 }
 0x425   : > { %v5797_v31 = vpack.c.bf16 %v5765_v9, %v5763_v29 }
 0x426   : > { %v5798_v50 = vpack.c.bf16 %v5766_v17, %v5764_v54 }
 0x428   : > { %6086 = vmatprep.mubr.bf16.mxu1 %v5798_v50 }
 0x429   : > { %6087 = vmatmul.mubr.bf16.gmra.mrb[124].mxu1 %v5797_v31 }
 0x484   : > { %v7355_v61 = vpop.f32.mrb[64].mxu1 }
 0x485   : > { %v7356_v32 = vpop.f32.mrb[65].mxu1 }
 0x486   : > { %v7357_v56 = vadd.f32 %v7356_v32, %v7355_v61  ;;  %v7358_v57 = vpop.f32.mrb[66].mxu1 }
 0x487   : > { %v7359_v49 = vpop.f32.mrb[67].mxu1 }
 0x488   : > { %v5969_v1 = vadd.f32 %v7357_v56, %v11200_v3  ;;  %v7360_v44 = vadd.f32 %v7359_v49, %v7358_v57 }
 0x48a   : > { %6095 = vst [vmem:[%s11203_s16] sm:$0xff] %v5969_v1  ;;  %v5972_v16 = vadd.f32 %v7360_v44, %v11200_v3 }
 0x48c   : > { %6096 = vst [vmem:[%s11203_s16 + $0x8] sm:$0xff] %v5972_v16  ;;  %v7361_v22 = vpop.f32.mrb[68].mxu1 }
 0x48d   : > { %v7362_v63 = vpop.f32.mrb[69].mxu1 }
 0x48e   : > { %v7363_v48 = vadd.f32 %v7362_v63, %v7361_v22  ;;  %v7364_v27 = vpop.f32.mrb[70].mxu1 }
 0x48f   : > { %v7365_v14 = vpop.f32.mrb[71].mxu1 }
 0x490   : > { %v5977_v53 = vadd.f32 %v7363_v48, %v11200_v3  ;;  %v7366_v15 = vadd.f32 %v7365_v14, %v7364_v27 }
 0x492   : > { %6097 = vst [vmem:[%s11203_s16 + $0x10] sm:$0xff] %v5977_v53  ;;  %v5980_v34 = vadd.f32 %v7366_v15, %v11200_v3 }
 0x494   : > { %6098 = vst [vmem:[%s11203_s16 + $0x18] sm:$0xff] %v5980_v34  ;;  %v7367_v7 = vpop.f32.mrb[72].mxu1 }
 0x495   : > { %v7368_v4 = vpop.f32.mrb[73].mxu1 }
 0x496   : > { %v7369_v59 = vadd.f32 %v7368_v4, %v7367_v7  ;;  %v7370_v13 = vpop.f32.mrb[74].mxu1 }
 0x497   : > { %v7371_v2 = vpop.f32.mrb[75].mxu1 }
 0x498   : > { %v5985_v12 = vadd.f32 %v7369_v59, %v11200_v3  ;;  %v7372_v30 = vadd.f32 %v7371_v2, %v7370_v13 }
 0x49a   : > { %6099 = vst [vmem:[%s11203_s16 + $0x20] sm:$0xff] %v5985_v12  ;;  %v5988_v5 = vadd.f32 %v7372_v30, %v11200_v3 }
 0x49c   : > { %6100 = vst [vmem:[%s11203_s16 + $0x28] sm:$0xff] %v5988_v5  ;;  %v7373_v10 = vpop.f32.mrb[76].mxu1 }
 0x49d   : > { %v7374_v28 = vpop.f32.mrb[77].mxu1 }
 0x49e   : > { %v7375_v18 = vadd.f32 %v7374_v28, %v7373_v10  ;;  %v7376_v38 = vpop.f32.mrb[78].mxu1 }
 0x49f   : > { %v7377_v58 = vpop.f32.mrb[79].mxu1 }
 0x4a0   : > { %v5993_v36 = vadd.f32 %v7375_v18, %v11200_v3  ;;  %v7378_v11 = vadd.f32 %v7377_v58, %v7376_v38 }
 0x4a2   : > { %6101 = vst [vmem:[%s11203_s16 + $0x30] sm:$0xff] %v5993_v36  ;;  %v5996_v0 = vadd.f32 %v7378_v11, %v11200_v3 }
 0x4a4   : > { %6102 = vst [vmem:[%s11203_s16 + $0x38] sm:$0xff] %v5996_v0  ;;  %v7379_v43 = vpop.f32.mrb[80].mxu1 }
 0x4a5   : > { %v7380_v41 = vpop.f32.mrb[81].mxu1 }
 0x4a6   : > { %v7381_v52 = vadd.f32 %v7380_v41, %v7379_v43  ;;  %v7382_v6 = vpop.f32.mrb[82].mxu1 }
 0x4a7   : > { %v7383_v19 = vpop.f32.mrb[83].mxu1 }
 0x4a8   : > { %v6001_v46 = vadd.f32 %v7381_v52, %v11200_v3  ;;  %v7384_v35 = vadd.f32 %v7383_v19, %v7382_v6 }
 0x4aa   : > { %6103 = vst [vmem:[%s11203_s16 + $0x40] sm:$0xff] %v6001_v46  ;;  %v6004_v51 = vadd.f32 %v7384_v35, %v11200_v3 }
 0x4ac   : > { %6104 = vst [vmem:[%s11203_s16 + $0x48] sm:$0xff] %v6004_v51  ;;  %v7385_v21 = vpop.f32.mrb[84].mxu1 }
 0x4ad   : > { %v7386_v45 = vpop.f32.mrb[85].mxu1 }
 0x4ae   : > { %v7387_v24 = vadd.f32 %v7386_v45, %v7385_v21  ;;  %v7388_v26 = vpop.f32.mrb[86].mxu1 }
 0x4af   : > { %v7389_v23 = vpop.f32.mrb[87].mxu1 }
 0x4b0   : > { %v6009_v8 = vadd.f32 %v7387_v24, %v11200_v3  ;;  %v7390_v60 = vadd.f32 %v7389_v23, %v7388_v26 }
 0x4b2   : > { %6105 = vst [vmem:[%s11203_s16 + $0x50] sm:$0xff] %v6009_v8  ;;  %v6012_v55 = vadd.f32 %v7390_v60, %v11200_v3 }
 0x4b4   : > { %6106 = vst [vmem:[%s11203_s16 + $0x58] sm:$0xff] %v6012_v55  ;;  %v7391_v25 = vpop.f32.mrb[88].mxu1 }
 0x4b5   : > { %v7392_v42 = vpop.f32.mrb[89].mxu1 }
 0x4b6   : > { %v7393_v47 = vadd.f32 %v7392_v42, %v7391_v25  ;;  %v7394_v20 = vpop.f32.mrb[90].mxu1 }
 0x4b7   : > { %v7395_v39 = vpop.f32.mrb[91].mxu1 }
 0x4b8   : > { %v6017_v33 = vadd.f32 %v7393_v47, %v11200_v3  ;;  %v7396_v40 = vadd.f32 %v7395_v39, %v7394_v20 }
 0x4ba   : > { %6107 = vst [vmem:[%s11203_s16 + $0x60] sm:$0xff] %v6017_v33  ;;  %v6020_v62 = vadd.f32 %v7396_v40, %v11200_v3 }
 0x4bc   : > { %6108 = vst [vmem:[%s11203_s16 + $0x68] sm:$0xff] %v6020_v62  ;;  %v7397_v37 = vpop.f32.mrb[92].mxu1 }
 0x4bd   : > { %v7398_v29 = vpop.f32.mrb[93].mxu1 }
 0x4be   : > { %v7399_v9 = vadd.f32 %v7398_v29, %v7397_v37  ;;  %v7400_v54 = vpop.f32.mrb[94].mxu1 }
 0x4bf   : > { %v7401_v17 = vpop.f32.mrb[95].mxu1 }
 0x4c0   : > { %v6025_v31 = vadd.f32 %v7399_v9, %v11200_v3  ;;  %v7402_v50 = vadd.f32 %v7401_v17, %v7400_v54 }
 0x4c2   : > { %6109 = vst [vmem:[%s11203_s16 + $0x70] sm:$0xff] %v6025_v31  ;;  %v6028_v61 = vadd.f32 %v7402_v50, %v11200_v3 }
 0x4c4   : > { %6110 = vst [vmem:[%s11203_s16 + $0x78] sm:$0xff] %v6028_v61  ;;  %v7403_v32 = vpop.f32.mrb[96].mxu1 }
 0x4c5   : > { %v7404_v56 = vpop.f32.mrb[97].mxu1 }
 0x4c6   : > { %v7405_v57 = vadd.f32 %v7404_v56, %v7403_v32  ;;  %v7406_v49 = vpop.f32.mrb[98].mxu1 }
 0x4c7   : > { %v7407_v1 = vpop.f32.mrb[99].mxu1 }
 0x4c8   : > { %v6033_v44 = vadd.f32 %v7405_v57, %v11200_v3  ;;  %v7408_v16 = vadd.f32 %v7407_v1, %v7406_v49 }
 0x4ca   : > { %6111 = vst [vmem:[%s11203_s16 + $0x80] sm:$0xff] %v6033_v44  ;;  %v6036_v22 = vadd.f32 %v7408_v16, %v11200_v3 }
 0x4cc   : > { %6112 = vst [vmem:[%s11203_s16 + $0x88] sm:$0xff] %v6036_v22  ;;  %v7409_v63 = vpop.f32.mrb[100].mxu1 }
 0x4cd   : > { %v7410_v48 = vpop.f32.mrb[101].mxu1 }
 0x4ce   : > { %v7411_v27 = vadd.f32 %v7410_v48, %v7409_v63  ;;  %v7412_v14 = vpop.f32.mrb[102].mxu1 }
 0x4cf   : > { %v7413_v53 = vpop.f32.mrb[103].mxu1 }
 0x4d0   : > { %v6041_v15 = vadd.f32 %v7411_v27, %v11200_v3  ;;  %v7414_v34 = vadd.f32 %v7413_v53, %v7412_v14 }
 0x4d2   : > { %6113 = vst [vmem:[%s11203_s16 + $0x90] sm:$0xff] %v6041_v15  ;;  %v6044_v7 = vadd.f32 %v7414_v34, %v11200_v3 }
 0x4d4   : > { %6114 = vst [vmem:[%s11203_s16 + $0x98] sm:$0xff] %v6044_v7  ;;  %v7415_v4 = vpop.f32.mrb[104].mxu1 }
 0x4d5   : > { %v7416_v59 = vpop.f32.mrb[105].mxu1 }
 0x4d6   : > { %v7417_v13 = vadd.f32 %v7416_v59, %v7415_v4  ;;  %v7418_v2 = vpop.f32.mrb[106].mxu1 }
 0x4d7   : > { %v7419_v12 = vpop.f32.mrb[107].mxu1 }
 0x4d8   : > { %v6049_v30 = vadd.f32 %v7417_v13, %v11200_v3  ;;  %v7420_v5 = vadd.f32 %v7419_v12, %v7418_v2 }
 0x4da   : > { %6115 = vst [vmem:[%s11203_s16 + $0xa0] sm:$0xff] %v6049_v30  ;;  %v6052_v10 = vadd.f32 %v7420_v5, %v11200_v3 }
 0x4dc   : > { %6116 = vst [vmem:[%s11203_s16 + $0xa8] sm:$0xff] %v6052_v10  ;;  %v7421_v28 = vpop.f32.mrb[108].mxu1 }
 0x4dd   : > { %v7422_v18 = vpop.f32.mrb[109].mxu1 }
 0x4de   : > { %v7423_v38 = vadd.f32 %v7422_v18, %v7421_v28  ;;  %v7424_v58 = vpop.f32.mrb[110].mxu1 }
 0x4df   : > { %v7425_v36 = vpop.f32.mrb[111].mxu1 }
 0x4e0   : > { %v6057_v11 = vadd.f32 %v7423_v38, %v11200_v3  ;;  %v7426_v0 = vadd.f32 %v7425_v36, %v7424_v58 }
 0x4e2   : > { %6117 = vst [vmem:[%s11203_s16 + $0xb0] sm:$0xff] %v6057_v11  ;;  %v6060_v43 = vadd.f32 %v7426_v0, %v11200_v3 }
 0x4e4   : > { %6118 = vst [vmem:[%s11203_s16 + $0xb8] sm:$0xff] %v6060_v43  ;;  %v7427_v41 = vpop.f32.mrb[112].mxu1 }
 0x4e5   : > { %v7428_v52 = vpop.f32.mrb[113].mxu1 }
 0x4e6   : > { %v7429_v6 = vadd.f32 %v7428_v52, %v7427_v41  ;;  %v7430_v19 = vpop.f32.mrb[114].mxu1 }
 0x4e7   : > { %v7431_v46 = vpop.f32.mrb[115].mxu1 }
 0x4e8   : > { %v6065_v35 = vadd.f32 %v7429_v6, %v11200_v3  ;;  %v7432_v51 = vadd.f32 %v7431_v46, %v7430_v19 }
 0x4ea   : > { %6119 = vst [vmem:[%s11203_s16 + $0xc0] sm:$0xff] %v6065_v35  ;;  %v6068_v21 = vadd.f32 %v7432_v51, %v11200_v3 }
 0x4ec   : > { %6120 = vst [vmem:[%s11203_s16 + $0xc8] sm:$0xff] %v6068_v21  ;;  %v7433_v45 = vpop.f32.mrb[116].mxu1 }
 0x4ed   : > { %v7434_v24 = vpop.f32.mrb[117].mxu1 }
 0x4ee   : > { %v7435_v26 = vadd.f32 %v7434_v24, %v7433_v45  ;;  %v7436_v23 = vpop.f32.mrb[118].mxu1 }
 0x4ef   : > { %v7437_v8 = vpop.f32.mrb[119].mxu1 }
 0x4f0   : > { %v6073_v60 = vadd.f32 %v7435_v26, %v11200_v3  ;;  %v7438_v55 = vadd.f32 %v7437_v8, %v7436_v23 }
 0x4f2   : > { %6121 = vst [vmem:[%s11203_s16 + $0xd0] sm:$0xff] %v6073_v60  ;;  %v6076_v25 = vadd.f32 %v7438_v55, %v11200_v3 }
 0x4f4   : > { %6122 = vst [vmem:[%s11203_s16 + $0xd8] sm:$0xff] %v6076_v25  ;;  %v7439_v42 = vpop.f32.mrb[120].mxu1 }
 0x4f5   : > { %v7440_v47 = vpop.f32.mrb[121].mxu1 }
 0x4f6   : > { %v7441_v20 = vadd.f32 %v7440_v47, %v7439_v42  ;;  %v7442_v39 = vpop.f32.mrb[122].mxu1 }
 0x4f7   : > { %v7443_v33 = vpop.f32.mrb[123].mxu1 }
 0x4f8   : > { %v6081_v40 = vadd.f32 %v7441_v20, %v11200_v3  ;;  %v7444_v62 = vadd.f32 %v7443_v33, %v7442_v39 }
 0x4fa   : > { %6123 = vst [vmem:[%s11203_s16 + $0xe0] sm:$0xff] %v6081_v40  ;;  %v6084_v37 = vadd.f32 %v7444_v62, %v11200_v3 }
 0x4fc   : > { %6124 = vst [vmem:[%s11203_s16 + $0xe8] sm:$0xff] %v6084_v37  ;;  %v7445_v29 = vpop.f32.mrb[124].mxu1 }
 0x4fd   : > { %v7446_v9 = vpop.f32.mrb[125].mxu1 }
 0x4fe   : > { %v7447_v54 = vadd.f32 %v7446_v9, %v7445_v29  ;;  %v7448_v17 = vpop.f32.mrb[126].mxu1 }
 0x4ff   : > { %v7449_v31 = vpop.f32.mrb[127].mxu1 }
 0x500   : > { %v6089_v50 = vadd.f32 %v7447_v54, %v11200_v3  ;;  %v7450_v61 = vadd.f32 %v7449_v31, %v7448_v17 }
 0x502   : > { %6125 = vst [vmem:[%s11203_s16 + $0xf0] sm:$0xff] %v6089_v50  ;;  %v6092_v32 = vadd.f32 %v7450_v61, %v11200_v3 }
 0x504   : > { %6126 = vst [vmem:[%s11203_s16 + $0xf8] sm:$0xff] %v6092_v32 }
 0x505   : > { %8699 = shalt.err (!%p8696_p1)
}
 0x506   : > { %s8700_s1 = scalar_lea.hbm %s11270_s11, 4096  ;;  %s8704_s23 = scalar_lea.hbm %s11325_s5, 8192 }
 0x507   : > { %p8701_p0 = scmp.ne.s32.totalorder %s11270_s11, %s8700_s1  ;;  %p8705_p9 = scmp.lt.u32.totalorder %s11270_s11, %s11325_s5 }
 0x508   : > { %p8706_p12 = scmp.lt.u32.totalorder %s8704_s23, %s8700_s1  ;;  %p8708_p2 = scmp.lt.u32.totalorder %s8700_s1, %s11270_s11 }
 0x509   : > { %p8702_p6 = pnand %p8701_p0, %p12293_p3 }
 0x50a   : > { %p8707_p10 = por %p8706_p12, %p8705_p9 }
 0x50b   : > { %p8703_p5 = pneg %p8702_p6 }
 0x50c   : > { %p8709_p4 = por %p8708_p2, %p8707_p10 }
 0x50e   : > { %p8710_p7 = pnand %p8709_p4, %p8703_p5 }
 0x510   : > { %8713 = shalt.err (!%p8710_p7)
}
 0x511   : > { %s8773_s15 = smov 128   ;;  %s8774_s16 = smov 8  }
 0x512   : > { %7979 = dma.vmem_to_hbm [thread:$0]  (%p12293_p3), %s11272_s25, 4096, %s11270_s11, %s11279_s22, %s8773_s15, %s8773_s15, %s8774_s16  }
 0x513 PF: > { %p8038_p8 = scmp.ge.s32.totalorder %s8760_s21, 2  ;;  %s6156_s17 = sand.u32 1, %s8748_s18  }
 0x514   : > { %p12294_p11 = scmp.ne.s32.totalorder %s11662_s29, 0  ;;  %s6157_s26 = scalar_lea.sflag [#allocation5], %s6156_s17 }
 0x516   : > { %p7995_p13 = pnand %p8038_p8, %p12294_p11 }
 0x518   : > { %8743 = dma.done.wait (!%p7995_p13), %s6157_s26, 4096  }
 0x519   : > { %8745 = vsyncadd (!%p7995_p13), %s6157_s26, 4294963200  ;;  %p18_p1 = scmp.ge.s32.totalorder %s8830_s24, 4   ;;  %s12295_s18 = smov %s8752_s19 }
 0x51a   : > { %s12296_s19 = smov %s8756_s20  ;;  %s12297_s20 = smov %s8841_s27 }
 0x51b   : > { %s12298_s21 = smov %s8830_s24  ;;  %20 = sbr.rel (!%p18_p1) target bundleno = 8 (0x8), region = 94 }
 0x522   :  { %6162 = vsyncpa [#allocation4], 1 }
 0x523   :  { %6164 = vsyncpa [#allocation4 + $0x1], 1 }
 0x524   :  { %6165 = vsyncpa [#allocation7], 1 }
 0x525   :  { %6166 = vsyncpa [#allocation10], 1 }
 0x526   :  { %6167 = vsyncpa [#allocation5], 1 }
 0x527   :  { %6169 = vsyncpa [#allocation5 + $0x1], 1 }

</bundles_post_ra>
